<compile_context>
chip_gen: v7x
topology: tpu7x:2x2x1
jax: 0.10.0
libtpu: 0.0.40
codegen_flags: <defaults>
</compile_context>

<pallas_src>
import functools

import jax
import jax.numpy as jnp
from jax.experimental import pallas as pl
from jax.experimental.pallas import tpu as pltpu

LN_EPS = 1e-12          # DistilBERT LayerNorm eps
C_PAD = 128             # lane-dense padded class dimension
MASK_BIAS = -1e30       # additive key-mask bias (HF masked_fill equivalent)


def _layernorm(x, gamma, beta):
    # two-pass (centered) variance in f32 — avoids E[x^2]-mu^2 cancellation.
    mu = jnp.mean(x, axis=-1, keepdims=True)
    xc = x - mu
    var = jnp.mean(xc * xc, axis=-1, keepdims=True)
    return xc * jax.lax.rsqrt(var + LN_EPS) * gamma + beta


def _gelu_erf(x):
    # Exact GELU: 0.5*x*(1+erf(x/sqrt(2))) with an Abramowitz-Stegun 7.1.26 erf
    # polynomial (max abs err ~1.5e-7).  Only mul/add/exp/where -> lowers cleanly on
    # all TPU generations; far closer to HF's erf GELU than the tanh approximation.
    z = x * 0.7071067811865476
    az = jnp.abs(z)
    t = 1.0 / (1.0 + 0.3275911 * az)
    poly = ((((1.061405429 * t - 1.453152027) * t + 1.421413741) * t
             - 0.284496736) * t + 0.254829592) * t
    erf_abs = 1.0 - poly * jnp.exp(-az * az)
    erf = jnp.where(z >= 0.0, erf_abs, -erf_abs)
    return 0.5 * x * (1.0 + erf)


# ---------------------------------------------------------------------------
# Single fused kernel: one grid step per batch block; whole network inside.
# ---------------------------------------------------------------------------
def dbert_fused_kernel(emb_ref, bias_ref, embg_ref, embb_ref,
                       wqkv_ref, bqkv_ref, wo_ref, bo_ref,
                       ln1g_ref, ln1b_ref, w1_ref, b1_ref, w2_ref, b2_ref,
                       ln2g_ref, ln2b_ref, clsw_ref, clsb_ref,
                       out_ref, x_sc, ctx_sc, *, n_heads, seq_len):
    R, H = x_sc.shape                    # R = BB * S folded batch rows
    S = seq_len
    BB = R // S
    dh = H // n_heads
    scale = 1.0 / float(dh) ** 0.5
    n_layers = wqkv_ref.shape[0]

    # ---- embeddings (word + pos already summed in wrapper) + LayerNorm ----
    x_sc[...] = _layernorm(emb_ref[...], embg_ref[...], embb_ref[...])

    # ---- transformer layers: weights VMEM-resident, loop unrolled at trace time ----
    for l in range(n_layers):
        x = x_sc[...]                                   # (R, H) f32
        xb = x.astype(jnp.bfloat16)

        # fused QKV projection: one (R,H)x(H,3H) MXU matmul
        qkv = jnp.dot(xb, wqkv_ref[l],
                      preferred_element_type=jnp.float32) + bqkv_ref[l]
        q = qkv[:, 0:H] * scale
        k = qkv[:, H:2 * H]
        v = qkv[:, 2 * H:3 * H]

        # attention is block-diagonal over the folded batch rows: per sequence, per head
        for bb in range(BB):
            r0 = bb * S
            kb = k[r0:r0 + S].astype(jnp.bfloat16)      # (S, H)
            vb = v[r0:r0 + S].astype(jnp.bfloat16)      # (S, H)
            bias_row = bias_ref[bb:bb + 1, :]           # (1, S) additive key mask
            for h in range(n_heads):
                lo = h * dh
                qh = q[r0:r0 + S, lo:lo + dh].astype(jnp.bfloat16)
                # q @ k^T via NT dot_general (no materialized transpose)
                s = jax.lax.dot_general(qh, kb[:, lo:lo + dh],
                                        (((1,), (1,)), ((), ())),
                                        preferred_element_type=jnp.float32)  # (S, S)
                s = s + bias_row
                m = jnp.max(s, axis=-1, keepdims=True)
                p = jnp.exp(s - m)
                p = p / jnp.sum(p, axis=-1, keepdims=True)   # exact normalization
                # write head context into its lane slice (no lane-wise concatenate)
                ctx_sc[r0:r0 + S, lo:lo + dh] = jnp.dot(
                    p.astype(jnp.bfloat16), vb[:, lo:lo + dh],
                    preferred_element_type=jnp.float32)

        # output projection: one full-K (R,H)x(H,H) matmul on the context slab
        attn = jnp.dot(ctx_sc[...].astype(jnp.bfloat16), wo_ref[l],
                       preferred_element_type=jnp.float32) + bo_ref[l]
        h1 = _layernorm(x + attn, ln1g_ref[l], ln1b_ref[l])

        # FFN: Linear -> exact-erf GELU -> Linear
        ff = jnp.dot(h1.astype(jnp.bfloat16), w1_ref[l],
                     preferred_element_type=jnp.float32) + b1_ref[l]
        ff = _gelu_erf(ff)
        ff = jnp.dot(ff.astype(jnp.bfloat16), w2_ref[l],
                     preferred_element_type=jnp.float32) + b2_ref[l]

        x_sc[...] = _layernorm(h1 + ff, ln2g_ref[l], ln2b_ref[l])

    # ---- classifier: concat(token0, token1) @ W + Softmax (lane-dense padded slab) ----
    h2 = x_sc[...]
    w = clsw_ref[...]                                   # (2H, C_PAD) bf16
    for bb in range(BB):
        r0 = bb * S
        t0 = h2[r0:r0 + 1, :].astype(jnp.bfloat16)      # token-0 hidden state (1, H)
        t1 = h2[r0 + 1:r0 + 2, :].astype(jnp.bfloat16)  # token-1 hidden state (1, H)
        # concat([t0, t1]) @ W == t0 @ W[:H] + t1 @ W[H:]  (avoids in-kernel reshape)
        logits = (jnp.dot(t0, w[0:H, :], preferred_element_type=jnp.float32)
                  + jnp.dot(t1, w[H:2 * H, :], preferred_element_type=jnp.float32)
                  + clsb_ref[...])                      # (1, C_PAD); pad lanes biased -1e30
        m = jnp.max(logits, axis=-1, keepdims=True)
        e = jnp.exp(logits - m)
        out_ref[bb:bb + 1, :] = e / jnp.sum(e, axis=-1, keepdims=True)


# ---------------------------------------------------------------------------
# Parameter packing (done once): stack per-layer weights on a leading L axis,
# cast matmul weights to bf16, pad classifier to a lane-dense 128-wide slab.
# ---------------------------------------------------------------------------
def pack_params(params):
    H = params["word_emb"].shape[1]
    n_classes = params["cls_w"].shape[1]
    layers = params["layers"]

    def stack(name):
        return jnp.stack([l[name] for l in layers])

    return {
        "n_heads": params["n_heads"],
        "n_classes": n_classes,
        "word_emb": params["word_emb"],
        "pos_emb": params["pos_emb"],
        "emb_ln_g": params["emb_ln_g"].reshape(1, H),
        "emb_ln_b": params["emb_ln_b"].reshape(1, H),
        "w_qkv": jnp.stack([jnp.concatenate([l["wq"], l["wk"], l["wv"]], axis=1)
                            for l in layers]).astype(jnp.bfloat16),      # (L, H, 3H)
        "b_qkv": jnp.stack([jnp.concatenate([l["bq"], l["bk"], l["bv"]])[None, :]
                            for l in layers]),                           # (L, 1, 3H)
        "wo": stack("wo").astype(jnp.bfloat16),                          # (L, H, H)
        "bo": stack("bo")[:, None, :],
        "ln1_g": stack("ln1_g")[:, None, :],
        "ln1_b": stack("ln1_b")[:, None, :],
        "w1": stack("w1").astype(jnp.bfloat16),                          # (L, H, F)
        "b1": stack("b1")[:, None, :],
        "w2": stack("w2").astype(jnp.bfloat16),                          # (L, F, H)
        "b2": stack("b2")[:, None, :],
        "ln2_g": stack("ln2_g")[:, None, :],
        "ln2_b": stack("ln2_b")[:, None, :],
        "cls_w": jnp.pad(params["cls_w"],
                         ((0, 0), (0, C_PAD - n_classes))).astype(jnp.bfloat16),
        "cls_b": jnp.pad(params["cls_b"], (0, C_PAD - n_classes),
                         constant_values=-1e30).reshape(1, C_PAD),
    }


# ---------------------------------------------------------------------------
# Forward wrapper: embedding gather (tiny XLA op) + ONE fused pallas_call.
# ---------------------------------------------------------------------------
def dbert_classifier_forward(packed, input_ids, attention_mask):
    B, S = input_ids.shape
    H = packed["word_emb"].shape[1]
    F = packed["w1"].shape[2]
    L = packed["w_qkv"].shape[0]
    n_heads = packed["n_heads"]
    n_classes = packed["n_classes"]

    # Batch block: fold the whole batch on 1-TC chips (v5e/v6e). On v7x keep
    # B // BB >= 2 so the "parallel" batch axis shards across both TensorCores.
    BB = B
    assert B % BB == 0
    nb = B // BB

    # TODO(synk): at production vocab (30k x 768) keep word_emb in HBM
    # (memory_space=pl.ANY), scalar-prefetch input_ids, and DMA-gather rows + add
    # positional embeddings inside the kernel; at this toy scale the XLA gather is
    # negligible.
    emb = (jnp.take(packed["word_emb"], input_ids, axis=0)
           + packed["pos_emb"][:S][None, :, :]).reshape(B * S, H)       # (B*S, H) f32
    # additive key-side mask bias (0 keep / -1e30 drop), one row per sequence
    mask_bias = (1.0 - attention_mask.astype(jnp.float32)) * MASK_BIAS  # (B, S)

    bat2 = lambda b: (b, 0)             # per-batch-block 2D inputs
    cst2 = lambda b: (0, 0)             # shared 2D constants
    cst3 = lambda b: (0, 0, 0)          # shared, layer-stacked, fully VMEM-resident

    in_specs = [
        pl.BlockSpec((BB * S, H), bat2),             # emb rows (folded batch)
        pl.BlockSpec((BB, S), bat2),                 # additive mask bias
        pl.BlockSpec((1, H), cst2),                  # emb ln gamma
        pl.BlockSpec((1, H), cst2),                  # emb ln beta
        pl.BlockSpec((L, H, 3 * H), cst3),           # w_qkv
        pl.BlockSpec((L, 1, 3 * H), cst3),           # b_qkv
        pl.BlockSpec((L, H, H), cst3),               # wo
        pl.BlockSpec((L, 1, H), cst3),               # bo
        pl.BlockSpec((L, 1, H), cst3),               # ln1_g
        pl.BlockSpec((L, 1, H), cst3),               # ln1_b
        pl.BlockSpec((L, H, F), cst3),               # w1
        pl.BlockSpec((L, 1, F), cst3),               # b1
        pl.BlockSpec((L, F, H), cst3),               # w2
        pl.BlockSpec((L, 1, H), cst3),               # b2
        pl.BlockSpec((L, 1, H), cst3),               # ln2_g
        pl.BlockSpec((L, 1, H), cst3),               # ln2_b
        pl.BlockSpec((2 * H, C_PAD), cst2),          # cls_w (padded)
        pl.BlockSpec((1, C_PAD), cst2),              # cls_b (padded)
    ]

    scores_pad = pl.pallas_call(
        functools.partial(dbert_fused_kernel, n_heads=n_heads, seq_len=S),
        out_shape=jax.ShapeDtypeStruct((B, C_PAD), jnp.float32),
        grid=(nb,),
        in_specs=in_specs,
        out_specs=pl.BlockSpec((BB, C_PAD), bat2),
        scratch_shapes=[pltpu.VMEM((BB * S, H), jnp.float32),   # resident activations
                        pltpu.VMEM((BB * S, H), jnp.float32)],  # attention context slab
        compiler_params=pltpu.CompilerParams(
            dimension_semantics=("parallel",),
            vmem_limit_bytes=32 * 1024 * 1024),
    )(emb, mask_bias, packed["emb_ln_g"], packed["emb_ln_b"],
      packed["w_qkv"], packed["b_qkv"], packed["wo"], packed["bo"],
      packed["ln1_g"], packed["ln1_b"], packed["w1"], packed["b1"],
      packed["w2"], packed["b2"], packed["ln2_g"], packed["ln2_b"],
      packed["cls_w"], packed["cls_b"])

    return scores_pad[:, :n_classes]


def init_params(key, vocab, max_pos, hidden, n_heads, ffn, n_layers, n_classes):
    std = 0.02
    keys = iter(jax.random.split(key, 8 + 8 * n_layers))

    def nrm(shape):
        return std * jax.random.normal(next(keys), shape, jnp.float32)

    params = {
        "n_heads": n_heads,
        "word_emb": nrm((vocab, hidden)),
        "pos_emb": nrm((max_pos, hidden)),
        "emb_ln_g": jnp.ones((hidden,), jnp.float32),
        "emb_ln_b": jnp.zeros((hidden,), jnp.float32),
        "layers": [],
        "cls_w": nrm((2 * hidden, n_classes)),
        "cls_b": jnp.zeros((n_classes,), jnp.float32),
    }
    for _ in range(n_layers):
        params["layers"].append({
            "wq": nrm((hidden, hidden)), "bq": jnp.zeros((hidden,), jnp.float32),
            "wk": nrm((hidden, hidden)), "bk": jnp.zeros((hidden,), jnp.float32),
            "wv": nrm((hidden, hidden)), "bv": jnp.zeros((hidden,), jnp.float32),
            "wo": nrm((hidden, hidden)), "bo": jnp.zeros((hidden,), jnp.float32),
            "ln1_g": jnp.ones((hidden,), jnp.float32),
            "ln1_b": jnp.zeros((hidden,), jnp.float32),
            "w1": nrm((hidden, ffn)), "b1": jnp.zeros((ffn,), jnp.float32),
            "w2": nrm((ffn, hidden)), "b2": jnp.zeros((hidden,), jnp.float32),
            "ln2_g": jnp.ones((hidden,), jnp.float32),
            "ln2_b": jnp.zeros((hidden,), jnp.float32),
        })
    return params


if __name__ == "__main__":
    B, S = 2, 8
    HIDDEN, N_HEADS, FFN = 64, 2, 128
    VOCAB, MAX_POS, N_LAYERS, N_CLASSES = 128, 32, 2, 2

    root = jax.random.PRNGKey(0)
    k_param, k_ids = jax.random.split(root)

    params = init_params(k_param, VOCAB, MAX_POS, HIDDEN, N_HEADS, FFN,
                         N_LAYERS, N_CLASSES)
    packed = pack_params(params)

    input_ids = jax.random.randint(k_ids, (B, S), 0, VOCAB, dtype=jnp.int32)
    attention_mask = jnp.ones((B, S), dtype=jnp.int32)

    scores = dbert_classifier_forward(packed, input_ids, attention_mask)
    scores = jax.block_until_ready(scores)

    assert scores.shape == (B, N_CLASSES)
    assert bool(jnp.all(jnp.isfinite(scores)))
    # softmax rows sum to 1 (pad lanes contribute exactly 0)
    assert bool(jnp.allclose(jnp.sum(scores, axis=-1), 1.0, atol=1e-4))
    print("KERNEL_OK")
</pallas_src>

<mosaic_0001>
module attributes {stable_mosaic.version = 11 : i64} {
  func.func @dbert_fused_kernel(%arg0: i32, %arg1: memref<16x64xf32, #tpu.memory_space<vmem>>, %arg2: memref<2x8xf32, #tpu.memory_space<vmem>>, %arg3: memref<1x64xf32, #tpu.memory_space<vmem>>, %arg4: memref<1x64xf32, #tpu.memory_space<vmem>>, %arg5: memref<2x64x192xbf16, #tpu.memory_space<vmem>>, %arg6: memref<2x1x192xf32, #tpu.memory_space<vmem>>, %arg7: memref<2x64x64xbf16, #tpu.memory_space<vmem>>, %arg8: memref<2x1x64xf32, #tpu.memory_space<vmem>>, %arg9: memref<2x1x64xf32, #tpu.memory_space<vmem>>, %arg10: memref<2x1x64xf32, #tpu.memory_space<vmem>>, %arg11: memref<2x64x128xbf16, #tpu.memory_space<vmem>>, %arg12: memref<2x1x128xf32, #tpu.memory_space<vmem>>, %arg13: memref<2x128x64xbf16, #tpu.memory_space<vmem>>, %arg14: memref<2x1x64xf32, #tpu.memory_space<vmem>>, %arg15: memref<2x1x64xf32, #tpu.memory_space<vmem>>, %arg16: memref<2x1x64xf32, #tpu.memory_space<vmem>>, %arg17: memref<128x128xbf16, #tpu.memory_space<vmem>>, %arg18: memref<1x128xf32, #tpu.memory_space<vmem>>, %arg19: memref<2x128xf32, #tpu.memory_space<vmem>>, %arg20: memref<16x64xf32, #tpu.memory_space<vmem>>, %arg21: memref<16x64xf32, #tpu.memory_space<vmem>>) attributes {dimension_semantics = [#tpu.dimension_semantics<parallel>], iteration_bounds = array<i64: 1>, scalar_prefetch = 0 : i64, scratch_operands = 2 : i64, tpu.core_type = #tpu.core_type<tc>, window_params = [{transform_indices = @transform_0, window_bounds = array<i64: 16, 64>}, {transform_indices = @transform_1, window_bounds = array<i64: 2, 8>}, {pipeline_mode = #tpu.pipeline_mode<synchronous>, transform_indices = @transform_2, window_bounds = array<i64: 1, 64>}, {pipeline_mode = #tpu.pipeline_mode<synchronous>, transform_indices = @transform_3, window_bounds = array<i64: 1, 64>}, {pipeline_mode = #tpu.pipeline_mode<synchronous>, transform_indices = @transform_4, window_bounds = array<i64: 2, 64, 192>}, {pipeline_mode = #tpu.pipeline_mode<synchronous>, transform_indices = @transform_5, window_bounds = array<i64: 2, 1, 192>}, {pipeline_mode = #tpu.pipeline_mode<synchronous>, transform_indices = @transform_6, window_bounds = array<i64: 2, 64, 64>}, {pipeline_mode = #tpu.pipeline_mode<synchronous>, transform_indices = @transform_7, window_bounds = array<i64: 2, 1, 64>}, {pipeline_mode = #tpu.pipeline_mode<synchronous>, transform_indices = @transform_8, window_bounds = array<i64: 2, 1, 64>}, {pipeline_mode = #tpu.pipeline_mode<synchronous>, transform_indices = @transform_9, window_bounds = array<i64: 2, 1, 64>}, {pipeline_mode = #tpu.pipeline_mode<synchronous>, transform_indices = @transform_10, window_bounds = array<i64: 2, 64, 128>}, {pipeline_mode = #tpu.pipeline_mode<synchronous>, transform_indices = @transform_11, window_bounds = array<i64: 2, 1, 128>}, {pipeline_mode = #tpu.pipeline_mode<synchronous>, transform_indices = @transform_12, window_bounds = array<i64: 2, 128, 64>}, {pipeline_mode = #tpu.pipeline_mode<synchronous>, transform_indices = @transform_13, window_bounds = array<i64: 2, 1, 64>}, {pipeline_mode = #tpu.pipeline_mode<synchronous>, transform_indices = @transform_14, window_bounds = array<i64: 2, 1, 64>}, {pipeline_mode = #tpu.pipeline_mode<synchronous>, transform_indices = @transform_15, window_bounds = array<i64: 2, 1, 64>}, {pipeline_mode = #tpu.pipeline_mode<synchronous>, transform_indices = @transform_16, window_bounds = array<i64: 128, 128>}, {pipeline_mode = #tpu.pipeline_mode<synchronous>, transform_indices = @transform_17, window_bounds = array<i64: 1, 128>}, {transform_indices = @transform_18, window_bounds = array<i64: 2, 128>}]} {
    %c0 = arith.constant 0 : index
    %c0_0 = arith.constant 0 : index
    %0 = vector.load %arg1[%c0, %c0_0] : memref<16x64xf32, #tpu.memory_space<vmem>>, vector<16x64xf32>
    %c0_1 = arith.constant 0 : index
    %c0_2 = arith.constant 0 : index
    %1 = vector.load %arg3[%c0_1, %c0_2] : memref<1x64xf32, #tpu.memory_space<vmem>>, vector<1x64xf32>
    %c0_3 = arith.constant 0 : index
    %c0_4 = arith.constant 0 : index
    %2 = vector.load %arg4[%c0_3, %c0_4] : memref<1x64xf32, #tpu.memory_space<vmem>>, vector<1x64xf32>
    %cst = arith.constant dense<0.000000e+00> : vector<16xf32>
    %3 = vector.multi_reduction <add>, %0, %cst [1] : vector<16x64xf32> to vector<16xf32>
    %4 = vector.shape_cast %3 : vector<16xf32> to vector<16x1xf32>
    %cst_5 = arith.constant 6.400000e+01 : f32
    %5 = vector.broadcast %cst_5 : f32 to vector<16x1xf32>
    %6 = arith.divf %4, %5 : vector<16x1xf32>
    %7 = vector.broadcast %6 : vector<16x1xf32> to vector<16x64xf32>
    %8 = arith.subf %0, %7 : vector<16x64xf32>
    %9 = arith.mulf %8, %8 : vector<16x64xf32>
    %cst_6 = arith.constant dense<0.000000e+00> : vector<16xf32>
    %10 = vector.multi_reduction <add>, %9, %cst_6 [1] : vector<16x64xf32> to vector<16xf32>
    %11 = vector.shape_cast %10 : vector<16xf32> to vector<16x1xf32>
    %cst_7 = arith.constant 6.400000e+01 : f32
    %12 = vector.broadcast %cst_7 : f32 to vector<16x1xf32>
    %13 = arith.divf %11, %12 : vector<16x1xf32>
    %cst_8 = arith.constant 9.99999996E-13 : f32
    %14 = vector.broadcast %cst_8 : f32 to vector<16x1xf32>
    %15 = arith.addf %13, %14 : vector<16x1xf32>
    %16 = math.rsqrt %15 : vector<16x1xf32>
    %17 = vector.broadcast %16 : vector<16x1xf32> to vector<16x64xf32>
    %18 = arith.mulf %8, %17 : vector<16x64xf32>
    %19 = vector.broadcast %1 : vector<1x64xf32> to vector<16x64xf32>
    %20 = arith.mulf %18, %19 : vector<16x64xf32>
    %21 = vector.broadcast %2 : vector<1x64xf32> to vector<16x64xf32>
    %22 = arith.addf %20, %21 : vector<16x64xf32>
    %c0_9 = arith.constant 0 : index
    %c0_10 = arith.constant 0 : index
    %23 = vector.load %arg20[%c0_9, %c0_10] : memref<16x64xf32, #tpu.memory_space<vmem>>, vector<16x64xf32>
    tpu.vector_store %arg20[%c0_9, %c0_10], %22 {strides = array<i32>} : memref<16x64xf32, #tpu.memory_space<vmem>>, vector<16x64xf32>,
    %c0_11 = arith.constant 0 : index
    %c0_12 = arith.constant 0 : index
    %24 = vector.load %arg20[%c0_11, %c0_12] : memref<16x64xf32, #tpu.memory_space<vmem>>, vector<16x64xf32>
    %25 = arith.truncf %24 : vector<16x64xf32> to vector<16x64xbf16>
    %c0_13 = arith.constant 0 : index
    %c0_14 = arith.constant 0 : index
    %c0_15 = arith.constant 0 : index
    %26 = vector.load %arg5[%c0_13, %c0_14, %c0_15] : memref<2x64x192xbf16, #tpu.memory_space<vmem>>, vector<1x64x192xbf16>
    %27 = vector.shape_cast %26 : vector<1x64x192xbf16> to vector<64x192xbf16>
    %cst_16 = arith.constant dense<0.000000e+00> : vector<16x192xf32>
    %28 = tpu.matmul %25, %27, %cst_16 {dimension_numbers = #tpu.dot_dimension_numbers<[1], [0], [0], [1], [0, 0, 1, 1], [], []>} : vector<16x64xbf16>, vector<64x192xbf16>, vector<16x192xf32> -> vector<16x192xf32>
    %c0_17 = arith.constant 0 : index
    %c0_18 = arith.constant 0 : index
    %c0_19 = arith.constant 0 : index
    %29 = vector.load %arg6[%c0_17, %c0_18, %c0_19] : memref<2x1x192xf32, #tpu.memory_space<vmem>>, vector<1x1x192xf32>
    %30 = vector.shape_cast %29 : vector<1x1x192xf32> to vector<1x192xf32>
    %31 = vector.broadcast %30 : vector<1x192xf32> to vector<16x192xf32>
    %32 = arith.addf %28, %31 : vector<16x192xf32>
    %33 = vector.extract_strided_slice %32 {offsets = [0, 0], sizes = [16, 64], strides = [1, 1]} : vector<16x192xf32> to vector<16x64xf32>
    %cst_20 = arith.constant 0.176776692 : f32
    %34 = vector.broadcast %cst_20 : f32 to vector<16x64xf32>
    %35 = arith.mulf %33, %34 : vector<16x64xf32>
    %36 = vector.extract_strided_slice %32 {offsets = [0, 64], sizes = [16, 64], strides = [1, 1]} : vector<16x192xf32> to vector<16x64xf32>
    %37 = vector.extract_strided_slice %32 {offsets = [0, 128], sizes = [16, 64], strides = [1, 1]} : vector<16x192xf32> to vector<16x64xf32>
    %38 = vector.extract_strided_slice %36 {offsets = [0, 0], sizes = [8, 64], strides = [1, 1]} : vector<16x64xf32> to vector<8x64xf32>
    %39 = arith.truncf %38 : vector<8x64xf32> to vector<8x64xbf16>
    %40 = vector.extract_strided_slice %37 {offsets = [0, 0], sizes = [8, 64], strides = [1, 1]} : vector<16x64xf32> to vector<8x64xf32>
    %41 = arith.truncf %40 : vector<8x64xf32> to vector<8x64xbf16>
    %c0_21 = arith.constant 0 : index
    %c0_22 = arith.constant 0 : index
    %42 = vector.load %arg2[%c0_21, %c0_22] : memref<2x8xf32, #tpu.memory_space<vmem>>, vector<1x8xf32>
    %43 = vector.extract_strided_slice %35 {offsets = [0, 0], sizes = [8, 32], strides = [1, 1]} : vector<16x64xf32> to vector<8x32xf32>
    %44 = arith.truncf %43 : vector<8x32xf32> to vector<8x32xbf16>
    %45 = vector.extract_strided_slice %39 {offsets = [0, 0], sizes = [8, 32], strides = [1, 1]} : vector<8x64xbf16> to vector<8x32xbf16>
    %cst_23 = arith.constant dense<0.000000e+00> : vector<8x8xf32>
    %46 = tpu.matmul %44, %45, %cst_23 {dimension_numbers = #tpu.dot_dimension_numbers<[1], [1], [0], [0], [0, 0, 1, 0], [], []>} : vector<8x32xbf16>, vector<8x32xbf16>, vector<8x8xf32> -> vector<8x8xf32>
    %47 = vector.broadcast %42 : vector<1x8xf32> to vector<8x8xf32>
    %48 = arith.addf %46, %47 : vector<8x8xf32>
    %cst_24 = arith.constant dense<0xFF800000> : vector<8xf32>
    %49 = vector.multi_reduction <maximumf>, %48, %cst_24 [1] : vector<8x8xf32> to vector<8xf32>
    %50 = vector.shape_cast %49 : vector<8xf32> to vector<8x1xf32>
    %51 = vector.broadcast %50 : vector<8x1xf32> to vector<8x8xf32>
    %52 = arith.subf %48, %51 : vector<8x8xf32>
    %53 = math.exp %52 : vector<8x8xf32>
    %cst_25 = arith.constant dense<0.000000e+00> : vector<8xf32>
    %54 = vector.multi_reduction <add>, %53, %cst_25 [1] : vector<8x8xf32> to vector<8xf32>
    %55 = vector.shape_cast %54 : vector<8xf32> to vector<8x1xf32>
    %56 = vector.broadcast %55 : vector<8x1xf32> to vector<8x8xf32>
    %57 = arith.divf %53, %56 : vector<8x8xf32>
    %58 = arith.truncf %57 : vector<8x8xf32> to vector<8x8xbf16>
    %59 = vector.extract_strided_slice %41 {offsets = [0, 0], sizes = [8, 32], strides = [1, 1]} : vector<8x64xbf16> to vector<8x32xbf16>
    %cst_26 = arith.constant dense<0.000000e+00> : vector<8x32xf32>
    %60 = tpu.matmul %58, %59, %cst_26 {dimension_numbers = #tpu.dot_dimension_numbers<[1], [0], [0], [1], [0, 0, 1, 1], [], []>} : vector<8x8xbf16>, vector<8x32xbf16>, vector<8x32xf32> -> vector<8x32xf32>
    %c0_27 = arith.constant 0 : index
    %c0_28 = arith.constant 0 : index
    %61 = vector.load %arg21[%c0_27, %c0_28] : memref<16x64xf32, #tpu.memory_space<vmem>>, vector<8x32xf32>
    tpu.vector_store %arg21[%c0_27, %c0_28], %60 {strides = array<i32>} : memref<16x64xf32, #tpu.memory_space<vmem>>, vector<8x32xf32>,
    %62 = vector.extract_strided_slice %35 {offsets = [0, 32], sizes = [8, 32], strides = [1, 1]} : vector<16x64xf32> to vector<8x32xf32>
    %63 = arith.truncf %62 : vector<8x32xf32> to vector<8x32xbf16>
    %64 = vector.extract_strided_slice %39 {offsets = [0, 32], sizes = [8, 32], strides = [1, 1]} : vector<8x64xbf16> to vector<8x32xbf16>
    %cst_29 = arith.constant dense<0.000000e+00> : vector<8x8xf32>
    %65 = tpu.matmul %63, %64, %cst_29 {dimension_numbers = #tpu.dot_dimension_numbers<[1], [1], [0], [0], [0, 0, 1, 0], [], []>} : vector<8x32xbf16>, vector<8x32xbf16>, vector<8x8xf32> -> vector<8x8xf32>
    %66 = vector.broadcast %42 : vector<1x8xf32> to vector<8x8xf32>
    %67 = arith.addf %65, %66 : vector<8x8xf32>
    %cst_30 = arith.constant dense<0xFF800000> : vector<8xf32>
    %68 = vector.multi_reduction <maximumf>, %67, %cst_30 [1] : vector<8x8xf32> to vector<8xf32>
    %69 = vector.shape_cast %68 : vector<8xf32> to vector<8x1xf32>
    %70 = vector.broadcast %69 : vector<8x1xf32> to vector<8x8xf32>
    %71 = arith.subf %67, %70 : vector<8x8xf32>
    %72 = math.exp %71 : vector<8x8xf32>
    %cst_31 = arith.constant dense<0.000000e+00> : vector<8xf32>
    %73 = vector.multi_reduction <add>, %72, %cst_31 [1] : vector<8x8xf32> to vector<8xf32>
    %74 = vector.shape_cast %73 : vector<8xf32> to vector<8x1xf32>
    %75 = vector.broadcast %74 : vector<8x1xf32> to vector<8x8xf32>
    %76 = arith.divf %72, %75 : vector<8x8xf32>
    %77 = arith.truncf %76 : vector<8x8xf32> to vector<8x8xbf16>
    %78 = vector.extract_strided_slice %41 {offsets = [0, 32], sizes = [8, 32], strides = [1, 1]} : vector<8x64xbf16> to vector<8x32xbf16>
    %cst_32 = arith.constant dense<0.000000e+00> : vector<8x32xf32>
    %79 = tpu.matmul %77, %78, %cst_32 {dimension_numbers = #tpu.dot_dimension_numbers<[1], [0], [0], [1], [0, 0, 1, 1], [], []>} : vector<8x8xbf16>, vector<8x32xbf16>, vector<8x32xf32> -> vector<8x32xf32>
    %c0_33 = arith.constant 0 : index
    %c32 = arith.constant 32 : index
    %80 = vector.load %arg21[%c0_33, %c32] : memref<16x64xf32, #tpu.memory_space<vmem>>, vector<8x32xf32>
    tpu.vector_store %arg21[%c0_33, %c32], %79 {strides = array<i32>} : memref<16x64xf32, #tpu.memory_space<vmem>>, vector<8x32xf32>,
    %81 = vector.extract_strided_slice %36 {offsets = [8, 0], sizes = [8, 64], strides = [1, 1]} : vector<16x64xf32> to vector<8x64xf32>
    %82 = arith.truncf %81 : vector<8x64xf32> to vector<8x64xbf16>
    %83 = vector.extract_strided_slice %37 {offsets = [8, 0], sizes = [8, 64], strides = [1, 1]} : vector<16x64xf32> to vector<8x64xf32>
    %84 = arith.truncf %83 : vector<8x64xf32> to vector<8x64xbf16>
    %c1 = arith.constant 1 : index
    %c0_34 = arith.constant 0 : index
    %85 = vector.load %arg2[%c1, %c0_34] : memref<2x8xf32, #tpu.memory_space<vmem>>, vector<1x8xf32>
    %86 = vector.extract_strided_slice %35 {offsets = [8, 0], sizes = [8, 32], strides = [1, 1]} : vector<16x64xf32> to vector<8x32xf32>
    %87 = arith.truncf %86 : vector<8x32xf32> to vector<8x32xbf16>
    %88 = vector.extract_strided_slice %82 {offsets = [0, 0], sizes = [8, 32], strides = [1, 1]} : vector<8x64xbf16> to vector<8x32xbf16>
    %cst_35 = arith.constant dense<0.000000e+00> : vector<8x8xf32>
    %89 = tpu.matmul %87, %88, %cst_35 {dimension_numbers = #tpu.dot_dimension_numbers<[1], [1], [0], [0], [0, 0, 1, 0], [], []>} : vector<8x32xbf16>, vector<8x32xbf16>, vector<8x8xf32> -> vector<8x8xf32>
    %90 = vector.broadcast %85 : vector<1x8xf32> to vector<8x8xf32>
    %91 = arith.addf %89, %90 : vector<8x8xf32>
    %cst_36 = arith.constant dense<0xFF800000> : vector<8xf32>
    %92 = vector.multi_reduction <maximumf>, %91, %cst_36 [1] : vector<8x8xf32> to vector<8xf32>
    %93 = vector.shape_cast %92 : vector<8xf32> to vector<8x1xf32>
    %94 = vector.broadcast %93 : vector<8x1xf32> to vector<8x8xf32>
    %95 = arith.subf %91, %94 : vector<8x8xf32>
    %96 = math.exp %95 : vector<8x8xf32>
    %cst_37 = arith.constant dense<0.000000e+00> : vector<8xf32>
    %97 = vector.multi_reduction <add>, %96, %cst_37 [1] : vector<8x8xf32> to vector<8xf32>
    %98 = vector.shape_cast %97 : vector<8xf32> to vector<8x1xf32>
    %99 = vector.broadcast %98 : vector<8x1xf32> to vector<8x8xf32>
    %100 = arith.divf %96, %99 : vector<8x8xf32>
    %101 = arith.truncf %100 : vector<8x8xf32> to vector<8x8xbf16>
    %102 = vector.extract_strided_slice %84 {offsets = [0, 0], sizes = [8, 32], strides = [1, 1]} : vector<8x64xbf16> to vector<8x32xbf16>
    %cst_38 = arith.constant dense<0.000000e+00> : vector<8x32xf32>
    %103 = tpu.matmul %101, %102, %cst_38 {dimension_numbers = #tpu.dot_dimension_numbers<[1], [0], [0], [1], [0, 0, 1, 1], [], []>} : vector<8x8xbf16>, vector<8x32xbf16>, vector<8x32xf32> -> vector<8x32xf32>
    %c8 = arith.constant 8 : index
    %c0_39 = arith.constant 0 : index
    %104 = vector.load %arg21[%c8, %c0_39] : memref<16x64xf32, #tpu.memory_space<vmem>>, vector<8x32xf32>
    tpu.vector_store %arg21[%c8, %c0_39], %103 {strides = array<i32>} : memref<16x64xf32, #tpu.memory_space<vmem>>, vector<8x32xf32>,
    %105 = vector.extract_strided_slice %35 {offsets = [8, 32], sizes = [8, 32], strides = [1, 1]} : vector<16x64xf32> to vector<8x32xf32>
    %106 = arith.truncf %105 : vector<8x32xf32> to vector<8x32xbf16>
    %107 = vector.extract_strided_slice %82 {offsets = [0, 32], sizes = [8, 32], strides = [1, 1]} : vector<8x64xbf16> to vector<8x32xbf16>
    %cst_40 = arith.constant dense<0.000000e+00> : vector<8x8xf32>
    %108 = tpu.matmul %106, %107, %cst_40 {dimension_numbers = #tpu.dot_dimension_numbers<[1], [1], [0], [0], [0, 0, 1, 0], [], []>} : vector<8x32xbf16>, vector<8x32xbf16>, vector<8x8xf32> -> vector<8x8xf32>
    %109 = vector.broadcast %85 : vector<1x8xf32> to vector<8x8xf32>
    %110 = arith.addf %108, %109 : vector<8x8xf32>
    %cst_41 = arith.constant dense<0xFF800000> : vector<8xf32>
    %111 = vector.multi_reduction <maximumf>, %110, %cst_41 [1] : vector<8x8xf32> to vector<8xf32>
    %112 = vector.shape_cast %111 : vector<8xf32> to vector<8x1xf32>
    %113 = vector.broadcast %112 : vector<8x1xf32> to vector<8x8xf32>
    %114 = arith.subf %110, %113 : vector<8x8xf32>
    %115 = math.exp %114 : vector<8x8xf32>
    %cst_42 = arith.constant dense<0.000000e+00> : vector<8xf32>
    %116 = vector.multi_reduction <add>, %115, %cst_42 [1] : vector<8x8xf32> to vector<8xf32>
    %117 = vector.shape_cast %116 : vector<8xf32> to vector<8x1xf32>
    %118 = vector.broadcast %117 : vector<8x1xf32> to vector<8x8xf32>
    %119 = arith.divf %115, %118 : vector<8x8xf32>
    %120 = arith.truncf %119 : vector<8x8xf32> to vector<8x8xbf16>
    %121 = vector.extract_strided_slice %84 {offsets = [0, 32], sizes = [8, 32], strides = [1, 1]} : vector<8x64xbf16> to vector<8x32xbf16>
    %cst_43 = arith.constant dense<0.000000e+00> : vector<8x32xf32>
    %122 = tpu.matmul %120, %121, %cst_43 {dimension_numbers = #tpu.dot_dimension_numbers<[1], [0], [0], [1], [0, 0, 1, 1], [], []>} : vector<8x8xbf16>, vector<8x32xbf16>, vector<8x32xf32> -> vector<8x32xf32>
    %c8_44 = arith.constant 8 : index
    %c32_45 = arith.constant 32 : index
    %123 = vector.load %arg21[%c8_44, %c32_45] : memref<16x64xf32, #tpu.memory_space<vmem>>, vector<8x32xf32>
    tpu.vector_store %arg21[%c8_44, %c32_45], %122 {strides = array<i32>} : memref<16x64xf32, #tpu.memory_space<vmem>>, vector<8x32xf32>,
    %c0_46 = arith.constant 0 : index
    %c0_47 = arith.constant 0 : index
    %124 = vector.load %arg21[%c0_46, %c0_47] : memref<16x64xf32, #tpu.memory_space<vmem>>, vector<16x64xf32>
    %125 = arith.truncf %124 : vector<16x64xf32> to vector<16x64xbf16>
    %c0_48 = arith.constant 0 : index
    %c0_49 = arith.constant 0 : index
    %c0_50 = arith.constant 0 : index
    %126 = vector.load %arg7[%c0_48, %c0_49, %c0_50] : memref<2x64x64xbf16, #tpu.memory_space<vmem>>, vector<1x64x64xbf16>
    %127 = vector.shape_cast %126 : vector<1x64x64xbf16> to vector<64x64xbf16>
    %cst_51 = arith.constant dense<0.000000e+00> : vector<16x64xf32>
    %128 = tpu.matmul %125, %127, %cst_51 {dimension_numbers = #tpu.dot_dimension_numbers<[1], [0], [0], [1], [0, 0, 1, 1], [], []>} : vector<16x64xbf16>, vector<64x64xbf16>, vector<16x64xf32> -> vector<16x64xf32>
    %c0_52 = arith.constant 0 : index
    %c0_53 = arith.constant 0 : index
    %c0_54 = arith.constant 0 : index
    %129 = vector.load %arg8[%c0_52, %c0_53, %c0_54] : memref<2x1x64xf32, #tpu.memory_space<vmem>>, vector<1x1x64xf32>
    %130 = vector.shape_cast %129 : vector<1x1x64xf32> to vector<1x64xf32>
    %131 = vector.broadcast %130 : vector<1x64xf32> to vector<16x64xf32>
    %132 = arith.addf %128, %131 : vector<16x64xf32>
    %133 = arith.addf %24, %132 : vector<16x64xf32>
    %c0_55 = arith.constant 0 : index
    %c0_56 = arith.constant 0 : index
    %c0_57 = arith.constant 0 : index
    %134 = vector.load %arg9[%c0_55, %c0_56, %c0_57] : memref<2x1x64xf32, #tpu.memory_space<vmem>>, vector<1x1x64xf32>
    %135 = vector.shape_cast %134 : vector<1x1x64xf32> to vector<1x64xf32>
    %c0_58 = arith.constant 0 : index
    %c0_59 = arith.constant 0 : index
    %c0_60 = arith.constant 0 : index
    %136 = vector.load %arg10[%c0_58, %c0_59, %c0_60] : memref<2x1x64xf32, #tpu.memory_space<vmem>>, vector<1x1x64xf32>
    %137 = vector.shape_cast %136 : vector<1x1x64xf32> to vector<1x64xf32>
    %cst_61 = arith.constant dense<0.000000e+00> : vector<16xf32>
    %138 = vector.multi_reduction <add>, %133, %cst_61 [1] : vector<16x64xf32> to vector<16xf32>
    %139 = vector.shape_cast %138 : vector<16xf32> to vector<16x1xf32>
    %cst_62 = arith.constant 6.400000e+01 : f32
    %140 = vector.broadcast %cst_62 : f32 to vector<16x1xf32>
    %141 = arith.divf %139, %140 : vector<16x1xf32>
    %142 = vector.broadcast %141 : vector<16x1xf32> to vector<16x64xf32>
    %143 = arith.subf %133, %142 : vector<16x64xf32>
    %144 = arith.mulf %143, %143 : vector<16x64xf32>
    %cst_63 = arith.constant dense<0.000000e+00> : vector<16xf32>
    %145 = vector.multi_reduction <add>, %144, %cst_63 [1] : vector<16x64xf32> to vector<16xf32>
    %146 = vector.shape_cast %145 : vector<16xf32> to vector<16x1xf32>
    %cst_64 = arith.constant 6.400000e+01 : f32
    %147 = vector.broadcast %cst_64 : f32 to vector<16x1xf32>
    %148 = arith.divf %146, %147 : vector<16x1xf32>
    %cst_65 = arith.constant 9.99999996E-13 : f32
    %149 = vector.broadcast %cst_65 : f32 to vector<16x1xf32>
    %150 = arith.addf %148, %149 : vector<16x1xf32>
    %151 = math.rsqrt %150 : vector<16x1xf32>
    %152 = vector.broadcast %151 : vector<16x1xf32> to vector<16x64xf32>
    %153 = arith.mulf %143, %152 : vector<16x64xf32>
    %154 = vector.broadcast %135 : vector<1x64xf32> to vector<16x64xf32>
    %155 = arith.mulf %153, %154 : vector<16x64xf32>
    %156 = vector.broadcast %137 : vector<1x64xf32> to vector<16x64xf32>
    %157 = arith.addf %155, %156 : vector<16x64xf32>
    %158 = arith.truncf %157 : vector<16x64xf32> to vector<16x64xbf16>
    %c0_66 = arith.constant 0 : index
    %c0_67 = arith.constant 0 : index
    %c0_68 = arith.constant 0 : index
    %159 = vector.load %arg11[%c0_66, %c0_67, %c0_68] : memref<2x64x128xbf16, #tpu.memory_space<vmem>>, vector<1x64x128xbf16>
    %160 = vector.shape_cast %159 : vector<1x64x128xbf16> to vector<64x128xbf16>
    %cst_69 = arith.constant dense<0.000000e+00> : vector<16x128xf32>
    %161 = tpu.matmul %158, %160, %cst_69 {dimension_numbers = #tpu.dot_dimension_numbers<[1], [0], [0], [1], [0, 0, 1, 1], [], []>} : vector<16x64xbf16>, vector<64x128xbf16>, vector<16x128xf32> -> vector<16x128xf32>
    %c0_70 = arith.constant 0 : index
    %c0_71 = arith.constant 0 : index
    %c0_72 = arith.constant 0 : index
    %162 = vector.load %arg12[%c0_70, %c0_71, %c0_72] : memref<2x1x128xf32, #tpu.memory_space<vmem>>, vector<1x1x128xf32>
    %163 = vector.shape_cast %162 : vector<1x1x128xf32> to vector<1x128xf32>
    %164 = vector.broadcast %163 : vector<1x128xf32> to vector<16x128xf32>
    %165 = arith.addf %161, %164 : vector<16x128xf32>
    %cst_73 = arith.constant 0.707106769 : f32
    %166 = vector.broadcast %cst_73 : f32 to vector<16x128xf32>
    %167 = arith.mulf %165, %166 : vector<16x128xf32>
    %168 = math.absf %167 : vector<16x128xf32>
    %cst_74 = arith.constant 0.327591091 : f32
    %169 = vector.broadcast %cst_74 : f32 to vector<16x128xf32>
    %170 = arith.mulf %169, %168 : vector<16x128xf32>
    %cst_75 = arith.constant 1.000000e+00 : f32
    %171 = vector.broadcast %cst_75 : f32 to vector<16x128xf32>
    %172 = arith.addf %171, %170 : vector<16x128xf32>
    %cst_76 = arith.constant 1.000000e+00 : f32
    %173 = vector.broadcast %cst_76 : f32 to vector<16x128xf32>
    %174 = arith.divf %173, %172 : vector<16x128xf32>
    %cst_77 = arith.constant 1.06140542 : f32
    %175 = vector.broadcast %cst_77 : f32 to vector<16x128xf32>
    %176 = arith.mulf %175, %174 : vector<16x128xf32>
    %cst_78 = arith.constant 1.45315206 : f32
    %177 = vector.broadcast %cst_78 : f32 to vector<16x128xf32>
    %178 = arith.subf %176, %177 : vector<16x128xf32>
    %179 = arith.mulf %178, %174 : vector<16x128xf32>
    %cst_79 = arith.constant 1.42141378 : f32
    %180 = vector.broadcast %cst_79 : f32 to vector<16x128xf32>
    %181 = arith.addf %179, %180 : vector<16x128xf32>
    %182 = arith.mulf %181, %174 : vector<16x128xf32>
    %cst_80 = arith.constant 0.284496725 : f32
    %183 = vector.broadcast %cst_80 : f32 to vector<16x128xf32>
    %184 = arith.subf %182, %183 : vector<16x128xf32>
    %185 = arith.mulf %184, %174 : vector<16x128xf32>
    %cst_81 = arith.constant 0.254829586 : f32
    %186 = vector.broadcast %cst_81 : f32 to vector<16x128xf32>
    %187 = arith.addf %185, %186 : vector<16x128xf32>
    %188 = arith.mulf %187, %174 : vector<16x128xf32>
    %cst_82 = arith.constant 0.000000e+00 : f32
    %189 = vector.broadcast %cst_82 : f32 to vector<16x128xf32>
    %190 = arith.subf %189, %168 : vector<16x128xf32>
    %191 = arith.mulf %190, %168 : vector<16x128xf32>
    %192 = math.exp %191 : vector<16x128xf32>
    %193 = arith.mulf %188, %192 : vector<16x128xf32>
    %cst_83 = arith.constant 1.000000e+00 : f32
    %194 = vector.broadcast %cst_83 : f32 to vector<16x128xf32>
    %195 = arith.subf %194, %193 : vector<16x128xf32>
    %cst_84 = arith.constant 0.000000e+00 : f32
    %196 = vector.broadcast %cst_84 : f32 to vector<16x128xf32>
    %197 = arith.cmpf oge, %167, %196 : vector<16x128xf32>
    %cst_85 = arith.constant 0.000000e+00 : f32
    %198 = vector.broadcast %cst_85 : f32 to vector<16x128xf32>
    %199 = arith.subf %198, %195 : vector<16x128xf32>
    %200 = arith.select %197, %195, %199 : vector<16x128xi1>, vector<16x128xf32>
    %cst_86 = arith.constant 5.000000e-01 : f32
    %201 = vector.broadcast %cst_86 : f32 to vector<16x128xf32>
    %202 = arith.mulf %201, %165 : vector<16x128xf32>
    %cst_87 = arith.constant 1.000000e+00 : f32
    %203 = vector.broadcast %cst_87 : f32 to vector<16x128xf32>
    %204 = arith.addf %203, %200 : vector<16x128xf32>
    %205 = arith.mulf %202, %204 : vector<16x128xf32>
    %206 = arith.truncf %205 : vector<16x128xf32> to vector<16x128xbf16>
    %c0_88 = arith.constant 0 : index
    %c0_89 = arith.constant 0 : index
    %c0_90 = arith.constant 0 : index
    %207 = vector.load %arg13[%c0_88, %c0_89, %c0_90] : memref<2x128x64xbf16, #tpu.memory_space<vmem>>, vector<1x128x64xbf16>
    %208 = vector.shape_cast %207 : vector<1x128x64xbf16> to vector<128x64xbf16>
    %cst_91 = arith.constant dense<0.000000e+00> : vector<16x64xf32>
    %209 = tpu.matmul %206, %208, %cst_91 {dimension_numbers = #tpu.dot_dimension_numbers<[1], [0], [0], [1], [0, 0, 1, 1], [], []>} : vector<16x128xbf16>, vector<128x64xbf16>, vector<16x64xf32> -> vector<16x64xf32>
    %c0_92 = arith.constant 0 : index
    %c0_93 = arith.constant 0 : index
    %c0_94 = arith.constant 0 : index
    %210 = vector.load %arg14[%c0_92, %c0_93, %c0_94] : memref<2x1x64xf32, #tpu.memory_space<vmem>>, vector<1x1x64xf32>
    %211 = vector.shape_cast %210 : vector<1x1x64xf32> to vector<1x64xf32>
    %212 = vector.broadcast %211 : vector<1x64xf32> to vector<16x64xf32>
    %213 = arith.addf %209, %212 : vector<16x64xf32>
    %214 = arith.addf %157, %213 : vector<16x64xf32>
    %c0_95 = arith.constant 0 : index
    %c0_96 = arith.constant 0 : index
    %c0_97 = arith.constant 0 : index
    %215 = vector.load %arg15[%c0_95, %c0_96, %c0_97] : memref<2x1x64xf32, #tpu.memory_space<vmem>>, vector<1x1x64xf32>
    %216 = vector.shape_cast %215 : vector<1x1x64xf32> to vector<1x64xf32>
    %c0_98 = arith.constant 0 : index
    %c0_99 = arith.constant 0 : index
    %c0_100 = arith.constant 0 : index
    %217 = vector.load %arg16[%c0_98, %c0_99, %c0_100] : memref<2x1x64xf32, #tpu.memory_space<vmem>>, vector<1x1x64xf32>
    %218 = vector.shape_cast %217 : vector<1x1x64xf32> to vector<1x64xf32>
    %cst_101 = arith.constant dense<0.000000e+00> : vector<16xf32>
    %219 = vector.multi_reduction <add>, %214, %cst_101 [1] : vector<16x64xf32> to vector<16xf32>
    %220 = vector.shape_cast %219 : vector<16xf32> to vector<16x1xf32>
    %cst_102 = arith.constant 6.400000e+01 : f32
    %221 = vector.broadcast %cst_102 : f32 to vector<16x1xf32>
    %222 = arith.divf %220, %221 : vector<16x1xf32>
    %223 = vector.broadcast %222 : vector<16x1xf32> to vector<16x64xf32>
    %224 = arith.subf %214, %223 : vector<16x64xf32>
    %225 = arith.mulf %224, %224 : vector<16x64xf32>
    %cst_103 = arith.constant dense<0.000000e+00> : vector<16xf32>
    %226 = vector.multi_reduction <add>, %225, %cst_103 [1] : vector<16x64xf32> to vector<16xf32>
    %227 = vector.shape_cast %226 : vector<16xf32> to vector<16x1xf32>
    %cst_104 = arith.constant 6.400000e+01 : f32
    %228 = vector.broadcast %cst_104 : f32 to vector<16x1xf32>
    %229 = arith.divf %227, %228 : vector<16x1xf32>
    %cst_105 = arith.constant 9.99999996E-13 : f32
    %230 = vector.broadcast %cst_105 : f32 to vector<16x1xf32>
    %231 = arith.addf %229, %230 : vector<16x1xf32>
    %232 = math.rsqrt %231 : vector<16x1xf32>
    %233 = vector.broadcast %232 : vector<16x1xf32> to vector<16x64xf32>
    %234 = arith.mulf %224, %233 : vector<16x64xf32>
    %235 = vector.broadcast %216 : vector<1x64xf32> to vector<16x64xf32>
    %236 = arith.mulf %234, %235 : vector<16x64xf32>
    %237 = vector.broadcast %218 : vector<1x64xf32> to vector<16x64xf32>
    %238 = arith.addf %236, %237 : vector<16x64xf32>
    %c0_106 = arith.constant 0 : index
    %c0_107 = arith.constant 0 : index
    %239 = vector.load %arg20[%c0_106, %c0_107] : memref<16x64xf32, #tpu.memory_space<vmem>>, vector<16x64xf32>
    tpu.vector_store %arg20[%c0_106, %c0_107], %238 {strides = array<i32>} : memref<16x64xf32, #tpu.memory_space<vmem>>, vector<16x64xf32>,
    %c0_108 = arith.constant 0 : index
    %c0_109 = arith.constant 0 : index
    %240 = vector.load %arg20[%c0_108, %c0_109] : memref<16x64xf32, #tpu.memory_space<vmem>>, vector<16x64xf32>
    %241 = arith.truncf %240 : vector<16x64xf32> to vector<16x64xbf16>
    %c1_110 = arith.constant 1 : index
    %c0_111 = arith.constant 0 : index
    %c0_112 = arith.constant 0 : index
    %242 = vector.load %arg5[%c1_110, %c0_111, %c0_112] : memref<2x64x192xbf16, #tpu.memory_space<vmem>>, vector<1x64x192xbf16>
    %243 = vector.shape_cast %242 : vector<1x64x192xbf16> to vector<64x192xbf16>
    %cst_113 = arith.constant dense<0.000000e+00> : vector<16x192xf32>
    %244 = tpu.matmul %241, %243, %cst_113 {dimension_numbers = #tpu.dot_dimension_numbers<[1], [0], [0], [1], [0, 0, 1, 1], [], []>} : vector<16x64xbf16>, vector<64x192xbf16>, vector<16x192xf32> -> vector<16x192xf32>
    %c1_114 = arith.constant 1 : index
    %c0_115 = arith.constant 0 : index
    %c0_116 = arith.constant 0 : index
    %245 = vector.load %arg6[%c1_114, %c0_115, %c0_116] : memref<2x1x192xf32, #tpu.memory_space<vmem>>, vector<1x1x192xf32>
    %246 = vector.shape_cast %245 : vector<1x1x192xf32> to vector<1x192xf32>
    %247 = vector.broadcast %246 : vector<1x192xf32> to vector<16x192xf32>
    %248 = arith.addf %244, %247 : vector<16x192xf32>
    %249 = vector.extract_strided_slice %248 {offsets = [0, 0], sizes = [16, 64], strides = [1, 1]} : vector<16x192xf32> to vector<16x64xf32>
    %cst_117 = arith.constant 0.176776692 : f32
    %250 = vector.broadcast %cst_117 : f32 to vector<16x64xf32>
    %251 = arith.mulf %249, %250 : vector<16x64xf32>
    %252 = vector.extract_strided_slice %248 {offsets = [0, 64], sizes = [16, 64], strides = [1, 1]} : vector<16x192xf32> to vector<16x64xf32>
    %253 = vector.extract_strided_slice %248 {offsets = [0, 128], sizes = [16, 64], strides = [1, 1]} : vector<16x192xf32> to vector<16x64xf32>
    %254 = vector.extract_strided_slice %252 {offsets = [0, 0], sizes = [8, 64], strides = [1, 1]} : vector<16x64xf32> to vector<8x64xf32>
    %255 = arith.truncf %254 : vector<8x64xf32> to vector<8x64xbf16>
    %256 = vector.extract_strided_slice %253 {offsets = [0, 0], sizes = [8, 64], strides = [1, 1]} : vector<16x64xf32> to vector<8x64xf32>
    %257 = arith.truncf %256 : vector<8x64xf32> to vector<8x64xbf16>
    %c0_118 = arith.constant 0 : index
    %c0_119 = arith.constant 0 : index
    %258 = vector.load %arg2[%c0_118, %c0_119] : memref<2x8xf32, #tpu.memory_space<vmem>>, vector<1x8xf32>
    %259 = vector.extract_strided_slice %251 {offsets = [0, 0], sizes = [8, 32], strides = [1, 1]} : vector<16x64xf32> to vector<8x32xf32>
    %260 = arith.truncf %259 : vector<8x32xf32> to vector<8x32xbf16>
    %261 = vector.extract_strided_slice %255 {offsets = [0, 0], sizes = [8, 32], strides = [1, 1]} : vector<8x64xbf16> to vector<8x32xbf16>
    %cst_120 = arith.constant dense<0.000000e+00> : vector<8x8xf32>
    %262 = tpu.matmul %260, %261, %cst_120 {dimension_numbers = #tpu.dot_dimension_numbers<[1], [1], [0], [0], [0, 0, 1, 0], [], []>} : vector<8x32xbf16>, vector<8x32xbf16>, vector<8x8xf32> -> vector<8x8xf32>
    %263 = vector.broadcast %258 : vector<1x8xf32> to vector<8x8xf32>
    %264 = arith.addf %262, %263 : vector<8x8xf32>
    %cst_121 = arith.constant dense<0xFF800000> : vector<8xf32>
    %265 = vector.multi_reduction <maximumf>, %264, %cst_121 [1] : vector<8x8xf32> to vector<8xf32>
    %266 = vector.shape_cast %265 : vector<8xf32> to vector<8x1xf32>
    %267 = vector.broadcast %266 : vector<8x1xf32> to vector<8x8xf32>
    %268 = arith.subf %264, %267 : vector<8x8xf32>
    %269 = math.exp %268 : vector<8x8xf32>
    %cst_122 = arith.constant dense<0.000000e+00> : vector<8xf32>
    %270 = vector.multi_reduction <add>, %269, %cst_122 [1] : vector<8x8xf32> to vector<8xf32>
    %271 = vector.shape_cast %270 : vector<8xf32> to vector<8x1xf32>
    %272 = vector.broadcast %271 : vector<8x1xf32> to vector<8x8xf32>
    %273 = arith.divf %269, %272 : vector<8x8xf32>
    %274 = arith.truncf %273 : vector<8x8xf32> to vector<8x8xbf16>
    %275 = vector.extract_strided_slice %257 {offsets = [0, 0], sizes = [8, 32], strides = [1, 1]} : vector<8x64xbf16> to vector<8x32xbf16>
    %cst_123 = arith.constant dense<0.000000e+00> : vector<8x32xf32>
    %276 = tpu.matmul %274, %275, %cst_123 {dimension_numbers = #tpu.dot_dimension_numbers<[1], [0], [0], [1], [0, 0, 1, 1], [], []>} : vector<8x8xbf16>, vector<8x32xbf16>, vector<8x32xf32> -> vector<8x32xf32>
    %c0_124 = arith.constant 0 : index
    %c0_125 = arith.constant 0 : index
    %277 = vector.load %arg21[%c0_124, %c0_125] : memref<16x64xf32, #tpu.memory_space<vmem>>, vector<8x32xf32>
    tpu.vector_store %arg21[%c0_124, %c0_125], %276 {strides = array<i32>} : memref<16x64xf32, #tpu.memory_space<vmem>>, vector<8x32xf32>,
    %278 = vector.extract_strided_slice %251 {offsets = [0, 32], sizes = [8, 32], strides = [1, 1]} : vector<16x64xf32> to vector<8x32xf32>
    %279 = arith.truncf %278 : vector<8x32xf32> to vector<8x32xbf16>
    %280 = vector.extract_strided_slice %255 {offsets = [0, 32], sizes = [8, 32], strides = [1, 1]} : vector<8x64xbf16> to vector<8x32xbf16>
    %cst_126 = arith.constant dense<0.000000e+00> : vector<8x8xf32>
    %281 = tpu.matmul %279, %280, %cst_126 {dimension_numbers = #tpu.dot_dimension_numbers<[1], [1], [0], [0], [0, 0, 1, 0], [], []>} : vector<8x32xbf16>, vector<8x32xbf16>, vector<8x8xf32> -> vector<8x8xf32>
    %282 = vector.broadcast %258 : vector<1x8xf32> to vector<8x8xf32>
    %283 = arith.addf %281, %282 : vector<8x8xf32>
    %cst_127 = arith.constant dense<0xFF800000> : vector<8xf32>
    %284 = vector.multi_reduction <maximumf>, %283, %cst_127 [1] : vector<8x8xf32> to vector<8xf32>
    %285 = vector.shape_cast %284 : vector<8xf32> to vector<8x1xf32>
    %286 = vector.broadcast %285 : vector<8x1xf32> to vector<8x8xf32>
    %287 = arith.subf %283, %286 : vector<8x8xf32>
    %288 = math.exp %287 : vector<8x8xf32>
    %cst_128 = arith.constant dense<0.000000e+00> : vector<8xf32>
    %289 = vector.multi_reduction <add>, %288, %cst_128 [1] : vector<8x8xf32> to vector<8xf32>
    %290 = vector.shape_cast %289 : vector<8xf32> to vector<8x1xf32>
    %291 = vector.broadcast %290 : vector<8x1xf32> to vector<8x8xf32>
    %292 = arith.divf %288, %291 : vector<8x8xf32>
    %293 = arith.truncf %292 : vector<8x8xf32> to vector<8x8xbf16>
    %294 = vector.extract_strided_slice %257 {offsets = [0, 32], sizes = [8, 32], strides = [1, 1]} : vector<8x64xbf16> to vector<8x32xbf16>
    %cst_129 = arith.constant dense<0.000000e+00> : vector<8x32xf32>
    %295 = tpu.matmul %293, %294, %cst_129 {dimension_numbers = #tpu.dot_dimension_numbers<[1], [0], [0], [1], [0, 0, 1, 1], [], []>} : vector<8x8xbf16>, vector<8x32xbf16>, vector<8x32xf32> -> vector<8x32xf32>
    %c0_130 = arith.constant 0 : index
    %c32_131 = arith.constant 32 : index
    %296 = vector.load %arg21[%c0_130, %c32_131] : memref<16x64xf32, #tpu.memory_space<vmem>>, vector<8x32xf32>
    tpu.vector_store %arg21[%c0_130, %c32_131], %295 {strides = array<i32>} : memref<16x64xf32, #tpu.memory_space<vmem>>, vector<8x32xf32>,
    %297 = vector.extract_strided_slice %252 {offsets = [8, 0], sizes = [8, 64], strides = [1, 1]} : vector<16x64xf32> to vector<8x64xf32>
    %298 = arith.truncf %297 : vector<8x64xf32> to vector<8x64xbf16>
    %299 = vector.extract_strided_slice %253 {offsets = [8, 0], sizes = [8, 64], strides = [1, 1]} : vector<16x64xf32> to vector<8x64xf32>
    %300 = arith.truncf %299 : vector<8x64xf32> to vector<8x64xbf16>
    %c1_132 = arith.constant 1 : index
    %c0_133 = arith.constant 0 : index
    %301 = vector.load %arg2[%c1_132, %c0_133] : memref<2x8xf32, #tpu.memory_space<vmem>>, vector<1x8xf32>
    %302 = vector.extract_strided_slice %251 {offsets = [8, 0], sizes = [8, 32], strides = [1, 1]} : vector<16x64xf32> to vector<8x32xf32>
    %303 = arith.truncf %302 : vector<8x32xf32> to vector<8x32xbf16>
    %304 = vector.extract_strided_slice %298 {offsets = [0, 0], sizes = [8, 32], strides = [1, 1]} : vector<8x64xbf16> to vector<8x32xbf16>
    %cst_134 = arith.constant dense<0.000000e+00> : vector<8x8xf32>
    %305 = tpu.matmul %303, %304, %cst_134 {dimension_numbers = #tpu.dot_dimension_numbers<[1], [1], [0], [0], [0, 0, 1, 0], [], []>} : vector<8x32xbf16>, vector<8x32xbf16>, vector<8x8xf32> -> vector<8x8xf32>
    %306 = vector.broadcast %301 : vector<1x8xf32> to vector<8x8xf32>
    %307 = arith.addf %305, %306 : vector<8x8xf32>
    %cst_135 = arith.constant dense<0xFF800000> : vector<8xf32>
    %308 = vector.multi_reduction <maximumf>, %307, %cst_135 [1] : vector<8x8xf32> to vector<8xf32>
    %309 = vector.shape_cast %308 : vector<8xf32> to vector<8x1xf32>
    %310 = vector.broadcast %309 : vector<8x1xf32> to vector<8x8xf32>
    %311 = arith.subf %307, %310 : vector<8x8xf32>
    %312 = math.exp %311 : vector<8x8xf32>
    %cst_136 = arith.constant dense<0.000000e+00> : vector<8xf32>
    %313 = vector.multi_reduction <add>, %312, %cst_136 [1] : vector<8x8xf32> to vector<8xf32>
    %314 = vector.shape_cast %313 : vector<8xf32> to vector<8x1xf32>
    %315 = vector.broadcast %314 : vector<8x1xf32> to vector<8x8xf32>
    %316 = arith.divf %312, %315 : vector<8x8xf32>
    %317 = arith.truncf %316 : vector<8x8xf32> to vector<8x8xbf16>
    %318 = vector.extract_strided_slice %300 {offsets = [0, 0], sizes = [8, 32], strides = [1, 1]} : vector<8x64xbf16> to vector<8x32xbf16>
    %cst_137 = arith.constant dense<0.000000e+00> : vector<8x32xf32>
    %319 = tpu.matmul %317, %318, %cst_137 {dimension_numbers = #tpu.dot_dimension_numbers<[1], [0], [0], [1], [0, 0, 1, 1], [], []>} : vector<8x8xbf16>, vector<8x32xbf16>, vector<8x32xf32> -> vector<8x32xf32>
    %c8_138 = arith.constant 8 : index
    %c0_139 = arith.constant 0 : index
    %320 = vector.load %arg21[%c8_138, %c0_139] : memref<16x64xf32, #tpu.memory_space<vmem>>, vector<8x32xf32>
    tpu.vector_store %arg21[%c8_138, %c0_139], %319 {strides = array<i32>} : memref<16x64xf32, #tpu.memory_space<vmem>>, vector<8x32xf32>,
    %321 = vector.extract_strided_slice %251 {offsets = [8, 32], sizes = [8, 32], strides = [1, 1]} : vector<16x64xf32> to vector<8x32xf32>
    %322 = arith.truncf %321 : vector<8x32xf32> to vector<8x32xbf16>
    %323 = vector.extract_strided_slice %298 {offsets = [0, 32], sizes = [8, 32], strides = [1, 1]} : vector<8x64xbf16> to vector<8x32xbf16>
    %cst_140 = arith.constant dense<0.000000e+00> : vector<8x8xf32>
    %324 = tpu.matmul %322, %323, %cst_140 {dimension_numbers = #tpu.dot_dimension_numbers<[1], [1], [0], [0], [0, 0, 1, 0], [], []>} : vector<8x32xbf16>, vector<8x32xbf16>, vector<8x8xf32> -> vector<8x8xf32>
    %325 = vector.broadcast %301 : vector<1x8xf32> to vector<8x8xf32>
    %326 = arith.addf %324, %325 : vector<8x8xf32>
    %cst_141 = arith.constant dense<0xFF800000> : vector<8xf32>
    %327 = vector.multi_reduction <maximumf>, %326, %cst_141 [1] : vector<8x8xf32> to vector<8xf32>
    %328 = vector.shape_cast %327 : vector<8xf32> to vector<8x1xf32>
    %329 = vector.broadcast %328 : vector<8x1xf32> to vector<8x8xf32>
    %330 = arith.subf %326, %329 : vector<8x8xf32>
    %331 = math.exp %330 : vector<8x8xf32>
    %cst_142 = arith.constant dense<0.000000e+00> : vector<8xf32>
    %332 = vector.multi_reduction <add>, %331, %cst_142 [1] : vector<8x8xf32> to vector<8xf32>
    %333 = vector.shape_cast %332 : vector<8xf32> to vector<8x1xf32>
    %334 = vector.broadcast %333 : vector<8x1xf32> to vector<8x8xf32>
    %335 = arith.divf %331, %334 : vector<8x8xf32>
    %336 = arith.truncf %335 : vector<8x8xf32> to vector<8x8xbf16>
    %337 = vector.extract_strided_slice %300 {offsets = [0, 32], sizes = [8, 32], strides = [1, 1]} : vector<8x64xbf16> to vector<8x32xbf16>
    %cst_143 = arith.constant dense<0.000000e+00> : vector<8x32xf32>
    %338 = tpu.matmul %336, %337, %cst_143 {dimension_numbers = #tpu.dot_dimension_numbers<[1], [0], [0], [1], [0, 0, 1, 1], [], []>} : vector<8x8xbf16>, vector<8x32xbf16>, vector<8x32xf32> -> vector<8x32xf32>
    %c8_144 = arith.constant 8 : index
    %c32_145 = arith.constant 32 : index
    %339 = vector.load %arg21[%c8_144, %c32_145] : memref<16x64xf32, #tpu.memory_space<vmem>>, vector<8x32xf32>
    tpu.vector_store %arg21[%c8_144, %c32_145], %338 {strides = array<i32>} : memref<16x64xf32, #tpu.memory_space<vmem>>, vector<8x32xf32>,
    %c0_146 = arith.constant 0 : index
    %c0_147 = arith.constant 0 : index
    %340 = vector.load %arg21[%c0_146, %c0_147] : memref<16x64xf32, #tpu.memory_space<vmem>>, vector<16x64xf32>
    %341 = arith.truncf %340 : vector<16x64xf32> to vector<16x64xbf16>
    %c1_148 = arith.constant 1 : index
    %c0_149 = arith.constant 0 : index
    %c0_150 = arith.constant 0 : index
    %342 = vector.load %arg7[%c1_148, %c0_149, %c0_150] : memref<2x64x64xbf16, #tpu.memory_space<vmem>>, vector<1x64x64xbf16>
    %343 = vector.shape_cast %342 : vector<1x64x64xbf16> to vector<64x64xbf16>
    %cst_151 = arith.constant dense<0.000000e+00> : vector<16x64xf32>
    %344 = tpu.matmul %341, %343, %cst_151 {dimension_numbers = #tpu.dot_dimension_numbers<[1], [0], [0], [1], [0, 0, 1, 1], [], []>} : vector<16x64xbf16>, vector<64x64xbf16>, vector<16x64xf32> -> vector<16x64xf32>
    %c1_152 = arith.constant 1 : index
    %c0_153 = arith.constant 0 : index
    %c0_154 = arith.constant 0 : index
    %345 = vector.load %arg8[%c1_152, %c0_153, %c0_154] : memref<2x1x64xf32, #tpu.memory_space<vmem>>, vector<1x1x64xf32>
    %346 = vector.shape_cast %345 : vector<1x1x64xf32> to vector<1x64xf32>
    %347 = vector.broadcast %346 : vector<1x64xf32> to vector<16x64xf32>
    %348 = arith.addf %344, %347 : vector<16x64xf32>
    %349 = arith.addf %240, %348 : vector<16x64xf32>
    %c1_155 = arith.constant 1 : index
    %c0_156 = arith.constant 0 : index
    %c0_157 = arith.constant 0 : index
    %350 = vector.load %arg9[%c1_155, %c0_156, %c0_157] : memref<2x1x64xf32, #tpu.memory_space<vmem>>, vector<1x1x64xf32>
    %351 = vector.shape_cast %350 : vector<1x1x64xf32> to vector<1x64xf32>
    %c1_158 = arith.constant 1 : index
    %c0_159 = arith.constant 0 : index
    %c0_160 = arith.constant 0 : index
    %352 = vector.load %arg10[%c1_158, %c0_159, %c0_160] : memref<2x1x64xf32, #tpu.memory_space<vmem>>, vector<1x1x64xf32>
    %353 = vector.shape_cast %352 : vector<1x1x64xf32> to vector<1x64xf32>
    %cst_161 = arith.constant dense<0.000000e+00> : vector<16xf32>
    %354 = vector.multi_reduction <add>, %349, %cst_161 [1] : vector<16x64xf32> to vector<16xf32>
    %355 = vector.shape_cast %354 : vector<16xf32> to vector<16x1xf32>
    %cst_162 = arith.constant 6.400000e+01 : f32
    %356 = vector.broadcast %cst_162 : f32 to vector<16x1xf32>
    %357 = arith.divf %355, %356 : vector<16x1xf32>
    %358 = vector.broadcast %357 : vector<16x1xf32> to vector<16x64xf32>
    %359 = arith.subf %349, %358 : vector<16x64xf32>
    %360 = arith.mulf %359, %359 : vector<16x64xf32>
    %cst_163 = arith.constant dense<0.000000e+00> : vector<16xf32>
    %361 = vector.multi_reduction <add>, %360, %cst_163 [1] : vector<16x64xf32> to vector<16xf32>
    %362 = vector.shape_cast %361 : vector<16xf32> to vector<16x1xf32>
    %cst_164 = arith.constant 6.400000e+01 : f32
    %363 = vector.broadcast %cst_164 : f32 to vector<16x1xf32>
    %364 = arith.divf %362, %363 : vector<16x1xf32>
    %cst_165 = arith.constant 9.99999996E-13 : f32
    %365 = vector.broadcast %cst_165 : f32 to vector<16x1xf32>
    %366 = arith.addf %364, %365 : vector<16x1xf32>
    %367 = math.rsqrt %366 : vector<16x1xf32>
    %368 = vector.broadcast %367 : vector<16x1xf32> to vector<16x64xf32>
    %369 = arith.mulf %359, %368 : vector<16x64xf32>
    %370 = vector.broadcast %351 : vector<1x64xf32> to vector<16x64xf32>
    %371 = arith.mulf %369, %370 : vector<16x64xf32>
    %372 = vector.broadcast %353 : vector<1x64xf32> to vector<16x64xf32>
    %373 = arith.addf %371, %372 : vector<16x64xf32>
    %374 = arith.truncf %373 : vector<16x64xf32> to vector<16x64xbf16>
    %c1_166 = arith.constant 1 : index
    %c0_167 = arith.constant 0 : index
    %c0_168 = arith.constant 0 : index
    %375 = vector.load %arg11[%c1_166, %c0_167, %c0_168] : memref<2x64x128xbf16, #tpu.memory_space<vmem>>, vector<1x64x128xbf16>
    %376 = vector.shape_cast %375 : vector<1x64x128xbf16> to vector<64x128xbf16>
    %cst_169 = arith.constant dense<0.000000e+00> : vector<16x128xf32>
    %377 = tpu.matmul %374, %376, %cst_169 {dimension_numbers = #tpu.dot_dimension_numbers<[1], [0], [0], [1], [0, 0, 1, 1], [], []>} : vector<16x64xbf16>, vector<64x128xbf16>, vector<16x128xf32> -> vector<16x128xf32>
    %c1_170 = arith.constant 1 : index
    %c0_171 = arith.constant 0 : index
    %c0_172 = arith.constant 0 : index
    %378 = vector.load %arg12[%c1_170, %c0_171, %c0_172] : memref<2x1x128xf32, #tpu.memory_space<vmem>>, vector<1x1x128xf32>
    %379 = vector.shape_cast %378 : vector<1x1x128xf32> to vector<1x128xf32>
    %380 = vector.broadcast %379 : vector<1x128xf32> to vector<16x128xf32>
    %381 = arith.addf %377, %380 : vector<16x128xf32>
    %cst_173 = arith.constant 0.707106769 : f32
    %382 = vector.broadcast %cst_173 : f32 to vector<16x128xf32>
    %383 = arith.mulf %381, %382 : vector<16x128xf32>
    %384 = math.absf %383 : vector<16x128xf32>
    %cst_174 = arith.constant 0.327591091 : f32
    %385 = vector.broadcast %cst_174 : f32 to vector<16x128xf32>
    %386 = arith.mulf %385, %384 : vector<16x128xf32>
    %cst_175 = arith.constant 1.000000e+00 : f32
    %387 = vector.broadcast %cst_175 : f32 to vector<16x128xf32>
    %388 = arith.addf %387, %386 : vector<16x128xf32>
    %cst_176 = arith.constant 1.000000e+00 : f32
    %389 = vector.broadcast %cst_176 : f32 to vector<16x128xf32>
    %390 = arith.divf %389, %388 : vector<16x128xf32>
    %cst_177 = arith.constant 1.06140542 : f32
    %391 = vector.broadcast %cst_177 : f32 to vector<16x128xf32>
    %392 = arith.mulf %391, %390 : vector<16x128xf32>
    %cst_178 = arith.constant 1.45315206 : f32
    %393 = vector.broadcast %cst_178 : f32 to vector<16x128xf32>
    %394 = arith.subf %392, %393 : vector<16x128xf32>
    %395 = arith.mulf %394, %390 : vector<16x128xf32>
    %cst_179 = arith.constant 1.42141378 : f32
    %396 = vector.broadcast %cst_179 : f32 to vector<16x128xf32>
    %397 = arith.addf %395, %396 : vector<16x128xf32>
    %398 = arith.mulf %397, %390 : vector<16x128xf32>
    %cst_180 = arith.constant 0.284496725 : f32
    %399 = vector.broadcast %cst_180 : f32 to vector<16x128xf32>
    %400 = arith.subf %398, %399 : vector<16x128xf32>
    %401 = arith.mulf %400, %390 : vector<16x128xf32>
    %cst_181 = arith.constant 0.254829586 : f32
    %402 = vector.broadcast %cst_181 : f32 to vector<16x128xf32>
    %403 = arith.addf %401, %402 : vector<16x128xf32>
    %404 = arith.mulf %403, %390 : vector<16x128xf32>
    %cst_182 = arith.constant 0.000000e+00 : f32
    %405 = vector.broadcast %cst_182 : f32 to vector<16x128xf32>
    %406 = arith.subf %405, %384 : vector<16x128xf32>
    %407 = arith.mulf %406, %384 : vector<16x128xf32>
    %408 = math.exp %407 : vector<16x128xf32>
    %409 = arith.mulf %404, %408 : vector<16x128xf32>
    %cst_183 = arith.constant 1.000000e+00 : f32
    %410 = vector.broadcast %cst_183 : f32 to vector<16x128xf32>
    %411 = arith.subf %410, %409 : vector<16x128xf32>
    %cst_184 = arith.constant 0.000000e+00 : f32
    %412 = vector.broadcast %cst_184 : f32 to vector<16x128xf32>
    %413 = arith.cmpf oge, %383, %412 : vector<16x128xf32>
    %cst_185 = arith.constant 0.000000e+00 : f32
    %414 = vector.broadcast %cst_185 : f32 to vector<16x128xf32>
    %415 = arith.subf %414, %411 : vector<16x128xf32>
    %416 = arith.select %413, %411, %415 : vector<16x128xi1>, vector<16x128xf32>
    %cst_186 = arith.constant 5.000000e-01 : f32
    %417 = vector.broadcast %cst_186 : f32 to vector<16x128xf32>
    %418 = arith.mulf %417, %381 : vector<16x128xf32>
    %cst_187 = arith.constant 1.000000e+00 : f32
    %419 = vector.broadcast %cst_187 : f32 to vector<16x128xf32>
    %420 = arith.addf %419, %416 : vector<16x128xf32>
    %421 = arith.mulf %418, %420 : vector<16x128xf32>
    %422 = arith.truncf %421 : vector<16x128xf32> to vector<16x128xbf16>
    %c1_188 = arith.constant 1 : index
    %c0_189 = arith.constant 0 : index
    %c0_190 = arith.constant 0 : index
    %423 = vector.load %arg13[%c1_188, %c0_189, %c0_190] : memref<2x128x64xbf16, #tpu.memory_space<vmem>>, vector<1x128x64xbf16>
    %424 = vector.shape_cast %423 : vector<1x128x64xbf16> to vector<128x64xbf16>
    %cst_191 = arith.constant dense<0.000000e+00> : vector<16x64xf32>
    %425 = tpu.matmul %422, %424, %cst_191 {dimension_numbers = #tpu.dot_dimension_numbers<[1], [0], [0], [1], [0, 0, 1, 1], [], []>} : vector<16x128xbf16>, vector<128x64xbf16>, vector<16x64xf32> -> vector<16x64xf32>
    %c1_192 = arith.constant 1 : index
    %c0_193 = arith.constant 0 : index
    %c0_194 = arith.constant 0 : index
    %426 = vector.load %arg14[%c1_192, %c0_193, %c0_194] : memref<2x1x64xf32, #tpu.memory_space<vmem>>, vector<1x1x64xf32>
    %427 = vector.shape_cast %426 : vector<1x1x64xf32> to vector<1x64xf32>
    %428 = vector.broadcast %427 : vector<1x64xf32> to vector<16x64xf32>
    %429 = arith.addf %425, %428 : vector<16x64xf32>
    %430 = arith.addf %373, %429 : vector<16x64xf32>
    %c1_195 = arith.constant 1 : index
    %c0_196 = arith.constant 0 : index
    %c0_197 = arith.constant 0 : index
    %431 = vector.load %arg15[%c1_195, %c0_196, %c0_197] : memref<2x1x64xf32, #tpu.memory_space<vmem>>, vector<1x1x64xf32>
    %432 = vector.shape_cast %431 : vector<1x1x64xf32> to vector<1x64xf32>
    %c1_198 = arith.constant 1 : index
    %c0_199 = arith.constant 0 : index
    %c0_200 = arith.constant 0 : index
    %433 = vector.load %arg16[%c1_198, %c0_199, %c0_200] : memref<2x1x64xf32, #tpu.memory_space<vmem>>, vector<1x1x64xf32>
    %434 = vector.shape_cast %433 : vector<1x1x64xf32> to vector<1x64xf32>
    %cst_201 = arith.constant dense<0.000000e+00> : vector<16xf32>
    %435 = vector.multi_reduction <add>, %430, %cst_201 [1] : vector<16x64xf32> to vector<16xf32>
    %436 = vector.shape_cast %435 : vector<16xf32> to vector<16x1xf32>
    %cst_202 = arith.constant 6.400000e+01 : f32
    %437 = vector.broadcast %cst_202 : f32 to vector<16x1xf32>
    %438 = arith.divf %436, %437 : vector<16x1xf32>
    %439 = vector.broadcast %438 : vector<16x1xf32> to vector<16x64xf32>
    %440 = arith.subf %430, %439 : vector<16x64xf32>
    %441 = arith.mulf %440, %440 : vector<16x64xf32>
    %cst_203 = arith.constant dense<0.000000e+00> : vector<16xf32>
    %442 = vector.multi_reduction <add>, %441, %cst_203 [1] : vector<16x64xf32> to vector<16xf32>
    %443 = vector.shape_cast %442 : vector<16xf32> to vector<16x1xf32>
    %cst_204 = arith.constant 6.400000e+01 : f32
    %444 = vector.broadcast %cst_204 : f32 to vector<16x1xf32>
    %445 = arith.divf %443, %444 : vector<16x1xf32>
    %cst_205 = arith.constant 9.99999996E-13 : f32
    %446 = vector.broadcast %cst_205 : f32 to vector<16x1xf32>
    %447 = arith.addf %445, %446 : vector<16x1xf32>
    %448 = math.rsqrt %447 : vector<16x1xf32>
    %449 = vector.broadcast %448 : vector<16x1xf32> to vector<16x64xf32>
    %450 = arith.mulf %440, %449 : vector<16x64xf32>
    %451 = vector.broadcast %432 : vector<1x64xf32> to vector<16x64xf32>
    %452 = arith.mulf %450, %451 : vector<16x64xf32>
    %453 = vector.broadcast %434 : vector<1x64xf32> to vector<16x64xf32>
    %454 = arith.addf %452, %453 : vector<16x64xf32>
    %c0_206 = arith.constant 0 : index
    %c0_207 = arith.constant 0 : index
    %455 = vector.load %arg20[%c0_206, %c0_207] : memref<16x64xf32, #tpu.memory_space<vmem>>, vector<16x64xf32>
    tpu.vector_store %arg20[%c0_206, %c0_207], %454 {strides = array<i32>} : memref<16x64xf32, #tpu.memory_space<vmem>>, vector<16x64xf32>,
    %c0_208 = arith.constant 0 : index
    %c0_209 = arith.constant 0 : index
    %456 = vector.load %arg20[%c0_208, %c0_209] : memref<16x64xf32, #tpu.memory_space<vmem>>, vector<16x64xf32>
    %c0_210 = arith.constant 0 : index
    %c0_211 = arith.constant 0 : index
    %457 = vector.load %arg17[%c0_210, %c0_211] : memref<128x128xbf16, #tpu.memory_space<vmem>>, vector<128x128xbf16>
    %458 = vector.extract_strided_slice %456 {offsets = [0, 0], sizes = [1, 64], strides = [1, 1]} : vector<16x64xf32> to vector<1x64xf32>
    %459 = arith.truncf %458 : vector<1x64xf32> to vector<1x64xbf16>
    %460 = vector.extract_strided_slice %456 {offsets = [1, 0], sizes = [1, 64], strides = [1, 1]} : vector<16x64xf32> to vector<1x64xf32>
    %461 = arith.truncf %460 : vector<1x64xf32> to vector<1x64xbf16>
    %462 = vector.extract_strided_slice %457 {offsets = [0, 0], sizes = [64, 128], strides = [1, 1]} : vector<128x128xbf16> to vector<64x128xbf16>
    %cst_212 = arith.constant dense<0.000000e+00> : vector<1x128xf32>
    %463 = tpu.matmul %459, %462, %cst_212 {dimension_numbers = #tpu.dot_dimension_numbers<[1], [0], [0], [1], [0, 0, 1, 1], [], []>} : vector<1x64xbf16>, vector<64x128xbf16>, vector<1x128xf32> -> vector<1x128xf32>
    %464 = vector.extract_strided_slice %457 {offsets = [64, 0], sizes = [64, 128], strides = [1, 1]} : vector<128x128xbf16> to vector<64x128xbf16>
    %cst_213 = arith.constant dense<0.000000e+00> : vector<1x128xf32>
    %465 = tpu.matmul %461, %464, %cst_213 {dimension_numbers = #tpu.dot_dimension_numbers<[1], [0], [0], [1], [0, 0, 1, 1], [], []>} : vector<1x64xbf16>, vector<64x128xbf16>, vector<1x128xf32> -> vector<1x128xf32>
    %466 = arith.addf %463, %465 : vector<1x128xf32>
    %c0_214 = arith.constant 0 : index
    %c0_215 = arith.constant 0 : index
    %467 = vector.load %arg18[%c0_214, %c0_215] : memref<1x128xf32, #tpu.memory_space<vmem>>, vector<1x128xf32>
    %468 = arith.addf %466, %467 : vector<1x128xf32>
    %cst_216 = arith.constant dense<0xFF800000> : vector<1xf32>
    %469 = vector.multi_reduction <maximumf>, %468, %cst_216 [1] : vector<1x128xf32> to vector<1xf32>
    %470 = vector.shape_cast %469 : vector<1xf32> to vector<1x1xf32>
    %471 = vector.broadcast %470 : vector<1x1xf32> to vector<1x128xf32>
    %472 = arith.subf %468, %471 : vector<1x128xf32>
    %473 = math.exp %472 : vector<1x128xf32>
    %cst_217 = arith.constant dense<0.000000e+00> : vector<1xf32>
    %474 = vector.multi_reduction <add>, %473, %cst_217 [1] : vector<1x128xf32> to vector<1xf32>
    %475 = vector.shape_cast %474 : vector<1xf32> to vector<1x1xf32>
    %476 = vector.broadcast %475 : vector<1x1xf32> to vector<1x128xf32>
    %477 = arith.divf %473, %476 : vector<1x128xf32>
    %c0_218 = arith.constant 0 : index
    %c0_219 = arith.constant 0 : index
    %478 = vector.load %arg19[%c0_218, %c0_219] : memref<2x128xf32, #tpu.memory_space<vmem>>, vector<1x128xf32>
    tpu.vector_store %arg19[%c0_218, %c0_219], %477 {strides = array<i32>} : memref<2x128xf32, #tpu.memory_space<vmem>>, vector<1x128xf32>,
    %479 = vector.extract_strided_slice %456 {offsets = [8, 0], sizes = [1, 64], strides = [1, 1]} : vector<16x64xf32> to vector<1x64xf32>
    %480 = arith.truncf %479 : vector<1x64xf32> to vector<1x64xbf16>
    %481 = vector.extract_strided_slice %456 {offsets = [9, 0], sizes = [1, 64], strides = [1, 1]} : vector<16x64xf32> to vector<1x64xf32>
    %482 = arith.truncf %481 : vector<1x64xf32> to vector<1x64xbf16>
    %483 = vector.extract_strided_slice %457 {offsets = [0, 0], sizes = [64, 128], strides = [1, 1]} : vector<128x128xbf16> to vector<64x128xbf16>
    %cst_220 = arith.constant dense<0.000000e+00> : vector<1x128xf32>
    %484 = tpu.matmul %480, %483, %cst_220 {dimension_numbers = #tpu.dot_dimension_numbers<[1], [0], [0], [1], [0, 0, 1, 1], [], []>} : vector<1x64xbf16>, vector<64x128xbf16>, vector<1x128xf32> -> vector<1x128xf32>
    %485 = vector.extract_strided_slice %457 {offsets = [64, 0], sizes = [64, 128], strides = [1, 1]} : vector<128x128xbf16> to vector<64x128xbf16>
    %cst_221 = arith.constant dense<0.000000e+00> : vector<1x128xf32>
    %486 = tpu.matmul %482, %485, %cst_221 {dimension_numbers = #tpu.dot_dimension_numbers<[1], [0], [0], [1], [0, 0, 1, 1], [], []>} : vector<1x64xbf16>, vector<64x128xbf16>, vector<1x128xf32> -> vector<1x128xf32>
    %487 = arith.addf %484, %486 : vector<1x128xf32>
    %c0_222 = arith.constant 0 : index
    %c0_223 = arith.constant 0 : index
    %488 = vector.load %arg18[%c0_222, %c0_223] : memref<1x128xf32, #tpu.memory_space<vmem>>, vector<1x128xf32>
    %489 = arith.addf %487, %488 : vector<1x128xf32>
    %cst_224 = arith.constant dense<0xFF800000> : vector<1xf32>
    %490 = vector.multi_reduction <maximumf>, %489, %cst_224 [1] : vector<1x128xf32> to vector<1xf32>
    %491 = vector.shape_cast %490 : vector<1xf32> to vector<1x1xf32>
    %492 = vector.broadcast %491 : vector<1x1xf32> to vector<1x128xf32>
    %493 = arith.subf %489, %492 : vector<1x128xf32>
    %494 = math.exp %493 : vector<1x128xf32>
    %cst_225 = arith.constant dense<0.000000e+00> : vector<1xf32>
    %495 = vector.multi_reduction <add>, %494, %cst_225 [1] : vector<1x128xf32> to vector<1xf32>
    %496 = vector.shape_cast %495 : vector<1xf32> to vector<1x1xf32>
    %497 = vector.broadcast %496 : vector<1x1xf32> to vector<1x128xf32>
    %498 = arith.divf %494, %497 : vector<1x128xf32>
    %c1_226 = arith.constant 1 : index
    %c0_227 = arith.constant 0 : index
    %499 = vector.load %arg19[%c1_226, %c0_227] : memref<2x128xf32, #tpu.memory_space<vmem>>, vector<1x128xf32>
    tpu.vector_store %arg19[%c1_226, %c0_227], %498 {strides = array<i32>} : memref<2x128xf32, #tpu.memory_space<vmem>>, vector<1x128xf32>,
    return
  }
  func.func @transform_0(%arg0: i32) -> (i32, i32) {
    %c0_i32 = arith.constant 0 : i32
    %c0_i32_0 = arith.constant 0 : i32
    return %arg0, %c0_i32 : i32, i32
  }
  func.func @transform_1(%arg0: i32) -> (i32, i32) {
    %c0_i32 = arith.constant 0 : i32
    %c0_i32_0 = arith.constant 0 : i32
    return %arg0, %c0_i32 : i32, i32
  }
  func.func @transform_2(%arg0: i32) -> (i32, i32) {
    %c0_i32 = arith.constant 0 : i32
    %c0_i32_0 = arith.constant 0 : i32
    %c0_i32_1 = arith.constant 0 : i32
    return %c0_i32, %c0_i32_0 : i32, i32
  }
  func.func @transform_3(%arg0: i32) -> (i32, i32) {
    %c0_i32 = arith.constant 0 : i32
    %c0_i32_0 = arith.constant 0 : i32
    %c0_i32_1 = arith.constant 0 : i32
    return %c0_i32, %c0_i32_0 : i32, i32
  }
  func.func @transform_4(%arg0: i32) -> (i32, i32, i32) {
    %c0_i32 = arith.constant 0 : i32
    %c0_i32_0 = arith.constant 0 : i32
    %c0_i32_1 = arith.constant 0 : i32
    %c0_i32_2 = arith.constant 0 : i32
    return %c0_i32, %c0_i32_0, %c0_i32_1 : i32, i32, i32
  }
  func.func @transform_5(%arg0: i32) -> (i32, i32, i32) {
    %c0_i32 = arith.constant 0 : i32
    %c0_i32_0 = arith.constant 0 : i32
    %c0_i32_1 = arith.constant 0 : i32
    %c0_i32_2 = arith.constant 0 : i32
    return %c0_i32, %c0_i32_0, %c0_i32_1 : i32, i32, i32
  }
  func.func @transform_6(%arg0: i32) -> (i32, i32, i32) {
    %c0_i32 = arith.constant 0 : i32
    %c0_i32_0 = arith.constant 0 : i32
    %c0_i32_1 = arith.constant 0 : i32
    %c0_i32_2 = arith.constant 0 : i32
    return %c0_i32, %c0_i32_0, %c0_i32_1 : i32, i32, i32
  }
  func.func @transform_7(%arg0: i32) -> (i32, i32, i32) {
    %c0_i32 = arith.constant 0 : i32
    %c0_i32_0 = arith.constant 0 : i32
    %c0_i32_1 = arith.constant 0 : i32
    %c0_i32_2 = arith.constant 0 : i32
    return %c0_i32, %c0_i32_0, %c0_i32_1 : i32, i32, i32
  }
  func.func @transform_8(%arg0: i32) -> (i32, i32, i32) {
    %c0_i32 = arith.constant 0 : i32
    %c0_i32_0 = arith.constant 0 : i32
    %c0_i32_1 = arith.constant 0 : i32
    %c0_i32_2 = arith.constant 0 : i32
    return %c0_i32, %c0_i32_0, %c0_i32_1 : i32, i32, i32
  }
  func.func @transform_9(%arg0: i32) -> (i32, i32, i32) {
    %c0_i32 = arith.constant 0 : i32
    %c0_i32_0 = arith.constant 0 : i32
    %c0_i32_1 = arith.constant 0 : i32
    %c0_i32_2 = arith.constant 0 : i32
    return %c0_i32, %c0_i32_0, %c0_i32_1 : i32, i32, i32
  }
  func.func @transform_10(%arg0: i32) -> (i32, i32, i32) {
    %c0_i32 = arith.constant 0 : i32
    %c0_i32_0 = arith.constant 0 : i32
    %c0_i32_1 = arith.constant 0 : i32
    %c0_i32_2 = arith.constant 0 : i32
    return %c0_i32, %c0_i32_0, %c0_i32_1 : i32, i32, i32
  }
  func.func @transform_11(%arg0: i32) -> (i32, i32, i32) {
    %c0_i32 = arith.constant 0 : i32
    %c0_i32_0 = arith.constant 0 : i32
    %c0_i32_1 = arith.constant 0 : i32
    %c0_i32_2 = arith.constant 0 : i32
    return %c0_i32, %c0_i32_0, %c0_i32_1 : i32, i32, i32
  }
  func.func @transform_12(%arg0: i32) -> (i32, i32, i32) {
    %c0_i32 = arith.constant 0 : i32
    %c0_i32_0 = arith.constant 0 : i32
    %c0_i32_1 = arith.constant 0 : i32
    %c0_i32_2 = arith.constant 0 : i32
    return %c0_i32, %c0_i32_0, %c0_i32_1 : i32, i32, i32
  }
  func.func @transform_13(%arg0: i32) -> (i32, i32, i32) {
    %c0_i32 = arith.constant 0 : i32
    %c0_i32_0 = arith.constant 0 : i32
    %c0_i32_1 = arith.constant 0 : i32
    %c0_i32_2 = arith.constant 0 : i32
    return %c0_i32, %c0_i32_0, %c0_i32_1 : i32, i32, i32
  }
  func.func @transform_14(%arg0: i32) -> (i32, i32, i32) {
    %c0_i32 = arith.constant 0 : i32
    %c0_i32_0 = arith.constant 0 : i32
    %c0_i32_1 = arith.constant 0 : i32
    %c0_i32_2 = arith.constant 0 : i32
    return %c0_i32, %c0_i32_0, %c0_i32_1 : i32, i32, i32
  }
  func.func @transform_15(%arg0: i32) -> (i32, i32, i32) {
    %c0_i32 = arith.constant 0 : i32
    %c0_i32_0 = arith.constant 0 : i32
    %c0_i32_1 = arith.constant 0 : i32
    %c0_i32_2 = arith.constant 0 : i32
    return %c0_i32, %c0_i32_0, %c0_i32_1 : i32, i32, i32
  }
  func.func @transform_16(%arg0: i32) -> (i32, i32) {
    %c0_i32 = arith.constant 0 : i32
    %c0_i32_0 = arith.constant 0 : i32
    %c0_i32_1 = arith.constant 0 : i32
    return %c0_i32, %c0_i32_0 : i32, i32
  }
  func.func @transform_17(%arg0: i32) -> (i32, i32) {
    %c0_i32 = arith.constant 0 : i32
    %c0_i32_0 = arith.constant 0 : i32
    %c0_i32_1 = arith.constant 0 : i32
    return %c0_i32, %c0_i32_0 : i32, i32
  }
  func.func @transform_18(%arg0: i32) -> (i32, i32) {
    %c0_i32 = arith.constant 0 : i32
    %c0_i32_0 = arith.constant 0 : i32
    return %arg0, %c0_i32 : i32, i32
  }
}

</mosaic_0001>

<bundles_post_ra>
// kernel: tpu_custom_call.1
= control target key start
LH: loop header
LB: loop body
LE: loop exit
PB: predicated region body
PF: predicated region fallthrough
CT: control target
= control target key end

     0   :  { %s3945_s0 = inlined_call_operand.hbm [shape: f32[16,64], index: 0, kind: input, shape index: {}]   ;;  %s3946_s1 = inlined_call_operand.vmem [shape: f32[2,8], index: 1, kind: input, shape index: {}]   ;;  %s3947_s2 = inlined_call_operand.hbm [shape: f32[1,64], index: 2, kind: input, shape index: {}]   ;;  %s3948_s3 = inlined_call_operand.hbm [shape: f32[1,64], index: 3, kind: input, shape index: {}]   ;;  %s3949_s4 = inlined_call_operand.vmem [shape: bf16[2,64,192], index: 4, kind: input, shape index: {}]   ;;  %s3950_s5 = inlined_call_operand.vmem [shape: f32[2,1,192], index: 5, kind: input, shape index: {}]   ;;  %s3951_s6 = inlined_call_operand.vmem [shape: bf16[2,64,64], index: 6, kind: input, shape index: {}]   ;;  %s3952_s7 = inlined_call_operand.vmem [shape: f32[2,1,64], index: 7, kind: input, shape index: {}]   ;;  %s3953_s8 = inlined_call_operand.vmem [shape: f32[2,1,64], index: 8, kind: input, shape index: {}]   ;;  %s3954_s9 = inlined_call_operand.vmem [shape: f32[2,1,64], index: 9, kind: input, shape index: {}]   ;;  %s3955_s10 = inlined_call_operand.hbm [shape: bf16[2,64,128], index: 10, kind: input, shape index: {}]   ;;  %s3956_s11 = inlined_call_operand.vmem [shape: f32[2,1,128], index: 11, kind: input, shape index: {}]   ;;  %s3957_s12 = inlined_call_operand.vmem [shape: bf16[2,128,64], index: 12, kind: input, shape index: {}]   ;;  %s3958_s13 = inlined_call_operand.vmem [shape: f32[2,1,64], index: 13, kind: input, shape index: {}]   ;;  %s3959_s14 = inlined_call_operand.vmem [shape: f32[2,1,64], index: 14, kind: input, shape index: {}]   ;;  %s3960_s15 = inlined_call_operand.vmem [shape: f32[2,1,64], index: 15, kind: input, shape index: {}]   ;;  %s3961_s16 = inlined_call_operand.hbm [shape: bf16[128,128], index: 16, kind: input, shape index: {}]   ;;  %s3962_s17 = inlined_call_operand.vmem [shape: f32[1,128], index: 17, kind: input, shape index: {}]   ;;  %s3963_s18 = inlined_call_operand.hbm [shape: f32[2,128], index: 18, kind: output, shape index: {}]  }
   0x1   :  { %3971 = sst [smem:[#allocation18_spill]] %s3945_s0 }
   0x2   :  { %3972 = sst [smem:[#allocation19_spill]] %s3946_s1 }
   0x3   :  { %3973 = sst [smem:[#allocation20_spill]] %s3947_s2 }
   0x4   :  { %3974 = sst [smem:[#allocation21_spill]] %s3963_s18 }
   0x5   :  { %23 = vsyncpa [#allocation5], 0 }
   0x6   :  { %24 = vsyncpa [#allocation8], 0 }
   0x7   :  { %25 = vsyncpa [#allocation11], 0 }
   0x8   :  { %26 = vsyncpa [#allocation6], 0  ;;  %s3264_s27 = smov [#allocation7]   ;;  %s3265_s29 = smov [#allocation10]  }
   0x9   :  { %s47_s28 = sshll.u32 %s3264_s27, 4  ;;  %s78_s30 = sshll.u32 %s3265_s29, 4  ;;  %s48_s28 = int_to_ptr.vmem [resolvable:$true] %s47_s28  ;;  %s3374_s30 = int_to_ptr.vmem [resolvable:$true] %s78_s30 }
   0xa   :  { %s3975_s1 = sld [smem:[#allocation20_spill]] }
  0x10   :  { %s3124_s20 = scalar_lea.hbm %s3975_s1, 16 }
  0x11   :  { %p3125_p0 = scmp.ne.s32.totalorder %s3975_s1, %s3124_s20  ;;  %p3128_p1 = scmp.lt.u32.totalorder %s3124_s20, %s3975_s1 }
  0x13   :  { %p3130_p2 = pnand %p3128_p1, %p3125_p0 }
  0x15   :  { %3133 = shalt.err (!%p3130_p2)
}
  0x16   :  { %s3134_s24 = scalar_lea.vmem %s48_s28, 16  ;;  %s3138_s25 = scalar_lea.vmem %s48_s28, 32 }
  0x17   :  { %p3135_p3 = scmp.ne.s32.totalorder %s48_s28, %s3134_s24  ;;  %p3139_p4 = scmp.lt.s32.totalorder %s48_s28, %s48_s28 }
  0x18   :  { %p3140_p5 = scmp.lt.s32.totalorder %s3138_s25, %s3134_s24 }
  0x1a   :  { %p3141_p6 = por %p3140_p5, %p3139_p4 }
  0x1c   :  { %p3142_p7 = pnand %p3141_p6, %p3135_p3 }
  0x1e   :  { %3145 = shalt.err (!%p3142_p7)
}
  0x1f   :  { %50 = dma.hbm_to_vmem [thread:$0]  %s3975_s1, 16, %s48_s28, [#allocation8]  }
  0x20   :  { %s3146_s19 = scalar_lea.hbm %s3955_s10, 1024 }
  0x21   :  { %p3147_p8 = scmp.ne.s32.totalorder %s3955_s10, %s3146_s19  ;;  %p3150_p9 = scmp.lt.u32.totalorder %s3146_s19, %s3955_s10 }
  0x23   :  { %p3152_p10 = pnand %p3150_p9, %p3147_p8 }
  0x25   :  { %3155 = shalt.err (!%p3152_p10)
}
  0x26   :  { %s3156_s23 = scalar_lea.vmem %s3374_s30, 1024  ;;  %p3161_p12 = scmp.lt.s32.totalorder %s3374_s30, %s3374_s30 }
  0x27   :  { %p3157_p11 = scmp.ne.s32.totalorder %s3374_s30, %s3156_s23  ;;  %p3162_p13 = scmp.lt.s32.totalorder %s3156_s23, %s3156_s23 }
  0x29   :  { %p3163_p0 = por %p3162_p13, %p3161_p12 }
  0x2b   :  { %p3164_p1 = pnand %p3163_p0, %p3157_p11 }
  0x2d   :  { %3167 = shalt.err (!%p3164_p1)
}
  0x2e   :  { %s3968_s28 = smov 64   ;;  %s3970_s1 = smov 4  }
  0x2f   :  { %84 = dma.hbm_to_vmem [thread:$0]  %s3955_s10, 1024, %s3374_s30, [#allocation11], %s3968_s28, %s3968_s28, %s3970_s1  }
  0x30   :  { %s3268_s26 = smov [#allocation4]   ;;  %s3976_s19 = sld [smem:[#allocation18_spill]] }
  0x31   :  { %s32_s27 = sshll.u32 %s3268_s26, 4  ;;  %s33_s27 = int_to_ptr.vmem [resolvable:$true] %s32_s27 }
  0x36   :  { %s3168_s21 = scalar_lea.hbm %s3976_s19, 256 }
  0x37   :  { %p3169_p2 = scmp.ne.s32.totalorder %s3976_s19, %s3168_s21  ;;  %p3172_p3 = scmp.lt.u32.totalorder %s3168_s21, %s3976_s19 }
  0x39   :  { %p3174_p4 = pnand %p3172_p3, %p3169_p2 }
  0x3b   :  { %3177 = shalt.err (!%p3174_p4)
}
  0x3c   :  { %s3178_s18 = scalar_lea.vmem %s33_s27, 256  ;;  %p3183_p6 = scmp.lt.s32.totalorder %s33_s27, %s33_s27 }
  0x3d   :  { %p3179_p5 = scmp.ne.s32.totalorder %s33_s27, %s3178_s18  ;;  %p3184_p7 = scmp.lt.s32.totalorder %s3178_s18, %s3178_s18 }
  0x3f   :  { %p3185_p8 = por %p3184_p7, %p3183_p6 }
  0x41   :  { %p3186_p9 = pnand %p3185_p8, %p3179_p5 }
  0x43   :  { %3189 = shalt.err (!%p3186_p9)
}
  0x44   :  { %s3269_s10 = smov 128   ;;  %s3270_s30 = smov 8  }
  0x45   :  { %38 = dma.hbm_to_vmem [thread:$0]  %s3976_s19, 256, %s33_s27, [#allocation5], %s3269_s10, %s3269_s10, %s3270_s30  }
  0x46   :  { %s3271_s26 = smov [#allocation9]   ;;  %s3272_s0 = smov [#allocation12]  }
  0x47   :  { %s57_s29 = sshll.u32 %s3271_s26, 4  ;;  %s100_s21 = sshll.u32 %s3272_s0, 4  ;;  %s58_s29 = int_to_ptr.vmem [resolvable:$true] %s57_s29  ;;  %s101_s21 = int_to_ptr.vmem [resolvable:$true] %s100_s21 }
  0x48   :  { %s3190_s2 = scalar_lea.hbm %s3948_s3, 16 }
  0x49   :  { %p3191_p10 = scmp.ne.s32.totalorder %s3948_s3, %s3190_s2  ;;  %p3194_p11 = scmp.lt.u32.totalorder %s3190_s2, %s3948_s3 }
  0x4b   :  { %p3196_p12 = pnand %p3194_p11, %p3191_p10 }
  0x4d   :  { %3199 = shalt.err (!%p3196_p12)
}
  0x4e   :  { %s3200_s27 = scalar_lea.vmem %s58_s29, 16  ;;  %s3204_s19 = scalar_lea.vmem %s58_s29, 32 }
  0x4f   :  { %p3201_p13 = scmp.ne.s32.totalorder %s58_s29, %s3200_s27  ;;  %p3205_p0 = scmp.lt.s32.totalorder %s58_s29, %s58_s29 }
  0x50   :  { %p3206_p1 = scmp.lt.s32.totalorder %s3204_s19, %s3200_s27 }
  0x52   :  { %p3207_p2 = por %p3206_p1, %p3205_p0 }
  0x54   :  { %p3208_p3 = pnand %p3207_p2, %p3201_p13 }
  0x56   :  { %3211 = shalt.err (!%p3208_p3)
}
  0x57   :  { %60 = dma.hbm_to_vmem [thread:$0]  %s3948_s3, 16, %s58_s29, [#allocation8]  }
  0x58   :  { %s3212_s28 = scalar_lea.hbm %s3961_s16, 1024 }
  0x59   :  { %p3213_p4 = scmp.ne.s32.totalorder %s3961_s16, %s3212_s28  ;;  %p3216_p5 = scmp.lt.u32.totalorder %s3212_s28, %s3961_s16 }
  0x5b   :  { %p3218_p6 = pnand %p3216_p5, %p3213_p4 }
  0x5d   :  { %3221 = shalt.err (!%p3218_p6)
}
  0x5e   :  { %s3222_s22 = scalar_lea.vmem %s101_s21, 1024  ;;  %p3227_p8 = scmp.lt.s32.totalorder %s101_s21, %s101_s21 }
  0x5f   :  { %p3223_p7 = scmp.ne.s32.totalorder %s101_s21, %s3222_s22  ;;  %p3228_p9 = scmp.lt.s32.totalorder %s3222_s22, %s3222_s22 }
  0x61   :  { %p3229_p10 = por %p3228_p9, %p3227_p8 }
  0x63   :  { %p3230_p11 = pnand %p3229_p10, %p3223_p7 }
  0x65   :  { %3233 = shalt.err (!%p3230_p11)
}
  0x66   :  { %s3977_s3 = smov 4   ;;  %s3978_s29 = smov 64  }
  0x67   :  { %106 = dma.hbm_to_vmem [thread:$0]  %s3961_s16, 1024, %s101_s21, [#allocation11], %s3978_s29, %s3978_s29, %s3977_s3  }
  0x68   :  { %3256 = dma.done.wait [#allocation5], 256  }
  0x69   :  { %3257 = vsyncadd [#allocation5], 4294967040 }
  0x6a   :  { %3258 = dma.done.wait [#allocation8], 32  }
  0x6b   :  { %3259 = vsyncadd [#allocation8], 4294967264 }
  0x6c   :  { %3260 = dma.done.wait [#allocation11], 2048  }
  0x6d   :  { %3261 = vsyncadd [#allocation11], 4294965248  ;;  %vm129_vm0 = vcmask 523264   ;;  %v125_v0 = vld [vmem:[#allocation4] sm:$0xff]  ;;  %v126_v1 = vld [vmem:[#allocation4 + $0x8] sm:$0xff]  ;;  %v3273_v21 = vmov 0   ;;  %v188_v42 = vlaneseq }
  0x6e   :  { %v130_v2 = vsel %vm129_vm0, %v125_v0, 0.0  ;;  %v133_v3 = vsel %vm129_vm0, %v126_v1, 0.0  ;;  %v2984_v14 = vld [vmem:[%s3949_s4 + $0x4] ss:$8 sps:$4 sm:$0xff]   ;;  %v2986_v15 = vld [vmem:[%s3949_s4] ss:$8 sps:$4 sm:$0xff]   ;;  %273 = vmatprep.mubr.bf16.mxu0 %v3273_v21 }
  0x6f   :  { %131 = vadd.xlane.f32.xlu0 %v130_v2  ;;  %241 = vmatprep.subr.bf16.mxu0 %v2984_v14  ;;  %v2987_v16 = vld [vmem:[%s3949_s4 + $0x14] ss:$8 sps:$4 sm:$0xff]   ;;  %v2989_v17 = vld [vmem:[%s3949_s4 + $0x10] ss:$8 sps:$4 sm:$0xff]   ;;  %v2990_v18 = vld [vmem:[%s3949_s4 + $0x24] ss:$8 sps:$4 sm:$0xff]  }
  0x70   :  { %242 = vmatpush1.bf16.msra.mxu0 %v2986_v15  ;;  %v2992_v19 = vld [vmem:[%s3949_s4 + $0x20] ss:$8 sps:$4 sm:$0xff]   ;;  %v2993_v20 = vld [vmem:[%s3949_s4 + $0x34] ss:$8 sps:$4 sm:$0xff]   ;;  %v2995_v22 = vld [vmem:[%s3949_s4 + $0x30] ss:$8 sps:$4 sm:$0xff]  }
  0x71   :  { %243 = vmatprep.subr.bf16.mxu0 %v2987_v16  ;;  %v2497_v30 = vld [vmem:[#allocation7] ss:$0 sm:$0xff]  ;;  %v2498_v32 = vld [vmem:[#allocation9] ss:$0 sm:$0xff]  ;;  %v3485_v43 = vshrl.u32 %v188_v42, 7  ;;  %v3274_v44 = vmov 0.0  }
  0x72   :  { %2737 = vmatprep.subr.bf16.mxu1 %v3274_v44  ;;  %v186_v46 = vld [vmem:[%s3950_s5] sm:$0x3]  ;;  %vm3275_vm1 = vmmov 0   ;;  %s3276_s16 = smov 32   ;;  %s3277_s21 = smov 96   ;;  %vm297_vm2 = vcmask 261120  }
  0x73   :  { %134 = vadd.xlane.f32.xlu0 %v133_v3  ;;  %v190_v45 = vsub.s32 0, %v3485_v43  ;;  %2739 = vmatprep.mubr.msk.bf16.mxu1 %vm3275_vm1, %v3274_v44  ;;  %v194_v48 = vsub.s32 1, %v3485_v43  ;;  %vm360_vm3 = vcmask 1043456   ;;  %s3979_s19 = sld [smem:[#allocation19_spill]]  ;;  %vm344_vm4 = vcmask 64512  }
  0x74   :  { %244 = vmatpush1.bf16.msra.mxu0 %v2989_v17  ;;  %vm521_vm5 = vcmask 523520   ;;  %vm2364_vm10 = vcmask 1040384  }
  0x75   :  { %245 = vmatprep.subr.bf16.mxu0 %v2990_v18  ;;  %v191_v47 = vrot.slane %v186_v46, %v190_v45  ;;  %v195_v52 = vrot.slane %v186_v46, %v194_v48 }
  0x78   :  { %246 = vmatpush1.bf16.msra.mxu0 %v2992_v19 }
  0x79   :  { %247 = vmatprep.subr.bf16.mxu0 %v2993_v20 }
  0x7c   :  { %248 = vmatpush1.bf16.msra.mxu0 %v2995_v22 }
  0x7d   :  { %2749 = vmatprep.subr.bf16.mxu0 %v3274_v44 }
  0xfc   :  { %v132_v4 = vpop.xlane.xlu0 %131 }
  0xfd   :  { %v137_v5 = vmul.f32 0.015625, %v132_v4 }
  0xff   :  { %v139_v6 = vsub.f32 %v125_v0, %v137_v5 }
 0x100   :  { %v135_v7 = vpop.xlane.xlu0 %134 }
 0x101   :  { %v138_v8 = vmul.f32 0.015625, %v135_v7  ;;  %v141_v9 = vmul.f32 %v139_v6, %v139_v6 }
 0x103   :  { %v140_v10 = vsub.f32 %v126_v1, %v138_v8  ;;  %v143_v11 = vsel %vm129_vm0, %v141_v9, 0.0 }
 0x104   :  { %144 = vadd.xlane.f32.xlu1 %v143_v11 }
 0x105   :  { %v142_v12 = vmul.f32 %v140_v10, %v140_v10 }
 0x107   :  { %v146_v13 = vsel %vm129_vm0, %v142_v12, 0.0  ;;  %v3538_v12 = vld [vmem:[%s3979_s19] ss:$0 sm:$0xff] }
 0x108   :  { %147 = vadd.xlane.f32.xlu1 %v146_v13 }
 0x191   :  { %v145_v23 = vpop.xlane.xlu1 %144 }
 0x192   :  { %v149_v24 = vmul.f32 0.015625, %v145_v23 }
 0x194   :  { %v151_v25 = vadd.f32 1e-12, %v149_v24 }
 0x195   :  { %v148_v26 = vpop.xlane.xlu1 %147 }
 0x196   :  { %3048 = vrsqrt.f32 %v151_v25  ;;  %v150_v27 = vmul.f32 0.015625, %v148_v26  ;;  %v3547_v26 = vld [vmem:[%s3979_s19 + $0x1] ss:$0 sm:$0xff] }
 0x198   :  { %v152_v28 = vadd.f32 1e-12, %v150_v27 }
 0x19a   :  { %3050 = vrsqrt.f32 %v152_v28 }
 0x1a0   :  { %v3049_v29 = vpop.eup %3048 }
 0x1a1   :  { %v155_v31 = vmul.f32 %v3049_v29, %v139_v6 }
 0x1a3   :  { %v163_v33 = vmul.f32 %v2497_v30, %v155_v31 }
 0x1a4   :  { %v3051_v34 = vpop.eup %3050 }
 0x1a5   :  { %v171_v35 = vadd.f32 %v2498_v32, %v163_v33  ;;  %v156_v36 = vmul.f32 %v3051_v34, %v140_v10 }
 0x1a7   :  { %173 = vst.msk [vmem:[#allocation2] sm:$0xff] %vm129_vm0, %v171_v35  ;;  %v164_v37 = vmul.f32 %v2497_v30, %v156_v36 }
 0x1a9   :  { %v172_v38 = vadd.f32 %v2498_v32, %v164_v37 }
 0x1ab   :  { %174 = vst.msk [vmem:[#allocation2 + $0x8] sm:$0xff] %vm129_vm0, %v172_v38 }
 0x1ae   :  { %v3478_v39 = vld [vmem:[#allocation2] sm:$0xff] }
 0x1b2   :  { %v3480_v40 = vld [vmem:[#allocation2 + $0x8] sm:$0xff] }
 0x1b3   :  { %v177_v41 = vpack.c.bf16 %v3480_v40, %v3478_v39 }
 0x1b5   :  { %2507 = vmatmul.mubr.msk.bf16.vlgmr.msra.gmra.mrb[0].mxu0 %vm129_vm0, %v177_v41 }
 0x1b6   :  { %2751 = vmatprep.mubr.msk.bf16.mxu0 %vm3275_vm1, %v3274_v44 }
 0x288   :  { %v275_v49 = vpop.f32.mrb[0].mxu0 }
 0x289   :  { %v276_v50 = vadd.f32 %v275_v49, %v191_v47  ;;  %v277_v51 = vpop.f32.mrb[1].mxu0 }
 0x28a   :  { %v279_v53 = vpop.f32.mrb[2].mxu0  ;;  %v278_v1 = vadd.f32 %v277_v51, %v195_v52 }
 0x28b   :  { %v284_v54 = vmul.f32 0.17677669, %v276_v50  ;;  %v286_v55 = vpack.c.bf16 %v276_v50, %v276_v50  ;;  %v280_v56 = vadd.f32 %v279_v53, %v191_v47  ;;  %v281_v57 = vpop.f32.mrb[3].mxu0 }
 0x28c   :  { %v3502_v58 = vadd.f32 %v281_v57, %v195_v52  ;;  %v3514_v5 = vpack.c.bf16 %v278_v1, %v278_v1 }
 0x28d   :  { %408 = vrot.lane.b32.xlu1 %v286_v55, %s3276_s16  ;;  %295 = vrot.lane.b32.xlu0 %v286_v55, %s3978_s29  ;;  %v289_v59 = vpack.c.bf16 %v284_v54, %v284_v54  ;;  %v523_v60 = vpack.c.bf16 %v280_v56, %v280_v56  ;;  %v285_v61 = vmul.f32 0.17677669, %v280_v56 }
 0x28e   :  { %v362_v7 = vsel %vm360_vm3, %v3514_v5, 0 }
 0x28f   :  { %v526_v62 = vpack.c.bf16 %v285_v61, %v285_v61 }
 0x291   :  { %642 = vrot.lane.b32.xlu0 %v523_v60, %s3276_s16  ;;  %406 = vrot.lane.b32.xlu1 %v289_v59, %s3277_s21 }
 0x295   :  { %532 = vrot.lane.b32.xlu1 %v523_v60, %s3978_s29 }
 0x299   :  { %640 = vrot.lane.b32.xlu1 %v526_v62, %s3277_s21 }
 0x2ff   :  { %v409_v63 = vpop.permute.xlu1 %408  ;;  %v296_v0 = vpop.permute.xlu0 %295 }
 0x300   :  { %v414_v2 = vsel %vm297_vm2, %v409_v63, 0  ;;  %v302_v3 = vsel %vm297_vm2, %v296_v0, 0 }
 0x301   :  { %2738 = vmatpush3.bf16.xpose.msra.mxu1 %v302_v3  ;;  %2750 = vmatpush3.bf16.xpose.msra.mxu0 %v414_v2  ;;  %v524_v2 = vpack.c.bf16 %v3502_v58, %v3502_v58 }
 0x302   :  { %2743 = vmatprep.subr.bf16.mxu1 %v3274_v44  ;;  %2761 = vmatprep.subr.bf16.mxu0 %v3274_v44 }
 0x303   :  { %v407_v4 = vpop.permute.xlu1 %406  ;;  %v643_v9 = vpop.permute.xlu0 %642 }
 0x304   :  { %v648_v10 = vsel %vm297_vm2, %v643_v9, 0 }
 0x307   :  { %v533_v6 = vpop.permute.xlu1 %532 }
 0x308   :  { %v538_v8 = vsel %vm297_vm2, %v533_v6, 0  ;;  %2740 = vmatmul.mubr.msk.bf16.vlgmr.msra.gmra.mrb[0].mxu1 %vm297_vm2, %v289_v59  ;;  %2752 = vmatmul.mubr.msk.bf16.vlgmr.msra.gmra.mrb[4].mxu0 %vm297_vm2, %v407_v4 }
 0x309   :  { %2744 = vmatpush3.bf16.msra.mxu1 %v362_v7  ;;  %2762 = vmatpush3.bf16.xpose.msra.mxu0 %v538_v8 }
 0x30a   :  { %2763 = vmatprep.mubr.msk.bf16.mxu0 %vm3275_vm1, %v3274_v44  ;;  %2773 = vmatprep.subr.bf16.mxu0 %v3274_v44 }
 0x30b   :  { %2745 = vmatprep.mubr.msk.bf16.mxu1 %vm3275_vm1, %v3274_v44  ;;  %2755 = vmatprep.subr.bf16.mxu1 %v3274_v44  ;;  %v641_v11 = vpop.permute.xlu1 %640 }
 0x310   :  { %2764 = vmatmul.mubr.msk.bf16.vlgmr.msra.gmra.mrb[8].mxu0 %vm297_vm2, %v526_v62 }
 0x311   :  { %2774 = vmatpush3.bf16.xpose.msra.mxu0 %v648_v10  ;;  %2775 = vmatprep.mubr.msk.bf16.mxu0 %vm3275_vm1, %v3274_v44 }
 0x312   :  { %2785 = vmatprep.subr.bf16.mxu0 %v3274_v44 }
 0x318   :  { %2776 = vmatmul.mubr.msk.bf16.vlgmr.msra.gmra.mrb[12].mxu0 %vm297_vm2, %v641_v11 }
 0x319   :  { %2793 = vmatprep.mubr.msk.bf16.mxu0 %vm3275_vm1, %v3274_v44 }
 0x3db   :  { %v338_v13 = vpop.f32.mrb[0].mxu1  ;;  %v450_v14 = vpop.f32.mrb[4].mxu0 }
 0x3dc   :  { %v339_v15 = vadd.f32 %v3538_v12, %v338_v13  ;;  %v451_v16 = vadd.f32 %v3538_v12, %v450_v14  ;;  %v2741_v17 = vpop.f32.mrb[1].mxu1  ;;  %v2753_v18 = vpop.f32.mrb[5].mxu0 }
 0x3dd   :  { %v341_v19 = vpop.f32.mrb[2].mxu1  ;;  %v453_v20 = vpop.f32.mrb[6].mxu0 }
 0x3de   :  { %v2742_v22 = vpop.f32.mrb[3].mxu1  ;;  %v2754_v23 = vpop.f32.mrb[7].mxu0  ;;  %v456_v24 = vsel %vm344_vm4, %v451_v16, -inf  ;;  %v345_v25 = vsel %vm344_vm4, %v339_v15, -inf }
 0x3df   :  { %457 = vmax.xlane.f32.xlu1 %v456_v24  ;;  %346 = vmax.xlane.f32.xlu0 %v345_v25  ;;  %v2996_v25 = vld [vmem:[%s3951_s6] sm:$0xff]  }
 0x3e0   :  { %2786 = vmatpush3.bf16.msra.mxu0 %v2996_v25 }
 0x3e1   :  { %2787 = vmatprep.subr.bf16.mxu0 %v3274_v44 }
 0x3e3   :  { %v574_v27 = vpop.f32.mrb[8].mxu0 }
 0x3e4   :  { %v575_v28 = vadd.f32 %v3547_v26, %v574_v27  ;;  %v2765_v29 = vpop.f32.mrb[9].mxu0  ;;  %v2997_v27 = vld [vmem:[%s3951_s6 + $0x8] sm:$0xff]  }
 0x3e5   :  { %v577_v30 = vpop.f32.mrb[10].mxu0  ;;  %2788 = vmatpush3.bf16.msra.mxu0 %v2997_v27  ;;  %v2524_v27 = vld [vmem:[%s3953_s8] ss:$0 sm:$0xff] }
 0x3e6   :  { %v2766_v31 = vpop.f32.mrb[11].mxu0  ;;  %v580_v32 = vsel %vm344_vm4, %v575_v28, -inf  ;;  %2789 = vmatprep.subr.bf16.mxu0 %v3274_v44 }
 0x3e7   :  { %581 = vmax.xlane.f32.xlu0 %v580_v32 }
 0x3eb   :  { %v684_v33 = vpop.f32.mrb[12].mxu0 }
 0x3ec   :  { %v685_v34 = vadd.f32 %v3547_v26, %v684_v33  ;;  %v2777_v35 = vpop.f32.mrb[13].mxu0 }
 0x3ed   :  { %v687_v36 = vpop.f32.mrb[14].mxu0 }
 0x3ee   :  { %v2778_v37 = vpop.f32.mrb[15].mxu0  ;;  %v690_v38 = vsel %vm344_vm4, %v685_v34, -inf  ;;  %v2998_v36 = vld [vmem:[%s3951_s6 + $0x10] sm:$0xff]  }
 0x3ef   :  { %691 = vmax.xlane.f32.xlu0 %v690_v38  ;;  %2790 = vmatpush3.bf16.msra.mxu0 %v2998_v36  ;;  %v2999_v37 = vld [vmem:[%s3951_s6 + $0x18] sm:$0xff]   ;;  %v3004_v36 = vld [vmem:[%s3957_s12] sm:$0xff]  }
 0x3f0   :  { %2791 = vmatprep.subr.bf16.mxu0 %v3274_v44 }
 0x3f3   :  { %2792 = vmatpush3.bf16.msra.mxu0 %v2999_v37  ;;  %v3005_v37 = vld [vmem:[%s3957_s12 + $0x8] sm:$0xff]  }
 0x3f4   :  { %2809 = vmatprep.subr.bf16.mxu0 %v3274_v44 }
 0x46c   :  { %v458_v41 = vpop.xlane.xlu1 %457  ;;  %v347_v42 = vpop.xlane.xlu0 %346 }
 0x46d   :  { %v459_v46 = vsub.f32 %v451_v16, %v458_v41  ;;  %v348_v47 = vsub.f32 %v339_v15, %v347_v42  ;;  %v596_v16 = vsel %vm360_vm3, %v524_v2, 0 }
 0x46f   :  { %v460_v49 = vmul.f32 1.442695, %v459_v46  ;;  %v349_v50 = vmul.f32 1.442695, %v348_v47 }
 0x471   :  { %3052 = vpow2.f32 %v460_v49 }
 0x472   :  { %3054 = vpow2.f32 %v349_v50 }
 0x474   :  { %v582_v51 = vpop.xlane.xlu0 %581 }
 0x475   :  { %v583_v52 = vsub.f32 %v575_v28, %v582_v51 }
 0x477   :  { %v584_v53 = vmul.f32 1.442695, %v583_v52 }
 0x479   :  { %3056 = vpow2.f32 %v584_v53 }
 0x47b   :  { %v3053_v54 = vpop.eup %3052 }
 0x47c   :  { %v3055_v55 = vpop.eup %3054  ;;  %v692_v56 = vpop.xlane.xlu0 %691  ;;  %v462_v57 = vsel %vm344_vm4, %v3053_v54, 0.0 }
 0x47d   :  { %v693_v59 = vsub.f32 %v685_v34, %v692_v56  ;;  %463 = vadd.xlane.f32.xlu1 %v462_v57  ;;  %v351_v60 = vsel %vm344_vm4, %v3055_v55, 0.0  ;;  %v2518_v57 = vld [vmem:[%s3952_s7] ss:$0 sm:$0xff] }
 0x47e   :  { %352 = vadd.xlane.f32.xlu0 %v351_v60 }
 0x47f   :  { %v694_v61 = vmul.f32 1.442695, %v693_v59 }
 0x481   :  { %3058 = vpow2.f32 %v694_v61 }
 0x483   :  { %v3057_v62 = vpop.eup %3056 }
 0x484   :  { %v586_v63 = vsel %vm344_vm4, %v3057_v62, 0.0 }
 0x485   :  { %587 = vadd.xlane.f32.xlu0 %v586_v63 }
 0x48b   :  { %v3059_v0 = vpop.eup %3058 }
 0x48c   :  { %v696_v1 = vsel %vm344_vm4, %v3059_v0, 0.0 }
 0x48d   :  { %697 = vadd.xlane.f32.xlu1 %v696_v1 }
 0x49b   :  { %469 = vrot.lane.b32.xlu0 %v3514_v5, %s3277_s21 }
 0x49e   :  { %703 = vrot.lane.b32.xlu1 %v524_v2, %s3277_s21 }
 0x50a   :  { %v464_v4 = vpop.xlane.xlu1 %463 }
 0x50b   :  { %v353_v3 = vpop.xlane.xlu0 %352 }
 0x50c   :  { %3060 = vrcp.f32 %v353_v3 }
 0x50d   :  { %3062 = vrcp.f32 %v464_v4 }
 0x512   :  { %v588_v6 = vpop.xlane.xlu0 %587 }
 0x513   :  { %3064 = vrcp.f32 %v588_v6 }
 0x516   :  { %v3061_v7 = vpop.eup %3060  ;;  %v470_v9 = vpop.permute.xlu0 %469 }
 0x517   :  { %v355_v8 = vmul.f32 %v3061_v7, %v3055_v55  ;;  %v3063_v11 = vpop.eup %3062  ;;  %v475_v13 = vsel %vm360_vm3, %v470_v9, 0 }
 0x518   :  { %v466_v58 = vmul.f32 %v3063_v11, %v3053_v54 }
 0x519   :  { %v356_v10 = vpack.c.bf16 %v355_v8, %v355_v8 }
 0x51a   :  { %v698_v5 = vpop.xlane.xlu1 %697  ;;  %v467_v14 = vpack.c.bf16 %v466_v58, %v466_v58 }
 0x51b   :  { %2746 = vmatmul.mubr.msk.bf16.vlgmr.msra.gmra.mrb[4].mxu1 %vm344_vm4, %v356_v10  ;;  %3066 = vrcp.f32 %v698_v5 }
 0x51c   :  { %2756 = vmatpush3.bf16.msra.mxu1 %v475_v13  ;;  %2757 = vmatprep.mubr.msk.bf16.mxu1 %vm3275_vm1, %v3274_v44 }
 0x51d   :  { %2767 = vmatprep.subr.bf16.mxu1 %v3274_v44  ;;  %v3065_v15 = vpop.eup %3064 }
 0x51e   :  { %v590_v17 = vmul.f32 %v3065_v15, %v3057_v62  ;;  %v704_v18 = vpop.permute.xlu1 %703  ;;  %v3002_v15 = vld [vmem:[#allocation10 + $0x10] sm:$0xff]  }
 0x51f   :  { %v709_v22 = vsel %vm360_vm3, %v704_v18, 0 }
 0x520   :  { %v591_v19 = vpack.c.bf16 %v590_v17, %v590_v17 }
 0x523   :  { %2758 = vmatmul.mubr.msk.bf16.vlgmr.msra.gmra.mrb[8].mxu1 %vm344_vm4, %v467_v14  ;;  %v3000_v14 = vld [vmem:[#allocation10] sm:$0xff]  }
 0x524   :  { %2768 = vmatpush3.bf16.msra.mxu1 %v596_v16  ;;  %2769 = vmatprep.mubr.msk.bf16.mxu1 %vm3275_vm1, %v3274_v44  ;;  %v3003_v16 = vld [vmem:[#allocation10 + $0x18] sm:$0xff]  }
 0x525   :  { %2779 = vmatprep.subr.bf16.mxu1 %v3274_v44  ;;  %v3067_v20 = vpop.eup %3066 }
 0x526   :  { %v700_v23 = vmul.f32 %v3067_v20, %v3059_v0 }
 0x528   :  { %v701_v24 = vpack.c.bf16 %v700_v23, %v700_v23 }
 0x52b   :  { %2770 = vmatmul.mubr.msk.bf16.vlgmr.msra.gmra.mrb[12].mxu1 %vm344_vm4, %v591_v19 }
 0x52c   :  { %2780 = vmatpush3.bf16.msra.mxu1 %v709_v22  ;;  %2781 = vmatprep.mubr.msk.bf16.mxu1 %vm3275_vm1, %v3274_v44 }
 0x52d   :  { %2797 = vmatprep.subr.bf16.mxu1 %v3274_v44 }
 0x533   :  { %2782 = vmatmul.mubr.msk.bf16.vlgmr.msra.gmra.mrb[16].mxu1 %vm344_vm4, %v701_v24 }
 0x534   :  { %2805 = vmatprep.mubr.msk.bf16.mxu1 %vm3275_vm1, %v3274_v44  ;;  %2798 = vmatpush3.bf16.msra.mxu1 %v3000_v14 }
 0x535   :  { %2799 = vmatprep.subr.bf16.mxu1 %v3274_v44 }
 0x5ee   :  { %v398_v28 = vpop.f32.mrb[4].mxu1 }
 0x5ef   :  { %404 = vst.msk [vmem:[#allocation3] sm:$0xff] %vm297_vm2, %v398_v28  ;;  %v2747_v29 = vpop.f32.mrb[5].mxu1 }
 0x5f0   :  { %v401_v30 = vpop.f32.mrb[6].mxu1 }
 0x5f1   :  { %v2748_v31 = vpop.f32.mrb[7].mxu1 }
 0x5f2   :  { %v2525_v31 = vld [vmem:[%s3954_s9] ss:$0 sm:$0xff] }
 0x5f6   :  { %v511_v32 = vpop.f32.mrb[8].mxu1 }
 0x5f7   :  { %518 = vrot.lane.b32.xlu1 %v511_v32, %s3276_s16  ;;  %v2759_v33 = vpop.f32.mrb[9].mxu1 }
 0x5f8   :  { %v514_v34 = vpop.f32.mrb[10].mxu1 }
 0x5f9   :  { %v2760_v35 = vpop.f32.mrb[11].mxu1 }
 0x5fe   :  { %v632_v38 = vpop.f32.mrb[12].mxu1 }
 0x5ff   :  { %638 = vst.msk [vmem:[#allocation3 + $0x8] sm:$0xff] %vm297_vm2, %v632_v38  ;;  %v2771_v41 = vpop.f32.mrb[13].mxu1  ;;  %v3006_v38 = vld [vmem:[%s3957_s12 + $0x10] sm:$0xff]  }
 0x600   :  { %v635_v42 = vpop.f32.mrb[14].mxu1  ;;  %v3008_v41 = vld [vmem:[%s3957_s12 + $0x20] sm:$0xff]  }
 0x601   :  { %v2772_v46 = vpop.f32.mrb[15].mxu1  ;;  %v3009_v42 = vld [vmem:[%s3957_s12 + $0x28] sm:$0xff]  }
 0x602   :  { %v3010_v46 = vld [vmem:[%s3957_s12 + $0x30] sm:$0xff]  }
 0x606   :  { %v745_v47 = vpop.f32.mrb[16].mxu1 }
 0x607   :  { %752 = vrot.lane.b32.xlu1 %v745_v47, %s3276_s16  ;;  %v2783_v49 = vpop.f32.mrb[17].mxu1  ;;  %v3011_v47 = vld [vmem:[%s3957_s12 + $0x38] sm:$0xff]  }
 0x608   :  { %v748_v50 = vpop.f32.mrb[18].mxu1  ;;  %v2526_v49 = vld [vmem:[%s3956_s11] ss:$0 sm:$0xff] }
 0x609   :  { %v2784_v51 = vpop.f32.mrb[19].mxu1 }
 0x669   :  { %v519_v52 = vpop.permute.xlu1 %518 }
 0x66a   :  { %522 = vst.msk [vmem:[#allocation3] sm:$0xff] %vm521_vm5, %v519_v52 }
 0x671   :  { %v756_v54 = vld [vmem:[#allocation3] sm:$0xff] }
 0x679   :  { %v753_v53 = vpop.permute.xlu1 %752 }
 0x67a   :  { %755 = vst.msk [vmem:[#allocation3 + $0x8] sm:$0xff] %vm521_vm5, %v753_v53 }
 0x681   :  { %v757_v55 = vld [vmem:[#allocation3 + $0x8] sm:$0xff] }
 0x682   :  { %v758_v56 = vpack.c.bf16 %v757_v55, %v756_v54 }
 0x684   :  { %2794 = vmatmul.mubr.msk.bf16.vlgmr.msra.gmra.mrb[16].mxu0 %vm129_vm0, %v758_v56 }
 0x685   :  { %2825 = vmatprep.mubr.msk.bf16.mxu0 %vm3275_vm1, %v3274_v44  ;;  %2810 = vmatpush3.bf16.msra.mxu0 %v3004_v36 }
 0x686   :  { %2811 = vmatprep.subr.bf16.mxu0 %v3274_v44 }
 0x689   :  { %2812 = vmatpush3.bf16.msra.mxu0 %v3005_v37 }
 0x68a   :  { %2813 = vmatprep.subr.bf16.mxu0 %v3274_v44 }
 0x68d   :  { %2814 = vmatpush3.bf16.msra.mxu0 %v3006_v38 }
 0x68e   :  { %2815 = vmatprep.subr.bf16.mxu0 %v3274_v44 }
 0x757   :  { %v835_v59 = vpop.f32.mrb[16].mxu0 }
 0x758   :  { %v836_v60 = vadd.f32 %v2518_v57, %v835_v59  ;;  %v2795_v61 = vpop.f32.mrb[17].mxu0 }
 0x759   :  { %v838_v62 = vpop.f32.mrb[18].mxu0 }
 0x75a   :  { %v839_v63 = vadd.f32 %v2518_v57, %v838_v62  ;;  %v2796_v0 = vpop.f32.mrb[19].mxu0  ;;  %v842_v1 = vadd.f32 %v836_v60, %v3478_v39 }
 0x75c   :  { %v846_v2 = vsel %vm129_vm0, %v842_v1, 0.0  ;;  %v843_v3 = vadd.f32 %v839_v63, %v3480_v40  ;;  %v3001_v40 = vld [vmem:[#allocation10 + $0x8] sm:$0xff]  }
 0x75d   :  { %847 = vadd.xlane.f32.xlu0 %v846_v2  ;;  %2800 = vmatpush3.bf16.msra.mxu1 %v3001_v40 }
 0x75e   :  { %v849_v4 = vsel %vm129_vm0, %v843_v3, 0.0  ;;  %2801 = vmatprep.subr.bf16.mxu1 %v3274_v44 }
 0x75f   :  { %850 = vadd.xlane.f32.xlu1 %v849_v4 }
 0x761   :  { %2802 = vmatpush3.bf16.msra.mxu1 %v3002_v15 }
 0x762   :  { %2803 = vmatprep.subr.bf16.mxu1 %v3274_v44 }
 0x765   :  { %2804 = vmatpush3.bf16.msra.mxu1 %v3003_v16 }
 0x7ea   :  { %v848_v6 = vpop.xlane.xlu0 %847 }
 0x7eb   :  { %v852_v7 = vmul.f32 0.015625, %v848_v6 }
 0x7ec   :  { %v851_v8 = vpop.xlane.xlu1 %850 }
 0x7ed   :  { %v854_v9 = vsub.f32 %v842_v1, %v852_v7  ;;  %v853_v10 = vmul.f32 0.015625, %v851_v8 }
 0x7ef   :  { %v855_v11 = vsub.f32 %v843_v3, %v853_v10  ;;  %v856_v13 = vmul.f32 %v854_v9, %v854_v9 }
 0x7f1   :  { %v858_v58 = vsel %vm129_vm0, %v856_v13, 0.0  ;;  %v857_v5 = vmul.f32 %v855_v11, %v855_v11 }
 0x7f2   :  { %859 = vadd.xlane.f32.xlu0 %v858_v58 }
 0x7f3   :  { %v861_v39 = vsel %vm129_vm0, %v857_v5, 0.0 }
 0x7f6   :  { %862 = vadd.xlane.f32.xlu0 %v861_v39 }
 0x87f   :  { %v860_v17 = vpop.xlane.xlu0 %859 }
 0x880   :  { %v864_v18 = vmul.f32 0.015625, %v860_v17 }
 0x882   :  { %v866_v19 = vadd.f32 1e-12, %v864_v18 }
 0x883   :  { %v863_v20 = vpop.xlane.xlu0 %862 }
 0x884   :  { %3068 = vrsqrt.f32 %v866_v19  ;;  %v865_v22 = vmul.f32 0.015625, %v863_v20 }
 0x886   :  { %v867_v23 = vadd.f32 1e-12, %v865_v22 }
 0x888   :  { %3070 = vrsqrt.f32 %v867_v23 }
 0x88e   :  { %v3069_v24 = vpop.eup %3068 }
 0x88f   :  { %v870_v25 = vmul.f32 %v3069_v24, %v854_v9 }
 0x891   :  { %v878_v29 = vmul.f32 %v2524_v27, %v870_v25 }
 0x892   :  { %v3071_v28 = vpop.eup %3070 }
 0x893   :  { %v871_v30 = vmul.f32 %v3071_v28, %v855_v11  ;;  %v3623_v33 = vadd.f32 %v2525_v31, %v878_v29 }
 0x895   :  { %v879_v32 = vmul.f32 %v2524_v27, %v871_v30 }
 0x897   :  { %v3625_v34 = vadd.f32 %v2525_v31, %v879_v32 }
 0x899   :  { %v888_v35 = vpack.c.bf16 %v3625_v34, %v3623_v33 }
 0x89b   :  { %2806 = vmatmul.mubr.msk.bf16.vlgmr.msra.gmra.mrb[20].mxu1 %vm129_vm0, %v888_v35 }
 0x89c   :  { %1287 = vmatprep.mubr.bf16.mxu1 %v3273_v21  ;;  %v3007_v21 = vld [vmem:[%s3957_s12 + $0x18] sm:$0xff]  }
 0x89d   :  { %2816 = vmatpush3.bf16.msra.mxu0 %v3007_v21 }
 0x89e   :  { %2817 = vmatprep.subr.bf16.mxu0 %v3274_v44 }
 0x8a1   :  { %2818 = vmatpush3.bf16.msra.mxu0 %v3008_v41 }
 0x8a2   :  { %2819 = vmatprep.subr.bf16.mxu0 %v3274_v44 }
 0x8a5   :  { %2820 = vmatpush3.bf16.msra.mxu0 %v3009_v42 }
 0x8a6   :  { %2821 = vmatprep.subr.bf16.mxu0 %v3274_v44 }
 0x8a9   :  { %2822 = vmatpush3.bf16.msra.mxu0 %v3010_v46 }
 0x8aa   :  { %2823 = vmatprep.subr.bf16.mxu0 %v3274_v44 }
 0x8ad   :  { %2824 = vmatpush3.bf16.msra.mxu0 %v3011_v47 }
 0x8ae   :  { %2841 = vmatprep.subr.bf16.mxu0 %v3274_v44 }
 0x96e   :  { %v965_v50 = vpop.f32.mrb[20].mxu1 }
 0x96f   :  { %v966_v51 = vadd.f32 %v2526_v49, %v965_v50  ;;  %v2807_v52 = vpop.f32.mrb[21].mxu1 }
 0x970   :  { %v968_v53 = vpop.f32.mrb[22].mxu1  ;;  %v2536_v52 = vld [vmem:[%s3958_s13] ss:$0 sm:$0xff] }
 0x971   :  { %v972_v54 = vmul.f32 0.70710677, %v966_v51  ;;  %v969_v55 = vadd.f32 %v2526_v49, %v968_v53  ;;  %v2808_v56 = vpop.f32.mrb[23].mxu1  ;;  %v1020_v41 = vmul.f32 0.5, %v966_v51 }
 0x973   :  { %v974_v57 = vand.u32 2147483647, %v972_v54  ;;  %v973_v59 = vmul.f32 0.70710677, %v969_v55  ;;  %vm1014_vm6 = vcmp.ge.f32.partialorder %v972_v54, 0.0  ;;  %v1021_v42 = vmul.f32 0.5, %v969_v55 }
 0x975   :  { %v976_v60 = vmul.f32 0.3275911, %v974_v57  ;;  %v975_v61 = vand.u32 2147483647, %v973_v59  ;;  %v1002_v1 = vsub.f32 0.0, %v974_v57  ;;  %vm1015_vm7 = vcmp.ge.f32.partialorder %v973_v59, 0.0 }
 0x977   :  { %v978_v62 = vadd.f32 1.0, %v976_v60  ;;  %v977_v63 = vmul.f32 0.3275911, %v975_v61  ;;  %v1003_v2 = vsub.f32 0.0, %v975_v61  ;;  %v1004_v4 = vmul.f32 %v1002_v1, %v974_v57 }
 0x979   :  { %3072 = vrcp.f32 %v978_v62  ;;  %v979_v0 = vadd.f32 1.0, %v977_v63  ;;  %v1005_v9 = vmul.f32 %v1003_v2, %v975_v61  ;;  %v1006_v10 = vmul.f32 1.442695, %v1004_v4 }
 0x97b   :  { %3074 = vrcp.f32 %v979_v0  ;;  %v1008_v39 = vmul.f32 1.442695, %v1005_v9  ;;  %v3012_v9 = vld [vmem:[%s3949_s4 + $0x40] ss:$8 sps:$4 sm:$0xff]  }
 0x97c   :  { %3076 = vpow2.f32 %v1006_v10  ;;  %v3017_v10 = vld [vmem:[%s3949_s4 + $0x54] ss:$8 sps:$4 sm:$0xff]  }
 0x97d   :  { %3078 = vpow2.f32 %v1008_v39  ;;  %v3021_v39 = vld [vmem:[%s3949_s4 + $0x70] ss:$8 sps:$4 sm:$0xff]  }
 0x983   :  { %v3073_v3 = vpop.eup %3072 }
 0x984   :  { %v984_v6 = vmul.f32 1.0614054, %v3073_v3 }
 0x985   :  { %v3075_v7 = vpop.eup %3074 }
 0x986   :  { %v2532_v8 = vadd.f32 -1.4531521, %v984_v6  ;;  %v985_v11 = vmul.f32 1.0614054, %v3075_v7  ;;  %v3077_v24 = vpop.eup %3076 }
 0x987   :  { %v3079_v29 = vpop.eup %3078 }
 0x988   :  { %v988_v13 = vmul.f32 %v3073_v3, %v2532_v8  ;;  %v2533_v58 = vadd.f32 -1.4531521, %v985_v11  ;;  %v3015_v11 = vld [vmem:[%s3949_s4 + $0x50] ss:$8 sps:$4 sm:$0xff]  }
 0x98a   :  { %v990_v5 = vadd.f32 1.4214138, %v988_v13  ;;  %v989_v14 = vmul.f32 %v3075_v7, %v2533_v58  ;;  %v3018_v13 = vld [vmem:[%s3949_s4 + $0x60] ss:$8 sps:$4 sm:$0xff]   ;;  %v3020_v58 = vld [vmem:[%s3949_s4 + $0x64] ss:$8 sps:$4 sm:$0xff]  }
 0x98c   :  { %v992_v40 = vmul.f32 %v3073_v3, %v990_v5  ;;  %v991_v15 = vadd.f32 1.4214138, %v989_v14  ;;  %v3023_v5 = vld [vmem:[%s3949_s4 + $0x74] ss:$8 sps:$4 sm:$0xff]  }
 0x98e   :  { %v2534_v16 = vadd.f32 -0.28449672, %v992_v40  ;;  %v993_v17 = vmul.f32 %v3075_v7, %v991_v15 }
 0x990   :  { %v996_v18 = vmul.f32 %v3073_v3, %v2534_v16  ;;  %v2535_v19 = vadd.f32 -0.28449672, %v993_v17 }
 0x992   :  { %v998_v20 = vadd.f32 0.2548296, %v996_v18  ;;  %v997_v22 = vmul.f32 %v3075_v7, %v2535_v19 }
 0x994   :  { %v1000_v23 = vmul.f32 %v3073_v3, %v998_v20  ;;  %v999_v25 = vadd.f32 0.2548296, %v997_v22  ;;  %v2545_v20 = vld [vmem:[%s3959_s14] ss:$0 sm:$0xff] }
 0x996   :  { %v1010_v27 = vmul.f32 %v3077_v24, %v1000_v23  ;;  %v1001_v28 = vmul.f32 %v3075_v7, %v999_v25  ;;  %v2546_v24 = vld [vmem:[%s3960_s15] ss:$0 sm:$0xff] }
 0x998   :  { %v1012_v30 = vsub.f32 1.0, %v1010_v27  ;;  %v1011_v31 = vmul.f32 %v3079_v29, %v1001_v28 }
 0x99a   :  { %v1016_v32 = vsub.f32 0.0, %v1012_v30  ;;  %v1013_v35 = vsub.f32 1.0, %v1011_v31 }
 0x99c   :  { %v1018_v36 = vsel %vm1014_vm6, %v1012_v30, %v1016_v32  ;;  %v1017_v37 = vsub.f32 0.0, %v1013_v35 }
 0x99d   :  { %v1022_v38 = vadd.f32 1.0, %v1018_v36  ;;  %v2555_v36 = vld [vmem:[%s3950_s5 + $0x2] sm:$0x3] }
 0x99e   :  { %v1019_v21 = vsel %vm1015_vm7, %v1013_v35, %v1017_v37  ;;  %v1205_v37 = vrot.slane %v2555_v36, %v190_v45 }
 0x99f   :  { %v1023_v46 = vadd.f32 1.0, %v1019_v21  ;;  %v1024_v47 = vmul.f32 %v1022_v38, %v1020_v41 }
 0x9a1   :  { %v1025_v49 = vmul.f32 %v1023_v46, %v1021_v42  ;;  %v1209_v42 = vrot.slane %v2555_v36, %v194_v48 }
 0x9a3   :  { %v1026_v50 = vpack.c.bf16 %v1025_v49, %v1024_v47 }
 0x9a5   :  { %2826 = vmatmul.mubr.bf16.vlgmr.msra.gmra.mrb[20].mxu0 %v1026_v50 }
 0x9a6   :  { %2843 = vmatprep.mubr.msk.bf16.mxu0 %vm3275_vm1, %v3274_v44 }
 0xa78   :  { %v1132_v53 = vpop.f32.mrb[20].mxu0 }
 0xa79   :  { %v1133_v54 = vadd.f32 %v2536_v52, %v1132_v53  ;;  %v2827_v56 = vpop.f32.mrb[21].mxu0 }
 0xa7a   :  { %v1135_v57 = vpop.f32.mrb[22].mxu0 }
 0xa7b   :  { %v1136_v59 = vadd.f32 %v2536_v52, %v1135_v57  ;;  %v2828_v60 = vpop.f32.mrb[23].mxu0  ;;  %v1139_v51 = vadd.f32 %v1133_v54, %v3623_v33 }
 0xa7d   :  { %v1143_v55 = vsel %vm129_vm0, %v1139_v51, 0.0  ;;  %v1140_v61 = vadd.f32 %v1136_v59, %v3625_v34  ;;  %v3014_v34 = vld [vmem:[%s3949_s4 + $0x44] ss:$8 sps:$4 sm:$0xff]  }
 0xa7e   :  { %1144 = vadd.xlane.f32.xlu0 %v1143_v55  ;;  %1255 = vmatprep.subr.bf16.mxu1 %v3014_v34 }
 0xa7f   :  { %v1146_v62 = vsel %vm129_vm0, %v1140_v61, 0.0  ;;  %1256 = vmatpush1.bf16.msra.mxu1 %v3012_v9 }
 0xa80   :  { %1147 = vadd.xlane.f32.xlu1 %v1146_v62  ;;  %1257 = vmatprep.subr.bf16.mxu1 %v3017_v10 }
 0xa83   :  { %1258 = vmatpush1.bf16.msra.mxu1 %v3015_v11 }
 0xa84   :  { %1259 = vmatprep.subr.bf16.mxu1 %v3020_v58 }
 0xa87   :  { %1260 = vmatpush1.bf16.msra.mxu1 %v3018_v13 }
 0xa88   :  { %1261 = vmatprep.subr.bf16.mxu1 %v3023_v5 }
 0xa8b   :  { %1262 = vmatpush1.bf16.msra.mxu1 %v3021_v39 }
 0xa8c   :  { %2829 = vmatprep.subr.bf16.mxu1 %v3274_v44 }
 0xb0b   :  { %v1145_v63 = vpop.xlane.xlu0 %1144 }
 0xb0c   :  { %v1149_v0 = vmul.f32 0.015625, %v1145_v63 }
 0xb0d   :  { %v1148_v1 = vpop.xlane.xlu1 %1147 }
 0xb0e   :  { %v1151_v2 = vsub.f32 %v1139_v51, %v1149_v0  ;;  %v1150_v3 = vmul.f32 0.015625, %v1148_v1 }
 0xb10   :  { %v1152_v4 = vsub.f32 %v1140_v61, %v1150_v3  ;;  %v1153_v6 = vmul.f32 %v1151_v2, %v1151_v2 }
 0xb12   :  { %v1155_v7 = vsel %vm129_vm0, %v1153_v6, 0.0  ;;  %v1154_v8 = vmul.f32 %v1152_v4, %v1152_v4 }
 0xb13   :  { %1156 = vadd.xlane.f32.xlu0 %v1155_v7 }
 0xb14   :  { %v1158_v33 = vsel %vm129_vm0, %v1154_v8, 0.0 }
 0xb15   :  { %1159 = vadd.xlane.f32.xlu1 %v1158_v33 }
 0xba0   :  { %v1157_v14 = vpop.xlane.xlu0 %1156 }
 0xba1   :  { %v1161_v40 = vmul.f32 0.015625, %v1157_v14 }
 0xba2   :  { %v1160_v15 = vpop.xlane.xlu1 %1159 }
 0xba3   :  { %v1163_v16 = vadd.f32 1e-12, %v1161_v40  ;;  %v1162_v17 = vmul.f32 0.015625, %v1160_v15 }
 0xba5   :  { %3080 = vrsqrt.f32 %v1163_v16  ;;  %v1164_v18 = vadd.f32 1e-12, %v1162_v17 }
 0xba7   :  { %3082 = vrsqrt.f32 %v1164_v18 }
 0xbaf   :  { %v3081_v19 = vpop.eup %3080 }
 0xbb0   :  { %v1167_v22 = vmul.f32 %v3081_v19, %v1151_v2 }
 0xbb1   :  { %v3083_v23 = vpop.eup %3082 }
 0xbb2   :  { %v1175_v25 = vmul.f32 %v2545_v20, %v1167_v22  ;;  %v1168_v27 = vmul.f32 %v3083_v23, %v1152_v4 }
 0xbb4   :  { %v1183_v28 = vadd.f32 %v2546_v24, %v1175_v25  ;;  %v1176_v29 = vmul.f32 %v2545_v20, %v1168_v27 }
 0xbb6   :  { %1185 = vst.msk [vmem:[#allocation2] sm:$0xff] %vm129_vm0, %v1183_v28  ;;  %v1184_v30 = vadd.f32 %v2546_v24, %v1176_v29 }
 0xbb8   :  { %1186 = vst.msk [vmem:[#allocation2 + $0x8] sm:$0xff] %vm129_vm0, %v1184_v30 }
 0xbbd   :  { %v3710_v31 = vld [vmem:[#allocation2] sm:$0xff] }
 0xbbf   :  { %v3712_v32 = vld [vmem:[#allocation2 + $0x8] sm:$0xff] }
 0xbc0   :  { %v1189_v35 = vpack.c.bf16 %v3712_v32, %v3710_v31 }
 0xbc2   :  { %2564 = vmatmul.mubr.msk.bf16.vlgmr.msra.gmra.mrb[24].mxu1 %vm129_vm0, %v1189_v35 }
 0xbc3   :  { %2831 = vmatprep.mubr.msk.bf16.mxu1 %vm3275_vm1, %v3274_v44 }
 0xc95   :  { %v1289_v38 = vpop.f32.mrb[24].mxu1 }
 0xc96   :  { %v1290_v21 = vadd.f32 %v1289_v38, %v1205_v37  ;;  %v1291_v41 = vpop.f32.mrb[25].mxu1 }
 0xc97   :  { %v1293_v46 = vpop.f32.mrb[26].mxu1  ;;  %v1292_v59 = vadd.f32 %v1291_v41, %v1209_v42 }
 0xc98   :  { %v1298_v47 = vmul.f32 0.17677669, %v1290_v21  ;;  %v1300_v49 = vpack.c.bf16 %v1290_v21, %v1290_v21  ;;  %v1294_v50 = vadd.f32 %v1293_v46, %v1205_v37  ;;  %v1295_v52 = vpop.f32.mrb[27].mxu1 }
 0xc99   :  { %v3726_v53 = vadd.f32 %v1295_v52, %v1209_v42  ;;  %v3738_v61 = vpack.c.bf16 %v1292_v59, %v1292_v59 }
 0xc9a   :  { %1419 = vrot.lane.b32.xlu1 %v1300_v49, %s3276_s16  ;;  %1309 = vrot.lane.b32.xlu0 %v1300_v49, %s3978_s29  ;;  %v1303_v54 = vpack.c.bf16 %v1298_v47, %v1298_v47  ;;  %v1533_v56 = vpack.c.bf16 %v1294_v50, %v1294_v50  ;;  %v1299_v45 = vmul.f32 0.17677669, %v1294_v50 }
 0xc9b   :  { %v1373_v63 = vsel %vm360_vm3, %v3738_v61, 0 }
 0xc9c   :  { %v1536_v43 = vpack.c.bf16 %v1299_v45, %v1299_v45 }
 0xc9e   :  { %1652 = vrot.lane.b32.xlu0 %v1533_v56, %s3276_s16  ;;  %1417 = vrot.lane.b32.xlu1 %v1303_v54, %s3277_s21 }
 0xca2   :  { %1542 = vrot.lane.b32.xlu1 %v1533_v56, %s3978_s29  ;;  %v1534_v56 = vpack.c.bf16 %v3726_v53, %v3726_v53 }
 0xca6   :  { %1650 = vrot.lane.b32.xlu1 %v1536_v43, %s3277_s21 }
 0xd0c   :  { %v1420_v48 = vpop.permute.xlu1 %1419  ;;  %v1310_v57 = vpop.permute.xlu0 %1309 }
 0xd0d   :  { %v1425_v60 = vsel %vm297_vm2, %v1420_v48, 0  ;;  %v1315_v51 = vsel %vm297_vm2, %v1310_v57, 0 }
 0xd0e   :  { %2830 = vmatpush3.bf16.xpose.msra.mxu1 %v1315_v51  ;;  %2842 = vmatpush3.bf16.xpose.msra.mxu0 %v1425_v60 }
 0xd0f   :  { %2835 = vmatprep.subr.bf16.mxu1 %v3274_v44  ;;  %2853 = vmatprep.subr.bf16.mxu0 %v3274_v44 }
 0xd10   :  { %v1418_v55 = vpop.permute.xlu1 %1417  ;;  %v1653_v1 = vpop.permute.xlu0 %1652 }
 0xd11   :  { %v1658_v2 = vsel %vm297_vm2, %v1653_v1, 0  ;;  %v1606_v1 = vsel %vm360_vm3, %v1534_v56, 0 }
 0xd14   :  { %v1543_v62 = vpop.permute.xlu1 %1542 }
 0xd15   :  { %v1548_v0 = vsel %vm297_vm2, %v1543_v62, 0  ;;  %2832 = vmatmul.mubr.msk.bf16.vlgmr.msra.gmra.mrb[28].mxu1 %vm297_vm2, %v1303_v54  ;;  %2844 = vmatmul.mubr.msk.bf16.vlgmr.msra.gmra.mrb[24].mxu0 %vm297_vm2, %v1418_v55 }
 0xd16   :  { %2836 = vmatpush3.bf16.msra.mxu1 %v1373_v63  ;;  %2854 = vmatpush3.bf16.xpose.msra.mxu0 %v1548_v0 }
 0xd17   :  { %2855 = vmatprep.mubr.msk.bf16.mxu0 %vm3275_vm1, %v3274_v44  ;;  %2865 = vmatprep.subr.bf16.mxu0 %v3274_v44 }
 0xd18   :  { %2837 = vmatprep.mubr.msk.bf16.mxu1 %vm3275_vm1, %v3274_v44  ;;  %2847 = vmatprep.subr.bf16.mxu1 %v3274_v44  ;;  %v1651_v3 = vpop.permute.xlu1 %1650 }
 0xd1d   :  { %2856 = vmatmul.mubr.msk.bf16.vlgmr.msra.gmra.mrb[28].mxu0 %vm297_vm2, %v1536_v43 }
 0xd1e   :  { %2866 = vmatpush3.bf16.xpose.msra.mxu0 %v1658_v2  ;;  %2867 = vmatprep.mubr.msk.bf16.mxu0 %vm3275_vm1, %v3274_v44 }
 0xd1f   :  { %2877 = vmatprep.subr.bf16.mxu0 %v3274_v44 }
 0xd25   :  { %2868 = vmatmul.mubr.msk.bf16.vlgmr.msra.gmra.mrb[32].mxu0 %vm297_vm2, %v1651_v3 }
 0xd26   :  { %2885 = vmatprep.mubr.msk.bf16.mxu0 %vm3275_vm1, %v3274_v44 }
 0xde8   :  { %v1351_v4 = vpop.f32.mrb[28].mxu1  ;;  %v1461_v6 = vpop.f32.mrb[24].mxu0 }
 0xde9   :  { %v1352_v7 = vadd.f32 %v3538_v12, %v1351_v4  ;;  %v1462_v8 = vadd.f32 %v3538_v12, %v1461_v6  ;;  %v2833_v33 = vpop.f32.mrb[29].mxu1  ;;  %v2845_v34 = vpop.f32.mrb[25].mxu0 }
 0xdea   :  { %v1354_v9 = vpop.f32.mrb[30].mxu1  ;;  %v1464_v10 = vpop.f32.mrb[26].mxu0  ;;  %v3024_v34 = vld [vmem:[%s3951_s6 + $0x20] sm:$0xff]  }
 0xdeb   :  { %v2834_v11 = vpop.f32.mrb[31].mxu1  ;;  %v2846_v13 = vpop.f32.mrb[27].mxu0  ;;  %v1467_v58 = vsel %vm344_vm4, %v1462_v8, -inf  ;;  %v1357_v5 = vsel %vm344_vm4, %v1352_v7, -inf  ;;  %2878 = vmatpush3.bf16.msra.mxu0 %v3024_v34  ;;  %v3025_v9 = vld [vmem:[%s3951_s6 + $0x28] sm:$0xff]  }
 0xdec   :  { %1468 = vmax.xlane.f32.xlu1 %v1467_v58  ;;  %1358 = vmax.xlane.f32.xlu0 %v1357_v5 }
 0xded   :  { %2879 = vmatprep.subr.bf16.mxu0 %v3274_v44 }
 0xdef   :  { %2880 = vmatpush3.bf16.msra.mxu0 %v3025_v9 }
 0xdf0   :  { %v1584_v39 = vpop.f32.mrb[28].mxu0  ;;  %2881 = vmatprep.subr.bf16.mxu0 %v3274_v44 }
 0xdf1   :  { %v1585_v14 = vadd.f32 %v3547_v26, %v1584_v39  ;;  %v2857_v40 = vpop.f32.mrb[29].mxu0 }
 0xdf2   :  { %v1587_v15 = vpop.f32.mrb[30].mxu0 }
 0xdf3   :  { %v2858_v16 = vpop.f32.mrb[31].mxu0  ;;  %v1590_v12 = vsel %vm344_vm4, %v1585_v14, -inf  ;;  %v3026_v15 = vld [vmem:[%s3951_s6 + $0x30] sm:$0xff]  }
 0xdf4   :  { %1591 = vmax.xlane.f32.xlu0 %v1590_v12  ;;  %2882 = vmatpush3.bf16.msra.mxu0 %v3026_v15  ;;  %v3027_v16 = vld [vmem:[%s3951_s6 + $0x38] sm:$0xff]   ;;  %v3038_v15 = vld [vmem:[%s3957_s12 + $0x70] sm:$0xff]  }
 0xdf5   :  { %2883 = vmatprep.subr.bf16.mxu0 %v3274_v44 }
 0xdf8   :  { %v1694_v17 = vpop.f32.mrb[32].mxu0  ;;  %2884 = vmatpush3.bf16.msra.mxu0 %v3027_v16  ;;  %v3039_v16 = vld [vmem:[%s3957_s12 + $0x78] sm:$0xff]  }
 0xdf9   :  { %v1695_v18 = vadd.f32 %v3547_v26, %v1694_v17  ;;  %v2869_v19 = vpop.f32.mrb[33].mxu0  ;;  %2901 = vmatprep.subr.bf16.mxu0 %v3274_v44 }
 0xdfa   :  { %v1697_v20 = vpop.f32.mrb[34].mxu0 }
 0xdfb   :  { %v2870_v22 = vpop.f32.mrb[35].mxu0  ;;  %v1700_v23 = vsel %vm344_vm4, %v1695_v18, -inf }
 0xdfc   :  { %1701 = vmax.xlane.f32.xlu0 %v1700_v23 }
 0xe79   :  { %v1469_v24 = vpop.xlane.xlu1 %1468  ;;  %v1359_v25 = vpop.xlane.xlu0 %1358 }
 0xe7a   :  { %v1470_v27 = vsub.f32 %v1462_v8, %v1469_v24  ;;  %v1360_v28 = vsub.f32 %v1352_v7, %v1359_v25 }
 0xe7c   :  { %v1471_v29 = vmul.f32 1.442695, %v1470_v27  ;;  %v1361_v30 = vmul.f32 1.442695, %v1360_v28 }
 0xe7e   :  { %3084 = vpow2.f32 %v1471_v29 }
 0xe7f   :  { %3086 = vpow2.f32 %v1361_v30 }
 0xe81   :  { %v1592_v35 = vpop.xlane.xlu0 %1591 }
 0xe82   :  { %v1593_v36 = vsub.f32 %v1585_v14, %v1592_v35  ;;  %v2584_v35 = vld [vmem:[%s3952_s7 + $0x1] ss:$0 sm:$0xff] }
 0xe84   :  { %v1594_v37 = vmul.f32 1.442695, %v1593_v36 }
 0xe86   :  { %3088 = vpow2.f32 %v1594_v37 }
 0xe88   :  { %v3085_v38 = vpop.eup %3084 }
 0xe89   :  { %v3087_v26 = vpop.eup %3086  ;;  %v1702_v21 = vpop.xlane.xlu0 %1701  ;;  %v1473_v41 = vsel %vm344_vm4, %v3085_v38, 0.0 }
 0xe8a   :  { %v1703_v42 = vsub.f32 %v1695_v18, %v1702_v21  ;;  %1474 = vadd.xlane.f32.xlu1 %v1473_v41  ;;  %v1363_v46 = vsel %vm344_vm4, %v3087_v26, 0.0 }
 0xe8b   :  { %1364 = vadd.xlane.f32.xlu0 %v1363_v46 }
 0xe8c   :  { %v1704_v47 = vmul.f32 1.442695, %v1703_v42 }
 0xe8e   :  { %3090 = vpow2.f32 %v1704_v47 }
 0xe90   :  { %v3089_v49 = vpop.eup %3088 }
 0xe91   :  { %v1596_v50 = vsel %vm344_vm4, %v3089_v49, 0.0 }
 0xe92   :  { %1597 = vadd.xlane.f32.xlu0 %v1596_v50 }
 0xe98   :  { %v3091_v52 = vpop.eup %3090 }
 0xe99   :  { %v1706_v54 = vsel %vm344_vm4, %v3091_v52, 0.0 }
 0xe9a   :  { %1707 = vadd.xlane.f32.xlu1 %v1706_v54 }
 0xea8   :  { %1480 = vrot.lane.b32.xlu0 %v3738_v61, %s3277_s21 }
 0xeab   :  { %1713 = vrot.lane.b32.xlu1 %v1534_v56, %s3277_s21 }
 0xf17   :  { %v1475_v43 = vpop.xlane.xlu1 %1474 }
 0xf18   :  { %v1365_v45 = vpop.xlane.xlu0 %1364 }
 0xf19   :  { %3092 = vrcp.f32 %v1365_v45 }
 0xf1a   :  { %3094 = vrcp.f32 %v1475_v43 }
 0xf1f   :  { %v1598_v48 = vpop.xlane.xlu0 %1597 }
 0xf20   :  { %3096 = vrcp.f32 %v1598_v48 }
 0xf23   :  { %v3093_v57 = vpop.eup %3092  ;;  %v1481_v60 = vpop.permute.xlu0 %1480 }
 0xf24   :  { %v1367_v59 = vmul.f32 %v3093_v57, %v3087_v26  ;;  %v3095_v55 = vpop.eup %3094  ;;  %v1486_v62 = vsel %vm360_vm3, %v1481_v60, 0  ;;  %v3028_v60 = vld [vmem:[#allocation10 + $0x20] sm:$0xff]  }
 0xf25   :  { %v1477_v53 = vmul.f32 %v3095_v55, %v3085_v38  ;;  %v3031_v55 = vld [vmem:[#allocation10 + $0x38] sm:$0xff]  }
 0xf26   :  { %v1368_v51 = vpack.c.bf16 %v1367_v59, %v1367_v59 }
 0xf27   :  { %v1708_v61 = vpop.xlane.xlu1 %1707  ;;  %v1478_v63 = vpack.c.bf16 %v1477_v53, %v1477_v53 }
 0xf28   :  { %2838 = vmatmul.mubr.msk.bf16.vlgmr.msra.gmra.mrb[32].mxu1 %vm344_vm4, %v1368_v51  ;;  %3098 = vrcp.f32 %v1708_v61  ;;  %v3030_v51 = vld [vmem:[#allocation10 + $0x30] sm:$0xff]  }
 0xf29   :  { %2848 = vmatpush3.bf16.msra.mxu1 %v1486_v62  ;;  %2849 = vmatprep.mubr.msk.bf16.mxu1 %vm3275_vm1, %v3274_v44 }
 0xf2a   :  { %2859 = vmatprep.subr.bf16.mxu1 %v3274_v44  ;;  %v3097_v0 = vpop.eup %3096 }
 0xf2b   :  { %v1600_v2 = vmul.f32 %v3097_v0, %v3089_v49  ;;  %v1714_v3 = vpop.permute.xlu1 %1713 }
 0xf2c   :  { %v1719_v7 = vsel %vm360_vm3, %v1714_v3, 0 }
 0xf2d   :  { %v1601_v4 = vpack.c.bf16 %v1600_v2, %v1600_v2 }
 0xf30   :  { %2850 = vmatmul.mubr.msk.bf16.vlgmr.msra.gmra.mrb[36].mxu1 %vm344_vm4, %v1478_v63 }
 0xf31   :  { %2860 = vmatpush3.bf16.msra.mxu1 %v1606_v1  ;;  %2861 = vmatprep.mubr.msk.bf16.mxu1 %vm3275_vm1, %v3274_v44 }
 0xf32   :  { %2871 = vmatprep.subr.bf16.mxu1 %v3274_v44  ;;  %v3099_v6 = vpop.eup %3098 }
 0xf33   :  { %v1710_v8 = vmul.f32 %v3099_v6, %v3091_v52 }
 0xf35   :  { %v1711_v33 = vpack.c.bf16 %v1710_v8, %v1710_v8 }
 0xf38   :  { %2862 = vmatmul.mubr.msk.bf16.vlgmr.msra.gmra.mrb[40].mxu1 %vm344_vm4, %v1601_v4  ;;  %v2592_v4 = vld [vmem:[%s3953_s8 + $0x1] ss:$0 sm:$0xff] }
 0xf39   :  { %2872 = vmatpush3.bf16.msra.mxu1 %v1719_v7  ;;  %2873 = vmatprep.mubr.msk.bf16.mxu1 %vm3275_vm1, %v3274_v44 }
 0xf3a   :  { %2889 = vmatprep.subr.bf16.mxu1 %v3274_v44 }
 0xf40   :  { %2874 = vmatmul.mubr.msk.bf16.vlgmr.msra.gmra.mrb[44].mxu1 %vm344_vm4, %v1711_v33  ;;  %v2593_v33 = vld [vmem:[%s3954_s9 + $0x1] ss:$0 sm:$0xff] }
 0xf41   :  { %2897 = vmatprep.mubr.msk.bf16.mxu1 %vm3275_vm1, %v3274_v44  ;;  %2890 = vmatpush3.bf16.msra.mxu1 %v3028_v60 }
 0xf42   :  { %2891 = vmatprep.subr.bf16.mxu1 %v3274_v44 }
 0xffb   :  { %v1409_v10 = vpop.f32.mrb[32].mxu1 }
 0xffc   :  { %1415 = vst.msk [vmem:[#allocation3] sm:$0xff] %vm297_vm2, %v1409_v10  ;;  %v2839_v11 = vpop.f32.mrb[33].mxu1 }
 0xffd   :  { %v1412_v13 = vpop.f32.mrb[34].mxu1 }
 0xffe   :  { %v2840_v58 = vpop.f32.mrb[35].mxu1  ;;  %v3032_v13 = vld [vmem:[%s3957_s12 + $0x40] sm:$0xff]  }
 0xfff   :  { %v3033_v58 = vld [vmem:[%s3957_s12 + $0x48] sm:$0xff]  }
0x1003   :  { %v1522_v5 = vpop.f32.mrb[36].mxu1 }
0x1004   :  { %1529 = vrot.lane.b32.xlu1 %v1522_v5, %s3276_s16  ;;  %v2851_v39 = vpop.f32.mrb[37].mxu1  ;;  %v3034_v5 = vld [vmem:[%s3957_s12 + $0x50] sm:$0xff]  }
0x1005   :  { %v1525_v14 = vpop.f32.mrb[38].mxu1  ;;  %v3035_v39 = vld [vmem:[%s3957_s12 + $0x58] sm:$0xff]  }
0x1006   :  { %v2852_v40 = vpop.f32.mrb[39].mxu1  ;;  %v3036_v14 = vld [vmem:[%s3957_s12 + $0x60] sm:$0xff]  }
0x1007   :  { %v3037_v40 = vld [vmem:[%s3957_s12 + $0x68] sm:$0xff]  }
0x100b   :  { %v1642_v12 = vpop.f32.mrb[40].mxu1 }
0x100c   :  { %1648 = vst.msk [vmem:[#allocation3 + $0x8] sm:$0xff] %vm297_vm2, %v1642_v12  ;;  %v2863_v17 = vpop.f32.mrb[41].mxu1  ;;  %v2595_v12 = vld [vmem:[%s3956_s11 + $0x1] ss:$0 sm:$0xff] }
0x100d   :  { %v1645_v18 = vpop.f32.mrb[42].mxu1 }
0x100e   :  { %v2864_v19 = vpop.f32.mrb[43].mxu1 }
0x1013   :  { %v1755_v20 = vpop.f32.mrb[44].mxu1 }
0x1014   :  { %1762 = vrot.lane.b32.xlu1 %v1755_v20, %s3276_s16  ;;  %v2875_v22 = vpop.f32.mrb[45].mxu1 }
0x1015   :  { %v1758_v23 = vpop.f32.mrb[46].mxu1 }
0x1016   :  { %v2876_v24 = vpop.f32.mrb[47].mxu1 }
0x1076   :  { %v1530_v25 = vpop.permute.xlu1 %1529 }
0x1077   :  { %1532 = vst.msk [vmem:[#allocation3] sm:$0xff] %vm521_vm5, %v1530_v25 }
0x107e   :  { %v1766_v28 = vld [vmem:[#allocation3] sm:$0xff] }
0x1086   :  { %v1763_v27 = vpop.permute.xlu1 %1762 }
0x1087   :  { %1765 = vst.msk [vmem:[#allocation3 + $0x8] sm:$0xff] %vm521_vm5, %v1763_v27 }
0x108e   :  { %v1767_v29 = vld [vmem:[#allocation3 + $0x8] sm:$0xff] }
0x108f   :  { %v1768_v30 = vpack.c.bf16 %v1767_v29, %v1766_v28 }
0x1091   :  { %2886 = vmatmul.mubr.msk.bf16.vlgmr.msra.gmra.mrb[36].mxu0 %vm129_vm0, %v1768_v30 }
0x1092   :  { %2917 = vmatprep.mubr.msk.bf16.mxu0 %vm3275_vm1, %v3274_v44  ;;  %2902 = vmatpush3.bf16.msra.mxu0 %v3032_v13 }
0x1093   :  { %2903 = vmatprep.subr.bf16.mxu0 %v3274_v44 }
0x1096   :  { %2904 = vmatpush3.bf16.msra.mxu0 %v3033_v58 }
0x1097   :  { %2905 = vmatprep.subr.bf16.mxu0 %v3274_v44 }
0x109a   :  { %2906 = vmatpush3.bf16.msra.mxu0 %v3034_v5 }
0x109b   :  { %2907 = vmatprep.subr.bf16.mxu0 %v3274_v44 }
0x109e   :  { %2908 = vmatpush3.bf16.msra.mxu0 %v3035_v39 }
0x109f   :  { %2909 = vmatprep.subr.bf16.mxu0 %v3274_v44 }
0x10a2   :  { %2910 = vmatpush3.bf16.msra.mxu0 %v3036_v14 }
0x10a3   :  { %2911 = vmatprep.subr.bf16.mxu0 %v3274_v44 }
0x10a6   :  { %2912 = vmatpush3.bf16.msra.mxu0 %v3037_v40  ;;  %v2622_v40 = vld [vmem:[%s3958_s13 + $0x1] ss:$0 sm:$0xff] }
0x10a7   :  { %2913 = vmatprep.subr.bf16.mxu0 %v3274_v44 }
0x10aa   :  { %2914 = vmatpush3.bf16.msra.mxu0 %v3038_v15 }
0x10ab   :  { %2915 = vmatprep.subr.bf16.mxu0 %v3274_v44 }
0x10ae   :  { %2916 = vmatpush3.bf16.msra.mxu0 %v3039_v16 }
0x10af   :  { %2945 = vmatprep.subr.bf16.mxu0 %v3274_v44 }
0x1164   :  { %v1847_v36 = vpop.f32.mrb[36].mxu0 }
0x1165   :  { %v1848_v37 = vadd.f32 %v2584_v35, %v1847_v36  ;;  %v2887_v38 = vpop.f32.mrb[37].mxu0 }
0x1166   :  { %v1850_v26 = vpop.f32.mrb[38].mxu0 }
0x1167   :  { %v1851_v21 = vadd.f32 %v2584_v35, %v1850_v26  ;;  %v2888_v41 = vpop.f32.mrb[39].mxu0  ;;  %v1854_v42 = vadd.f32 %v1848_v37, %v3710_v31 }
0x1169   :  { %v1860_v46 = vsel %vm129_vm0, %v1854_v42, 0.0  ;;  %v1855_v47 = vadd.f32 %v1851_v21, %v3712_v32  ;;  %v3029_v32 = vld [vmem:[#allocation10 + $0x28] sm:$0xff]  }
0x116a   :  { %1861 = vadd.xlane.f32.xlu0 %v1860_v46  ;;  %2892 = vmatpush3.bf16.msra.mxu1 %v3029_v32 }
0x116b   :  { %v1863_v49 = vsel %vm129_vm0, %v1855_v47, 0.0  ;;  %2893 = vmatprep.subr.bf16.mxu1 %v3274_v44 }
0x116c   :  { %1864 = vadd.xlane.f32.xlu1 %v1863_v49 }
0x116e   :  { %2894 = vmatpush3.bf16.msra.mxu1 %v3030_v51 }
0x116f   :  { %2895 = vmatprep.subr.bf16.mxu1 %v3274_v44 }
0x1172   :  { %2896 = vmatpush3.bf16.msra.mxu1 %v3031_v55 }
0x1173   :  { %2921 = vmatprep.subr.bf16.mxu1 %v3274_v44 }
0x11f7   :  { %v1862_v50 = vpop.xlane.xlu0 %1861 }
0x11f8   :  { %v1866_v52 = vmul.f32 0.015625, %v1862_v50 }
0x11f9   :  { %v1865_v54 = vpop.xlane.xlu1 %1864 }
0x11fa   :  { %v1868_v56 = vsub.f32 %v1854_v42, %v1866_v52  ;;  %v1867_v45 = vmul.f32 0.015625, %v1865_v54 }
0x11fc   :  { %v1869_v43 = vsub.f32 %v1855_v47, %v1867_v45  ;;  %v1870_v48 = vmul.f32 %v1868_v56, %v1868_v56 }
0x11fe   :  { %v1872_v57 = vsel %vm129_vm0, %v1870_v48, 0.0  ;;  %v1871_v59 = vmul.f32 %v1869_v43, %v1869_v43 }
0x11ff   :  { %1873 = vadd.xlane.f32.xlu0 %v1872_v57 }
0x1200   :  { %v1875_v31 = vsel %vm129_vm0, %v1871_v59, 0.0 }
0x1203   :  { %1876 = vadd.xlane.f32.xlu0 %v1875_v31 }
0x128c   :  { %v1874_v62 = vpop.xlane.xlu0 %1873 }
0x128d   :  { %v1878_v53 = vmul.f32 0.015625, %v1874_v62 }
0x128f   :  { %v1880_v61 = vadd.f32 1e-12, %v1878_v53 }
0x1290   :  { %v1877_v63 = vpop.xlane.xlu0 %1876 }
0x1291   :  { %3100 = vrsqrt.f32 %v1880_v61  ;;  %v1879_v0 = vmul.f32 0.015625, %v1877_v63 }
0x1293   :  { %v1881_v1 = vadd.f32 1e-12, %v1879_v0 }
0x1295   :  { %3102 = vrsqrt.f32 %v1881_v1 }
0x129b   :  { %v3101_v2 = vpop.eup %3100 }
0x129c   :  { %v1884_v3 = vmul.f32 %v3101_v2, %v1868_v56 }
0x129e   :  { %v1892_v7 = vmul.f32 %v2592_v4, %v1884_v3 }
0x129f   :  { %v3103_v6 = vpop.eup %3102 }
0x12a0   :  { %v1885_v8 = vmul.f32 %v3103_v6, %v1869_v43  ;;  %v3838_v9 = vadd.f32 %v2593_v33, %v1892_v7 }
0x12a2   :  { %v1893_v34 = vmul.f32 %v2592_v4, %v1885_v8 }
0x12a4   :  { %v3840_v10 = vadd.f32 %v2593_v33, %v1893_v34 }
0x12a6   :  { %v1902_v11 = vpack.c.bf16 %v3840_v10, %v3838_v9 }
0x12a8   :  { %2898 = vmatmul.mubr.msk.bf16.vlgmr.msra.gmra.mrb[48].mxu1 %vm129_vm0, %v1902_v11 }
0x12a9   :  { %2929 = vmatprep.mubr.msk.bf16.mxu1 %vm3275_vm1, %v3274_v44 }
0x137b   :  { %v1981_v17 = vpop.f32.mrb[48].mxu1 }
0x137c   :  { %v1982_v18 = vadd.f32 %v2595_v12, %v1981_v17  ;;  %v2899_v19 = vpop.f32.mrb[49].mxu1 }
0x137d   :  { %v1984_v20 = vpop.f32.mrb[50].mxu1 }
0x137e   :  { %v1988_v22 = vmul.f32 0.70710677, %v1982_v18  ;;  %v1985_v23 = vadd.f32 %v2595_v12, %v1984_v20  ;;  %v2900_v24 = vpop.f32.mrb[51].mxu1  ;;  %v2036_v11 = vmul.f32 0.5, %v1982_v18 }
0x1380   :  { %v1990_v25 = vand.u32 2147483647, %v1988_v22  ;;  %v1989_v27 = vmul.f32 0.70710677, %v1985_v23  ;;  %vm2030_vm8 = vcmp.ge.f32.partialorder %v1988_v22, 0.0  ;;  %v2037_v13 = vmul.f32 0.5, %v1985_v23 }
0x1382   :  { %v1992_v28 = vmul.f32 0.3275911, %v1990_v25  ;;  %v1991_v29 = vand.u32 2147483647, %v1989_v27  ;;  %v2018_v37 = vsub.f32 0.0, %v1990_v25  ;;  %vm2031_vm9 = vcmp.ge.f32.partialorder %v1989_v27, 0.0 }
0x1384   :  { %v1994_v30 = vadd.f32 1.0, %v1992_v28  ;;  %v1993_v35 = vmul.f32 0.3275911, %v1991_v29  ;;  %v2019_v38 = vsub.f32 0.0, %v1991_v29  ;;  %v2020_v21 = vmul.f32 %v2018_v37, %v1990_v25 }
0x1386   :  { %3104 = vrcp.f32 %v1994_v30  ;;  %v1995_v36 = vadd.f32 1.0, %v1993_v35  ;;  %v2021_v47 = vmul.f32 %v2019_v38, %v1991_v29  ;;  %v2022_v49 = vmul.f32 1.442695, %v2020_v21  ;;  %v3042_v21 = vld [vmem:[#allocation12 + $0x30] sm:$0xff]  }
0x1388   :  { %3106 = vrcp.f32 %v1995_v36  ;;  %v2024_v45 = vmul.f32 1.442695, %v2021_v47 }
0x1389   :  { %3108 = vpow2.f32 %v2022_v49 }
0x138a   :  { %3110 = vpow2.f32 %v2024_v45 }
0x1390   :  { %v3105_v26 = vpop.eup %3104 }
0x1391   :  { %v2000_v41 = vmul.f32 1.0614054, %v3105_v26 }
0x1392   :  { %v3107_v42 = vpop.eup %3106 }
0x1393   :  { %v2601_v46 = vadd.f32 -1.4531521, %v2000_v41  ;;  %v2001_v50 = vmul.f32 1.0614054, %v3107_v42  ;;  %v3109_v53 = vpop.eup %3108  ;;  %v3043_v41 = vld [vmem:[#allocation12 + $0x38] sm:$0xff]  }
0x1394   :  { %v3111_v1 = vpop.eup %3110 }
0x1395   :  { %v2004_v52 = vmul.f32 %v3105_v26, %v2601_v46  ;;  %v2602_v54 = vadd.f32 -1.4531521, %v2001_v50 }
0x1397   :  { %v2006_v56 = vadd.f32 1.4214138, %v2004_v52  ;;  %v2005_v43 = vmul.f32 %v3107_v42, %v2602_v54 }
0x1399   :  { %v2008_v48 = vmul.f32 %v3105_v26, %v2006_v56  ;;  %v2007_v57 = vadd.f32 1.4214138, %v2005_v43  ;;  %v2633_v56 = vld [vmem:[%s3959_s14 + $0x1] ss:$0 sm:$0xff] }
0x139b   :  { %v2603_v59 = vadd.f32 -0.28449672, %v2008_v48  ;;  %v2009_v31 = vmul.f32 %v3107_v42, %v2007_v57  ;;  %v2634_v48 = vld [vmem:[%s3960_s15 + $0x1] ss:$0 sm:$0xff] }
0x139d   :  { %v2012_v60 = vmul.f32 %v3105_v26, %v2603_v59  ;;  %v2604_v32 = vadd.f32 -0.28449672, %v2009_v31 }
0x139f   :  { %v2014_v51 = vadd.f32 0.2548296, %v2012_v60  ;;  %v2013_v55 = vmul.f32 %v3107_v42, %v2604_v32 }
0x13a1   :  { %v2016_v62 = vmul.f32 %v3105_v26, %v2014_v51  ;;  %v2015_v61 = vadd.f32 0.2548296, %v2013_v55  ;;  %v3040_v26 = vld [vmem:[#allocation12 + $0x20] sm:$0xff]  }
0x13a2   :  { %2922 = vmatpush3.bf16.msra.mxu1 %v3040_v26 }
0x13a3   :  { %v2026_v63 = vmul.f32 %v3109_v53, %v2016_v62  ;;  %v2017_v0 = vmul.f32 %v3107_v42, %v2015_v61  ;;  %2923 = vmatprep.subr.bf16.mxu1 %v3274_v44  ;;  %v3044_v62 = vld [vmem:[#allocation12] sm:$0xff]  }
0x13a5   :  { %v2028_v2 = vsub.f32 1.0, %v2026_v63  ;;  %v2027_v3 = vmul.f32 %v3111_v1, %v2017_v0  ;;  %v3045_v1 = vld [vmem:[#allocation12 + $0x8] sm:$0xff]  }
0x13a7   :  { %v2032_v4 = vsub.f32 0.0, %v2028_v2  ;;  %v2029_v6 = vsub.f32 1.0, %v2027_v3  ;;  %v3047_v3 = vld [vmem:[#allocation12 + $0x18] sm:$0xff]  }
0x13a9   :  { %v2034_v7 = vsel %vm2030_vm8, %v2028_v2, %v2032_v4  ;;  %v2033_v8 = vsub.f32 0.0, %v2029_v6  ;;  %v3046_v2 = vld [vmem:[#allocation12 + $0x10] sm:$0xff]  }
0x13aa   :  { %v2038_v33 = vadd.f32 1.0, %v2034_v7 }
0x13ab   :  { %v2035_v34 = vsel %vm2031_vm9, %v2029_v6, %v2033_v8 }
0x13ac   :  { %v2039_v58 = vadd.f32 1.0, %v2035_v34  ;;  %v2040_v5 = vmul.f32 %v2038_v33, %v2036_v11 }
0x13ae   :  { %v2041_v39 = vmul.f32 %v2039_v58, %v2037_v13 }
0x13b0   :  { %v2042_v14 = vpack.c.bf16 %v2041_v39, %v2040_v5  ;;  %v2362_v5 = vld [vmem:[%s3962_s17] sm:$0x1] }
0x13b2   :  { %2918 = vmatmul.mubr.bf16.vlgmr.msra.gmra.mrb[40].mxu0 %v2042_v14 }
0x13b3   :  { %2953 = vmatprep.mubr.msk.bf16.mxu0 %vm3275_vm1, %v3274_v44  ;;  %2946 = vmatpush3.bf16.msra.mxu0 %v3040_v26 }
0x13b4   :  { %2947 = vmatprep.subr.bf16.mxu0 %v3274_v44 }
0x1485   :  { %v2150_v15 = vpop.f32.mrb[40].mxu0 }
0x1486   :  { %v2151_v16 = vadd.f32 %v2622_v40, %v2150_v15  ;;  %v2919_v12 = vpop.f32.mrb[41].mxu0 }
0x1487   :  { %v2153_v17 = vpop.f32.mrb[42].mxu0 }
0x1488   :  { %v2154_v19 = vadd.f32 %v2622_v40, %v2153_v17  ;;  %v2920_v20 = vpop.f32.mrb[43].mxu0  ;;  %v2157_v18 = vadd.f32 %v2151_v16, %v3838_v9  ;;  %v2466_v17 = vld [vmem:[%s3962_s17] sm:$0x1]  ;;  %s3278_s17 = smov [#allocation13]  }
0x1489   :  { %s2486_s19 = sshll.u32 %s3278_s17, 4  ;;  %s2487_s19 = int_to_ptr.vmem [resolvable:$true] %s2486_s19 }
0x148a   :  { %v2163_v22 = vsel %vm129_vm0, %v2157_v18, 0.0  ;;  %v2158_v23 = vadd.f32 %v2154_v19, %v3840_v10  ;;  %v3041_v10 = vld [vmem:[#allocation12 + $0x28] sm:$0xff]   ;;  %s3234_s10 = scalar_lea.vmem %s2487_s19, 32  ;;  %p3239_p13 = scmp.lt.s32.totalorder %s2487_s19, %s2487_s19 }
0x148b   :  { %2164 = vadd.xlane.f32.xlu0 %v2163_v22  ;;  %2924 = vmatpush3.bf16.msra.mxu1 %v3041_v10  ;;  %p3235_p12 = scmp.ne.s32.totalorder %s2487_s19, %s3234_s10  ;;  %p3240_p0 = scmp.lt.s32.totalorder %s3234_s10, %s3234_s10 }
0x148c   :  { %v2166_v24 = vsel %vm129_vm0, %v2158_v23, 0.0  ;;  %2948 = vmatpush3.bf16.msra.mxu0 %v3041_v10  ;;  %2925 = vmatprep.subr.bf16.mxu1 %v3274_v44 }
0x148d   :  { %2167 = vadd.xlane.f32.xlu1 %v2166_v24  ;;  %2949 = vmatprep.subr.bf16.mxu0 %v3274_v44  ;;  %p3241_p1 = por %p3240_p0, %p3239_p13 }
0x148f   :  { %2926 = vmatpush3.bf16.msra.mxu1 %v3042_v21  ;;  %p3242_p2 = pnand %p3241_p1, %p3235_p12 }
0x1490   :  { %2950 = vmatpush3.bf16.msra.mxu0 %v3042_v21  ;;  %2927 = vmatprep.subr.bf16.mxu1 %v3274_v44 }
0x1491   :  { %2951 = vmatprep.subr.bf16.mxu0 %v3274_v44 }
0x1493   :  { %2928 = vmatpush3.bf16.msra.mxu1 %v3043_v41 }
0x1494   :  { %2952 = vmatpush3.bf16.msra.mxu0 %v3043_v41  ;;  %2933 = vmatprep.subr.bf16.mxu1 %v3274_v44 }
0x1518   :  { %v2165_v25 = vpop.xlane.xlu0 %2164 }
0x1519   :  { %v2169_v27 = vmul.f32 0.015625, %v2165_v25 }
0x151a   :  { %v2168_v28 = vpop.xlane.xlu1 %2167 }
0x151b   :  { %v2171_v29 = vsub.f32 %v2157_v18, %v2169_v27  ;;  %v2170_v30 = vmul.f32 0.015625, %v2168_v28 }
0x151d   :  { %v2172_v35 = vsub.f32 %v2158_v23, %v2170_v30  ;;  %v2173_v36 = vmul.f32 %v2171_v29, %v2171_v29 }
0x151f   :  { %v2175_v37 = vsel %vm129_vm0, %v2173_v36, 0.0  ;;  %v2174_v38 = vmul.f32 %v2172_v35, %v2172_v35 }
0x1520   :  { %2176 = vadd.xlane.f32.xlu0 %v2175_v37 }
0x1521   :  { %v2178_v9 = vsel %vm129_vm0, %v2174_v38, 0.0 }
0x1522   :  { %2179 = vadd.xlane.f32.xlu1 %v2178_v9 }
0x15ad   :  { %v2177_v42 = vpop.xlane.xlu0 %2176 }
0x15ae   :  { %v2181_v46 = vmul.f32 0.015625, %v2177_v42 }
0x15af   :  { %v2180_v47 = vpop.xlane.xlu1 %2179 }
0x15b0   :  { %v2183_v49 = vadd.f32 1e-12, %v2181_v46  ;;  %v2182_v50 = vmul.f32 0.015625, %v2180_v47 }
0x15b2   :  { %3112 = vrsqrt.f32 %v2183_v49  ;;  %v2184_v52 = vadd.f32 1e-12, %v2182_v50 }
0x15b4   :  { %3114 = vrsqrt.f32 %v2184_v52 }
0x15bc   :  { %v3113_v54 = vpop.eup %3112 }
0x15bd   :  { %v2187_v45 = vmul.f32 %v3113_v54, %v2171_v29 }
0x15be   :  { %v3115_v43 = vpop.eup %3114 }
0x15bf   :  { %v2195_v57 = vmul.f32 %v2633_v56, %v2187_v45  ;;  %v2188_v59 = vmul.f32 %v3115_v43, %v2172_v35 }
0x15c1   :  { %v2203_v31 = vadd.f32 %v2634_v48, %v2195_v57  ;;  %v2196_v60 = vmul.f32 %v2633_v56, %v2188_v59 }
0x15c3   :  { %2205 = vst.msk [vmem:[#allocation2] sm:$0xff] %vm129_vm0, %v2203_v31  ;;  %v2204_v32 = vadd.f32 %v2634_v48, %v2196_v60 }
0x15c5   :  { %2206 = vst.msk [vmem:[#allocation2 + $0x8] sm:$0xff] %vm129_vm0, %v2204_v32 }
0x15ca   :  { %v2207_v51 = vld [vmem:[#allocation2] sm:$0xff] }
0x15cb   :  { %v2225_v55 = vpack.c.bf16 %v2207_v51, %v2207_v51 }
0x15cc   :  { %v2208_v53 = vld [vmem:[#allocation2 + $0x8] sm:$0xff] }
0x15cd   :  { %v2227_v61 = vshrl.u32 %v2225_v55, 16  ;;  %v2377_v63 = vpack.c.bf16 %v2208_v53, %v2208_v53 }
0x15cf   :  { %2930 = vmatmul.mubr.msk.bf16.vlgmr.msra.gmra.mrb[52].mxu1 %vm129_vm0, %v2227_v61  ;;  %v2379_v0 = vshrl.u32 %v2377_v63, 16 }
0x15d0   :  { %2934 = vmatpush3.bf16.msra.mxu1 %v3044_v62  ;;  %2941 = vmatprep.mubr.msk.bf16.mxu1 %vm3275_vm1, %v3274_v44 }
0x15d1   :  { %2954 = vmatmul.mubr.msk.bf16.vlgmr.msra.gmra.mrb[44].mxu0 %vm129_vm0, %v2379_v0  ;;  %2935 = vmatprep.subr.bf16.mxu1 %v3274_v44 }
0x15d4   :  { %2936 = vmatpush3.bf16.msra.mxu1 %v3045_v1 }
0x15d5   :  { %2937 = vmatprep.subr.bf16.mxu1 %v3274_v44 }
0x15d8   :  { %2938 = vmatpush3.bf16.msra.mxu1 %v3046_v2 }
0x15d9   :  { %2939 = vmatprep.subr.bf16.mxu1 %v3274_v44 }
0x15dc   :  { %2940 = vmatpush3.bf16.msra.mxu1 %v3047_v3 }
0x15dd   :  { %2957 = vmatprep.subr.bf16.mxu1 %v3274_v44 }
0x15df   :  { %2942 = vmatmul.mubr.msk.bf16.vlgmr.msra.gmra.mrb[56].mxu1 %vm129_vm0, %v2225_v55 }
0x15e0   :  { %2958 = vmatpush3.bf16.msra.mxu1 %v3044_v62  ;;  %2965 = vmatprep.mubr.msk.bf16.mxu1 %vm3275_vm1, %v3274_v44 }
0x15e1   :  { %2959 = vmatprep.subr.bf16.mxu1 %v3274_v44 }
0x15e4   :  { %2960 = vmatpush3.bf16.msra.mxu1 %v3045_v1 }
0x15e5   :  { %2961 = vmatprep.subr.bf16.mxu1 %v3274_v44 }
0x15e8   :  { %2962 = vmatpush3.bf16.msra.mxu1 %v3046_v2 }
0x15e9   :  { %2963 = vmatprep.subr.bf16.mxu1 %v3274_v44 }
0x15ec   :  { %2964 = vmatpush3.bf16.msra.mxu1 %v3047_v3 }
0x15ef   :  { %2966 = vmatmul.mubr.msk.bf16.vlgmr.msra.gmra.mrb[60].mxu1 %vm129_vm0, %v2377_v63 }
0x16a2   :  { %v2290_v4 = vpop.f32.mrb[52].mxu1 }
0x16a3   :  { %v2931_v6 = vpop.f32.mrb[53].mxu1 }
0x16a4   :  { %v2293_v7 = vpop.f32.mrb[54].mxu1  ;;  %v2418_v8 = vpop.f32.mrb[44].mxu0 }
0x16a5   :  { %v2932_v33 = vpop.f32.mrb[55].mxu1  ;;  %v2955_v34 = vpop.f32.mrb[45].mxu0 }
0x16a6   :  { %v2421_v11 = vpop.f32.mrb[46].mxu0 }
0x16a7   :  { %v2956_v13 = vpop.f32.mrb[47].mxu0 }
0x16b2   :  { %v2356_v58 = vpop.f32.mrb[56].mxu1 }
0x16b3   :  { %v2357_v39 = vadd.f32 %v2356_v58, %v2290_v4  ;;  %v2943_v14 = vpop.f32.mrb[57].mxu1 }
0x16b4   :  { %v2359_v40 = vpop.f32.mrb[58].mxu1 }
0x16b5   :  { %v2944_v44 = vpop.f32.mrb[59].mxu1  ;;  %v2363_v15 = vadd.f32 %v2362_v5, %v2357_v39 }
0x16b7   :  { %v2365_v16 = vsel %vm2364_vm10, %v2363_v15, -inf }
0x16b8   :  { %2366 = vmax.xlane.f32.xlu0 %v2365_v16 }
0x16c2   :  { %v2460_v12 = vpop.f32.mrb[60].mxu1 }
0x16c3   :  { %v2461_v19 = vadd.f32 %v2460_v12, %v2418_v8  ;;  %v2967_v20 = vpop.f32.mrb[61].mxu1 }
0x16c4   :  { %v2463_v18 = vpop.f32.mrb[62].mxu1 }
0x16c5   :  { %v2968_v22 = vpop.f32.mrb[63].mxu1  ;;  %v2467_v23 = vadd.f32 %v2466_v17, %v2461_v19 }
0x16c7   :  { %v2468_v24 = vsel %vm2364_vm10, %v2467_v23, -inf }
0x16c8   :  { %2469 = vmax.xlane.f32.xlu1 %v2468_v24 }
0x1745   :  { %v2367_v25 = vpop.xlane.xlu0 %2366 }
0x1746   :  { %v2368_v27 = vsub.f32 %v2363_v15, %v2367_v25 }
0x1748   :  { %v2369_v28 = vmul.f32 1.442695, %v2368_v27 }
0x174a   :  { %3116 = vpow2.f32 %v2369_v28 }
0x1754   :  { %v3117_v29 = vpop.eup %3116 }
0x1755   :  { %v2470_v30 = vpop.xlane.xlu1 %2469  ;;  %v2371_v35 = vsel %vm2364_vm10, %v3117_v29, 0.0 }
0x1756   :  { %v2471_v36 = vsub.f32 %v2467_v23, %v2470_v30  ;;  %2372 = vadd.xlane.f32.xlu0 %v2371_v35 }
0x1758   :  { %v2472_v37 = vmul.f32 1.442695, %v2471_v36 }
0x175a   :  { %3118 = vpow2.f32 %v2472_v37 }
0x1764   :  { %v3119_v38 = vpop.eup %3118 }
0x1765   :  { %v2474_v9 = vsel %vm2364_vm10, %v3119_v38, 0.0 }
0x1766   :  { %2475 = vadd.xlane.f32.xlu1 %v2474_v9 }
0x17e3   :  { %v2373_v26 = vpop.xlane.xlu0 %2372 }
0x17e4   :  { %3120 = vrcp.f32 %v2373_v26 }
0x17ee   :  { %v3121_v10 = vpop.eup %3120 }
0x17ef   :  { %v2375_v21 = vmul.f32 %v3121_v10, %v3117_v29 }
0x17f1   :  { %2376 = vst [vmem:[#allocation13] sm:$0x1] %v2375_v21 }
0x17f3   :  { %v2476_v41 = vpop.xlane.xlu1 %2475 }
0x17f4   :  { %3122 = vrcp.f32 %v2476_v41 }
0x17fe   :  { %v3123_v42 = vpop.eup %3122 }
0x17ff   :  { %v2478_v46 = vmul.f32 %v3123_v42, %v3119_v38 }
0x1801   :  { %2479 = vst [vmem:[#allocation13 + $0x1] sm:$0x1] %v2478_v46 }
0x1802   :  { %3245 = shalt.err (!%p3242_p2)
}
0x1803   :  { %s3980_s9 = sld [smem:[#allocation21_spill]] }
0x1809   :  { %s3246_s24 = scalar_lea.hbm %s3980_s9, 32 }
0x180a   :  { %p3247_p3 = scmp.ne.s32.totalorder %s3980_s9, %s3246_s24  ;;  %p3250_p4 = scmp.lt.u32.totalorder %s3246_s24, %s3980_s9 }
0x180c   :  { %p3252_p5 = pnand %p3250_p4, %p3247_p3 }
0x180e   :  { %3255 = shalt.err (!%p3252_p5)
}
0x180f   :  { %2489 = dma.vmem_to_hbm [thread:$0]  %s2487_s19, 32, %s3980_s9, [#allocation6]  }
0x1810   :  { %3262 = dma.done.wait [#allocation6], 32  }
0x1811   :  { %3263 = vsyncadd [#allocation6], 4294967264 }
0x1812   :  { %2493 = vsyncpa [#allocation5], 1 }
0x1813   :  { %2494 = vsyncpa [#allocation8], 1 }
0x1814   :  { %2495 = vsyncpa [#allocation11], 1 }
0x1815   :  { %2496 = vsyncpa [#allocation6], 1 }

</bundles_post_ra>
